<compile_context>
chip_gen: v6e
topology: v6e:2x2x1
jax: 0.10.0
libtpu: 0.0.40
codegen_flags: <defaults>
</compile_context>

<pallas_src>
import functools

import jax
import jax.numpy as jnp
from jax import lax
from jax.experimental import pallas as pl
from jax.experimental.pallas import tpu as pltpu

_INV_SQRT2 = 0.7071067811865476


def _gelu_exact(x):
    # PyTorch nn.GELU() default = exact (erf-based) GELU.
    return 0.5 * x * (1.0 + lax.erf(x * jnp.float32(_INV_SQRT2)))


def _conv_block_kernel(x_ref, w_ref, b_ref, o_ref, patch_ref, *,
                       B, KH, KW, stride, Ho, Wo, pool, Hp, Wp):
    """Fused Conv2d + GELU + MaxPool for one batch block.

    x_ref:     (B, Hpad, Wpad, Cin)      padded input tile (NHWC)
    w_ref:     (KH*KW*Cin, Cpad)         conv weights, bf16, Cout padded to 128
    b_ref:     (1, Cpad)                 conv bias, f32 (zeros in pad lanes)
    o_ref:     (B, Hp, Wp, Cpad)         pooled output tile (lane-dense store)
    patch_ref: (B, Ho, Wo, KH*KW*Cin)    VMEM scratch holding the im2col matrix
    """
    Cin = x_ref.shape[-1]
    Cpad = o_ref.shape[-1]
    Ktot = KH * KW * Cin

    x = x_ref[...].astype(jnp.float32)                       # (B, Hpad, Wpad, Cin)

    # --- im2col: write each conv tap into its column block of the scratch ---
    for kh in range(KH):
        for kw in range(KW):
            col = (kh * KW + kw) * Cin
            patch_ref[:, :, :, col:col + Cin] = x[
                :, kh:kh + stride * Ho:stride, kw:kw + stride * Wo:stride, :]

    # --- single MXU matmul: (M, K) @ (K, Cpad), bf16 inputs / f32 accumulate ---
    patches = patch_ref[...].reshape(B * Ho * Wo, Ktot).astype(jnp.bfloat16)
    acc = jnp.dot(patches, w_ref[...], preferred_element_type=jnp.float32)

    # --- bias + exact GELU (lane-dense f32, VPU/EUP) ---
    y = _gelu_exact(acc + b_ref[...])                        # (M, Cpad)

    # --- MaxPool2d(pool), floor semantics, via aligned slices + maximum ---
    y = y.reshape(B, Ho, Wo, Cpad)
    if (Ho != Hp * pool) or (Wo != Wp * pool):               # crop (floor)
        y = y[:, :Hp * pool, :Wp * pool, :]
    # pool along W: fold the pool window into the lane axis -> 128-aligned slices
    yw = y.reshape(B, Hp * pool, Wp, pool * Cpad)
    pw = yw[..., 0:Cpad]
    for d in range(1, pool):
        pw = jnp.maximum(pw, yw[..., d * Cpad:(d + 1) * Cpad])
    # pool along H: split the (major) row axis -> whole-tile unit slices
    ph6 = pw.reshape(B, Hp, pool, Wp, Cpad)
    ph = ph6[:, :, 0, :, :]
    for d in range(1, pool):
        ph = jnp.maximum(ph, ph6[:, :, d, :, :])

    o_ref[...] = ph.astype(o_ref.dtype)


def _pick_batch_block(n, cap=8):
    """Largest divisor of n that is <= cap (images processed per grid step)."""
    b = min(n, cap)
    while n % b:
        b -= 1
    return b


@functools.partial(jax.jit, static_argnames=("stride", "padding", "pool_size"))
def conv_block(x_nchw, weight, bias, *, stride=1, padding=0, pool_size=2):
    """Pallas ConvBlock forward. x_nchw: (N, Cin, H, W); weight: (Cout, Cin, KH, KW)."""
    N, Cin, H, W = x_nchw.shape
    Cout, _, KH, KW = weight.shape

    # NHWC + spatial padding (tiny tensors; an NHWC interface would remove these ops).
    x = jnp.transpose(x_nchw, (0, 2, 3, 1))
    if padding > 0:
        x = jnp.pad(x, ((0, 0), (padding, padding), (padding, padding), (0, 0)))
    Hpad, Wpad = H + 2 * padding, W + 2 * padding
    Ho = (Hpad - KH) // stride + 1
    Wo = (Wpad - KW) // stride + 1
    Hp, Wp = Ho // pool_size, Wo // pool_size

    LANE = 128
    Cpad = pl.cdiv(Cout, LANE) * LANE
    Ktot = KH * KW * Cin

    # OIHW -> (KH, KW, Cin, Cout) -> (Ktot, Cout); pad the N dim to 128; bf16 for MXU.
    w2 = jnp.transpose(weight, (2, 3, 1, 0)).reshape(Ktot, Cout)
    w2 = jnp.pad(w2, ((0, 0), (0, Cpad - Cout))).astype(jnp.bfloat16)
    b2 = jnp.pad(bias.astype(jnp.float32), (0, Cpad - Cout)).reshape(1, Cpad)

    BB = _pick_batch_block(N)
    grid = (N // BB,)

    kernel = functools.partial(
        _conv_block_kernel, B=BB, KH=KH, KW=KW, stride=stride,
        Ho=Ho, Wo=Wo, pool=pool_size, Hp=Hp, Wp=Wp)

    cost = pl.CostEstimate(
        flops=2 * N * Ho * Wo * Ktot * Cpad,
        transcendentals=N * Ho * Wo * Cpad,
        bytes_accessed=(x.size * x.dtype.itemsize + w2.size * 2 + b2.size * 4
                        + N * Hp * Wp * Cpad * x_nchw.dtype.itemsize))

    out = pl.pallas_call(
        kernel,
        out_shape=jax.ShapeDtypeStruct((N, Hp, Wp, Cpad), x_nchw.dtype),
        grid=grid,
        in_specs=[
            pl.BlockSpec((BB, Hpad, Wpad, Cin), lambda n: (n, 0, 0, 0)),
            pl.BlockSpec((Ktot, Cpad), lambda n: (0, 0)),
            pl.BlockSpec((1, Cpad), lambda n: (0, 0)),
        ],
        out_specs=pl.BlockSpec((BB, Hp, Wp, Cpad), lambda n: (n, 0, 0, 0)),
        scratch_shapes=[pltpu.VMEM((BB, Ho, Wo, Ktot), jnp.float32)],
        compiler_params=pltpu.CompilerParams(dimension_semantics=("parallel",)),
        cost_estimate=cost,
    )(x, w2, b2)

    out = out[..., :Cout]                                    # strip channel pad
    return jnp.transpose(out, (0, 3, 1, 2))                  # back to NCHW


def _reference(x_nchw, weight, bias, *, stride=1, padding=0, pool_size=2):
    """Pure-JAX reference matching PyTorch semantics (validation only)."""
    y = lax.conv_general_dilated(
        x_nchw.astype(jnp.float32), weight.astype(jnp.float32),
        window_strides=(stride, stride),
        padding=[(padding, padding), (padding, padding)],
        dimension_numbers=("NCHW", "OIHW", "NCHW"))
    y = y + bias.astype(jnp.float32)[None, :, None, None]
    y = 0.5 * y * (1.0 + lax.erf(y * jnp.float32(_INV_SQRT2)))
    y = lax.reduce_window(y, -jnp.inf, lax.max,
                          (1, 1, pool_size, pool_size),
                          (1, 1, pool_size, pool_size), "VALID")
    return y.astype(x_nchw.dtype)


if __name__ == "__main__":
    # ConvBlock(in_channels=4, out_channels=8), kernel_size=3, stride=1,
    # padding=0, pool_size=2, bias=True.
    N, Cin, H, W = 2, 4, 16, 16
    Cout, KH, KW = 8, 3, 3
    stride, padding, pool_size = 1, 0, 2

    key = jax.random.PRNGKey(0)
    kx, kw, kb = jax.random.split(key, 3)
    x = jax.random.normal(kx, (N, Cin, H, W), dtype=jnp.float32)
    fan_in = Cin * KH * KW
    bound = 1.0 / (fan_in ** 0.5)
    weight = jax.random.uniform(kw, (Cout, Cin, KH, KW),
                                minval=-bound, maxval=bound, dtype=jnp.float32)
    bias = jax.random.uniform(kb, (Cout,), minval=-bound, maxval=bound,
                              dtype=jnp.float32)

    out = conv_block(x, weight, bias, stride=stride, padding=padding,
                     pool_size=pool_size)
    out = jax.block_until_ready(out)

    ref = _reference(x, weight, bias, stride=stride, padding=padding,
                     pool_size=pool_size)
    Hp = ((H + 2 * padding - KH) // stride + 1) // pool_size
    Wp = ((W + 2 * padding - KW) // stride + 1) // pool_size
    assert out.shape == (N, Cout, Hp, Wp), out.shape
    # bf16 MXU inputs with f32 accumulation -> relaxed tolerance vs f32 reference.
    assert jnp.allclose(out, ref, atol=2e-2, rtol=2e-2), \
        f"mismatch vs reference: max abs err {jnp.max(jnp.abs(out - ref))}"
    print("KERNEL_OK")
</pallas_src>

<mosaic_0001>
module attributes {stable_mosaic.version = 11 : i64} {
  func.func @_conv_block_kernel(%arg0: i32, %arg1: memref<2x16x16x4xf32, #tpu.memory_space<vmem>>, %arg2: memref<36x128xbf16, #tpu.memory_space<vmem>>, %arg3: memref<1x128xf32, #tpu.memory_space<vmem>>, %arg4: memref<2x7x7x128xf32, #tpu.memory_space<vmem>>, %arg5: memref<2x14x14x36xf32, #tpu.memory_space<vmem>>) attributes {dimension_semantics = [#tpu.dimension_semantics<parallel>], iteration_bounds = array<i64: 1>, scalar_prefetch = 0 : i64, scratch_operands = 1 : i64, tpu.core_type = #tpu.core_type<tc>, window_params = [{transform_indices = @transform_0, window_bounds = array<i64: 2, 16, 16, 4>}, {pipeline_mode = #tpu.pipeline_mode<synchronous>, transform_indices = @transform_1, window_bounds = array<i64: 36, 128>}, {pipeline_mode = #tpu.pipeline_mode<synchronous>, transform_indices = @transform_2, window_bounds = array<i64: 1, 128>}, {transform_indices = @transform_3, window_bounds = array<i64: 2, 7, 7, 128>}]} {
    %c0 = arith.constant 0 : index
    %c0_0 = arith.constant 0 : index
    %c0_1 = arith.constant 0 : index
    %c0_2 = arith.constant 0 : index
    %0 = vector.load %arg1[%c0, %c0_0, %c0_1, %c0_2] : memref<2x16x16x4xf32, #tpu.memory_space<vmem>>, vector<2x16x16x4xf32>
    %1 = vector.extract_strided_slice %0 {offsets = [0, 0, 0, 0], sizes = [2, 14, 14, 4], strides = [1, 1, 1, 1]} : vector<2x16x16x4xf32> to vector<2x14x14x4xf32>
    %c0_3 = arith.constant 0 : index
    %c0_4 = arith.constant 0 : index
    %c0_5 = arith.constant 0 : index
    %c0_6 = arith.constant 0 : index
    %2 = vector.load %arg5[%c0_3, %c0_4, %c0_5, %c0_6] : memref<2x14x14x36xf32, #tpu.memory_space<vmem>>, vector<2x14x14x4xf32>
    tpu.vector_store %arg5[%c0_3, %c0_4, %c0_5, %c0_6], %1 {strides = array<i32>} : memref<2x14x14x36xf32, #tpu.memory_space<vmem>>, vector<2x14x14x4xf32>,
    %3 = vector.extract_strided_slice %0 {offsets = [0, 0, 1, 0], sizes = [2, 14, 14, 4], strides = [1, 1, 1, 1]} : vector<2x16x16x4xf32> to vector<2x14x14x4xf32>
    %c0_7 = arith.constant 0 : index
    %c0_8 = arith.constant 0 : index
    %c0_9 = arith.constant 0 : index
    %c4 = arith.constant 4 : index
    %4 = vector.load %arg5[%c0_7, %c0_8, %c0_9, %c4] : memref<2x14x14x36xf32, #tpu.memory_space<vmem>>, vector<2x14x14x4xf32>
    tpu.vector_store %arg5[%c0_7, %c0_8, %c0_9, %c4], %3 {strides = array<i32>} : memref<2x14x14x36xf32, #tpu.memory_space<vmem>>, vector<2x14x14x4xf32>,
    %5 = vector.extract_strided_slice %0 {offsets = [0, 0, 2, 0], sizes = [2, 14, 14, 4], strides = [1, 1, 1, 1]} : vector<2x16x16x4xf32> to vector<2x14x14x4xf32>
    %c0_10 = arith.constant 0 : index
    %c0_11 = arith.constant 0 : index
    %c0_12 = arith.constant 0 : index
    %c8 = arith.constant 8 : index
    %6 = vector.load %arg5[%c0_10, %c0_11, %c0_12, %c8] : memref<2x14x14x36xf32, #tpu.memory_space<vmem>>, vector<2x14x14x4xf32>
    tpu.vector_store %arg5[%c0_10, %c0_11, %c0_12, %c8], %5 {strides = array<i32>} : memref<2x14x14x36xf32, #tpu.memory_space<vmem>>, vector<2x14x14x4xf32>,
    %7 = vector.extract_strided_slice %0 {offsets = [0, 1, 0, 0], sizes = [2, 14, 14, 4], strides = [1, 1, 1, 1]} : vector<2x16x16x4xf32> to vector<2x14x14x4xf32>
    %c0_13 = arith.constant 0 : index
    %c0_14 = arith.constant 0 : index
    %c0_15 = arith.constant 0 : index
    %c12 = arith.constant 12 : index
    %8 = vector.load %arg5[%c0_13, %c0_14, %c0_15, %c12] : memref<2x14x14x36xf32, #tpu.memory_space<vmem>>, vector<2x14x14x4xf32>
    tpu.vector_store %arg5[%c0_13, %c0_14, %c0_15, %c12], %7 {strides = array<i32>} : memref<2x14x14x36xf32, #tpu.memory_space<vmem>>, vector<2x14x14x4xf32>,
    %9 = vector.extract_strided_slice %0 {offsets = [0, 1, 1, 0], sizes = [2, 14, 14, 4], strides = [1, 1, 1, 1]} : vector<2x16x16x4xf32> to vector<2x14x14x4xf32>
    %c0_16 = arith.constant 0 : index
    %c0_17 = arith.constant 0 : index
    %c0_18 = arith.constant 0 : index
    %c16 = arith.constant 16 : index
    %10 = vector.load %arg5[%c0_16, %c0_17, %c0_18, %c16] : memref<2x14x14x36xf32, #tpu.memory_space<vmem>>, vector<2x14x14x4xf32>
    tpu.vector_store %arg5[%c0_16, %c0_17, %c0_18, %c16], %9 {strides = array<i32>} : memref<2x14x14x36xf32, #tpu.memory_space<vmem>>, vector<2x14x14x4xf32>,
    %11 = vector.extract_strided_slice %0 {offsets = [0, 1, 2, 0], sizes = [2, 14, 14, 4], strides = [1, 1, 1, 1]} : vector<2x16x16x4xf32> to vector<2x14x14x4xf32>
    %c0_19 = arith.constant 0 : index
    %c0_20 = arith.constant 0 : index
    %c0_21 = arith.constant 0 : index
    %c20 = arith.constant 20 : index
    %12 = vector.load %arg5[%c0_19, %c0_20, %c0_21, %c20] : memref<2x14x14x36xf32, #tpu.memory_space<vmem>>, vector<2x14x14x4xf32>
    tpu.vector_store %arg5[%c0_19, %c0_20, %c0_21, %c20], %11 {strides = array<i32>} : memref<2x14x14x36xf32, #tpu.memory_space<vmem>>, vector<2x14x14x4xf32>,
    %13 = vector.extract_strided_slice %0 {offsets = [0, 2, 0, 0], sizes = [2, 14, 14, 4], strides = [1, 1, 1, 1]} : vector<2x16x16x4xf32> to vector<2x14x14x4xf32>
    %c0_22 = arith.constant 0 : index
    %c0_23 = arith.constant 0 : index
    %c0_24 = arith.constant 0 : index
    %c24 = arith.constant 24 : index
    %14 = vector.load %arg5[%c0_22, %c0_23, %c0_24, %c24] : memref<2x14x14x36xf32, #tpu.memory_space<vmem>>, vector<2x14x14x4xf32>
    tpu.vector_store %arg5[%c0_22, %c0_23, %c0_24, %c24], %13 {strides = array<i32>} : memref<2x14x14x36xf32, #tpu.memory_space<vmem>>, vector<2x14x14x4xf32>,
    %15 = vector.extract_strided_slice %0 {offsets = [0, 2, 1, 0], sizes = [2, 14, 14, 4], strides = [1, 1, 1, 1]} : vector<2x16x16x4xf32> to vector<2x14x14x4xf32>
    %c0_25 = arith.constant 0 : index
    %c0_26 = arith.constant 0 : index
    %c0_27 = arith.constant 0 : index
    %c28 = arith.constant 28 : index
    %16 = vector.load %arg5[%c0_25, %c0_26, %c0_27, %c28] : memref<2x14x14x36xf32, #tpu.memory_space<vmem>>, vector<2x14x14x4xf32>
    tpu.vector_store %arg5[%c0_25, %c0_26, %c0_27, %c28], %15 {strides = array<i32>} : memref<2x14x14x36xf32, #tpu.memory_space<vmem>>, vector<2x14x14x4xf32>,
    %17 = vector.extract_strided_slice %0 {offsets = [0, 2, 2, 0], sizes = [2, 14, 14, 4], strides = [1, 1, 1, 1]} : vector<2x16x16x4xf32> to vector<2x14x14x4xf32>
    %c0_28 = arith.constant 0 : index
    %c0_29 = arith.constant 0 : index
    %c0_30 = arith.constant 0 : index
    %c32 = arith.constant 32 : index
    %18 = vector.load %arg5[%c0_28, %c0_29, %c0_30, %c32] : memref<2x14x14x36xf32, #tpu.memory_space<vmem>>, vector<2x14x14x4xf32>
    tpu.vector_store %arg5[%c0_28, %c0_29, %c0_30, %c32], %17 {strides = array<i32>} : memref<2x14x14x36xf32, #tpu.memory_space<vmem>>, vector<2x14x14x4xf32>,
    %c0_31 = arith.constant 0 : index
    %c0_32 = arith.constant 0 : index
    %c0_33 = arith.constant 0 : index
    %c0_34 = arith.constant 0 : index
    %19 = vector.load %arg5[%c0_31, %c0_32, %c0_33, %c0_34] : memref<2x14x14x36xf32, #tpu.memory_space<vmem>>, vector<2x14x14x36xf32>
    %20 = vector.shape_cast %19 : vector<2x14x14x36xf32> to vector<392x36xf32>
    %21 = arith.truncf %20 : vector<392x36xf32> to vector<392x36xbf16>
    %c0_35 = arith.constant 0 : index
    %c0_36 = arith.constant 0 : index
    %22 = vector.load %arg2[%c0_35, %c0_36] : memref<36x128xbf16, #tpu.memory_space<vmem>>, vector<36x128xbf16>
    %cst = arith.constant dense<0.000000e+00> : vector<392x128xf32>
    %23 = tpu.matmul %21, %22, %cst {dimension_numbers = #tpu.dot_dimension_numbers<[1], [0], [0], [1], [0, 0, 1, 1], [], []>} : vector<392x36xbf16>, vector<36x128xbf16>, vector<392x128xf32> -> vector<392x128xf32>
    %c0_37 = arith.constant 0 : index
    %c0_38 = arith.constant 0 : index
    %24 = vector.load %arg3[%c0_37, %c0_38] : memref<1x128xf32, #tpu.memory_space<vmem>>, vector<1x128xf32>
    %25 = vector.broadcast %24 : vector<1x128xf32> to vector<392x128xf32>
    %26 = arith.addf %23, %25 : vector<392x128xf32>
    %cst_39 = arith.constant 5.000000e-01 : f32
    %27 = vector.broadcast %cst_39 : f32 to vector<392x128xf32>
    %28 = arith.mulf %27, %26 : vector<392x128xf32>
    %cst_40 = arith.constant 0.707106769 : f32
    %29 = vector.broadcast %cst_40 : f32 to vector<392x128xf32>
    %30 = arith.mulf %26, %29 : vector<392x128xf32>
    %31 = math.erf %30 : vector<392x128xf32>
    %cst_41 = arith.constant 1.000000e+00 : f32
    %32 = vector.broadcast %cst_41 : f32 to vector<392x128xf32>
    %33 = arith.addf %32, %31 : vector<392x128xf32>
    %34 = arith.mulf %28, %33 : vector<392x128xf32>
    %35 = vector.shape_cast %34 : vector<392x128xf32> to vector<2x14x14x128xf32>
    %36 = vector.shape_cast %35 : vector<2x14x14x128xf32> to vector<2x14x7x256xf32>
    %37 = vector.extract_strided_slice %36 {offsets = [0, 0, 0, 0], sizes = [2, 14, 7, 128], strides = [1, 1, 1, 1]} : vector<2x14x7x256xf32> to vector<2x14x7x128xf32>
    %38 = vector.extract_strided_slice %36 {offsets = [0, 0, 0, 128], sizes = [2, 14, 7, 128], strides = [1, 1, 1, 1]} : vector<2x14x7x256xf32> to vector<2x14x7x128xf32>
    %39 = arith.maximumf %37, %38 : vector<2x14x7x128xf32>
    %40 = vector.shape_cast %39 : vector<2x14x7x128xf32> to vector<2x7x2x7x128xf32>
    %41 = vector.extract_strided_slice %40 {offsets = [0, 0, 0, 0, 0], sizes = [2, 7, 1, 7, 128], strides = [1, 1, 1, 1, 1]} : vector<2x7x2x7x128xf32> to vector<2x7x1x7x128xf32>
    %42 = vector.shape_cast %41 : vector<2x7x1x7x128xf32> to vector<2x7x7x128xf32>
    %43 = vector.extract_strided_slice %40 {offsets = [0, 0, 1, 0, 0], sizes = [2, 7, 1, 7, 128], strides = [1, 1, 1, 1, 1]} : vector<2x7x2x7x128xf32> to vector<2x7x1x7x128xf32>
    %44 = vector.shape_cast %43 : vector<2x7x1x7x128xf32> to vector<2x7x7x128xf32>
    %45 = arith.maximumf %42, %44 : vector<2x7x7x128xf32>
    %c0_42 = arith.constant 0 : index
    %c0_43 = arith.constant 0 : index
    %c0_44 = arith.constant 0 : index
    %c0_45 = arith.constant 0 : index
    %46 = vector.load %arg4[%c0_42, %c0_43, %c0_44, %c0_45] : memref<2x7x7x128xf32, #tpu.memory_space<vmem>>, vector<2x7x7x128xf32>
    tpu.vector_store %arg4[%c0_42, %c0_43, %c0_44, %c0_45], %45 {strides = array<i32>} : memref<2x7x7x128xf32, #tpu.memory_space<vmem>>, vector<2x7x7x128xf32>,
    return
  }
  func.func @transform_0(%arg0: i32) -> (i32, i32, i32, i32) {
    %c0_i32 = arith.constant 0 : i32
    %c0_i32_0 = arith.constant 0 : i32
    %c0_i32_1 = arith.constant 0 : i32
    %c0_i32_2 = arith.constant 0 : i32
    return %arg0, %c0_i32, %c0_i32_0, %c0_i32_1 : i32, i32, i32, i32
  }
  func.func @transform_1(%arg0: i32) -> (i32, i32) {
    %c0_i32 = arith.constant 0 : i32
    %c0_i32_0 = arith.constant 0 : i32
    %c0_i32_1 = arith.constant 0 : i32
    return %c0_i32, %c0_i32_0 : i32, i32
  }
  func.func @transform_2(%arg0: i32) -> (i32, i32) {
    %c0_i32 = arith.constant 0 : i32
    %c0_i32_0 = arith.constant 0 : i32
    %c0_i32_1 = arith.constant 0 : i32
    return %c0_i32, %c0_i32_0 : i32, i32
  }
  func.func @transform_3(%arg0: i32) -> (i32, i32, i32, i32) {
    %c0_i32 = arith.constant 0 : i32
    %c0_i32_0 = arith.constant 0 : i32
    %c0_i32_1 = arith.constant 0 : i32
    %c0_i32_2 = arith.constant 0 : i32
    return %arg0, %c0_i32, %c0_i32_0, %c0_i32_1 : i32, i32, i32, i32
  }
}

</mosaic_0001>

<bundles_post_ra>
// kernel: conv_block.1
= control target key start
LH: loop header
LB: loop body
LE: loop exit
PB: predicated region body
PF: predicated region fallthrough
CT: control target
= control target key end

     0   :  { %vm81_vm0 = vcmask 29696   ;;  %vm79_vm1 = vcmask 31744   ;;  %s5525_s18 = smov 4   ;;  %s5526_s21 = smov 8   ;;  %vm361_vm2 = vcmask 64545   ;;  %vm363_vm3 = vcmask 63520   ;;  %s8713_s0 = inlined_call_operand.vmem [shape: f32[2,16,16,4], index: 0, kind: input, shape index: {}]   ;;  %s8714_s1 = inlined_call_operand.vmem [shape: bf16[36,128], index: 1, kind: input, shape index: {}]   ;;  %s8715_s2 = inlined_call_operand.vmem [shape: f32[1,128], index: 2, kind: input, shape index: {}]   ;;  %s8716_s3 = inlined_call_operand.vmem [shape: f32[2,7,7,128], index: 3, kind: output, shape index: {}]  }
   0x1   :  { %v5559_v0 = vld [vmem:[%s8713_s0 + $0x10] sm:$0xff]  ;;  %v5564_v1 = vld [vmem:[%s8713_s0] sm:$0xff]  ;;  %v5569_v2 = vld [vmem:[%s8713_s0 + $0x18] sm:$0xff]  ;;  %vm589_vm4 = vcmask 97344   ;;  %vm587_vm5 = vcmask 97346   ;;  %s5528_s30 = smov 16  }
   0x2   :  { %197 = vrot.lane.b32.xlu1 %v5559_v0, %s5525_s18  ;;  %193 = vrot.lane.b32.xlu0 %v5564_v1, %s5525_s18  ;;  %v5578_v3 = vld [vmem:[%s8713_s0 + $0x8] sm:$0xff]  ;;  %84 = vst.msk [vmem:[#allocation2 + $0x18] sm:$0x3f] %vm81_vm0, %v5569_v2  ;;  %v5598_v5 = vld [vmem:[%s8713_s0 + $0x20] sm:$0xff]  ;;  %vm819_vm6 = vcmask 128096   ;;  %vm817_vm7 = vcmask 130144  }
   0x3   :  { %v5585_v4 = vld [vmem:[%s8713_s0 + $0x28] sm:$0xff]  ;;  %80 = vst.msk [vmem:[#allocation2] sm:$0xff] %vm79_vm1, %v5564_v1  ;;  %83 = vst.msk [vmem:[#allocation2 + $0x10] sm:$0xff] %vm79_vm1, %v5559_v0  ;;  %v5603_v6 = vld [vmem:[%s8713_s0 + $0x38] sm:$0xff]  ;;  %s5529_s4 = smov 20   ;;  %vm1045_vm8 = vcmask 161920  }
   0x4   :  { %82 = vst.msk [vmem:[#allocation2 + $0x8] sm:$0x3f] %vm81_vm0, %v5578_v3  ;;  %86 = vst.msk [vmem:[#allocation2 + $0x28] sm:$0x3f] %vm81_vm0, %v5585_v4  ;;  %v5608_v7 = vld [vmem:[%s8713_s0 + $0x30] sm:$0xff]  ;;  %v5615_v8 = vld [vmem:[%s8713_s0 + $0x48] sm:$0xff] }
   0x5   :  { %88 = vst.msk [vmem:[#allocation2 + $0x38] sm:$0x3f] %vm81_vm0, %v5603_v6  ;;  %v5620_v9 = vld [vmem:[%s8713_s0 + $0x40] sm:$0xff]  ;;  %v5625_v10 = vld [vmem:[%s8713_s0 + $0x58] sm:$0xff]  ;;  %90 = vst.msk [vmem:[#allocation2 + $0x48] sm:$0x3f] %vm81_vm0, %v5615_v8 }
   0x6   :  { %85 = vst.msk [vmem:[#allocation2 + $0x20] sm:$0xff] %vm79_vm1, %v5598_v5  ;;  %87 = vst.msk [vmem:[#allocation2 + $0x30] sm:$0xff] %vm79_vm1, %v5608_v7  ;;  %v5638_v11 = vld [vmem:[%s8713_s0 + $0x50] sm:$0xff]  ;;  %v5643_v12 = vld [vmem:[%s8713_s0 + $0x68] sm:$0xff]  ;;  %199 = vrot.lane.b32.xlu1 %v5569_v2, %s5525_s18  ;;  %195 = vrot.lane.b32.xlu0 %v5578_v3, %s5525_s18  ;;  %vm1043_vm9 = vcmask 162945   ;;  %s5530_s5 = smov 24  }
   0x7   :  { %92 = vst.msk [vmem:[#allocation2 + $0x58] sm:$0x3f] %vm81_vm0, %v5625_v10  ;;  %v5648_v13 = vld [vmem:[%s8713_s0 + $0x60] sm:$0xff]  ;;  %94 = vst.msk [vmem:[#allocation2 + $0x68] sm:$0x3f] %vm81_vm0, %v5643_v12  ;;  %v5661_v14 = vld [vmem:[%s8713_s0 + $0x78] sm:$0xff] }
   0x8   :  { %89 = vst.msk [vmem:[#allocation2 + $0x40] sm:$0xff] %vm79_vm1, %v5620_v9  ;;  %v5666_v15 = vld [vmem:[%s8713_s0 + $0x70] sm:$0xff]  ;;  %91 = vst.msk [vmem:[#allocation2 + $0x50] sm:$0xff] %vm79_vm1, %v5638_v11  ;;  %v5677_v16 = vld [vmem:[%s8713_s0 + $0x88] sm:$0xff]  ;;  %s5531_s6 = smov 28   ;;  %s5532_s7 = smov 32  }
   0x9   :  { %93 = vst.msk [vmem:[#allocation2 + $0x60] sm:$0xff] %vm79_vm1, %v5648_v13  ;;  %v5682_v17 = vld [vmem:[%s8713_s0 + $0x80] sm:$0xff]  ;;  %v5687_v18 = vld [vmem:[%s8713_s0 + $0x98] sm:$0xff]  ;;  %95 = vst.msk [vmem:[#allocation2 + $0x70] sm:$0xff] %vm79_vm1, %v5666_v15  ;;  %vm4055_vm10 = vcmask 1041408   ;;  %vm8720_vm11 = vmmov 0  }
   0xa   :  { %96 = vst.msk [vmem:[#allocation2 + $0x78] sm:$0x3f] %vm81_vm0, %v5661_v14  ;;  %98 = vst.msk [vmem:[#allocation2 + $0x88] sm:$0x3f] %vm81_vm0, %v5677_v16  ;;  %v5698_v19 = vld [vmem:[%s8713_s0 + $0x90] sm:$0xff]  ;;  %v5703_v20 = vld [vmem:[%s8713_s0 + $0xa8] sm:$0xff]  ;;  %203 = vrot.lane.b32.xlu1 %v5585_v4, %s5525_s18  ;;  %201 = vrot.lane.b32.xlu0 %v5598_v5, %s5525_s18 }
   0xb   :  { %100 = vst.msk [vmem:[#allocation2 + $0x98] sm:$0x3f] %vm81_vm0, %v5687_v18  ;;  %v5708_v21 = vld [vmem:[%s8713_s0 + $0xa0] sm:$0xff]  ;;  %102 = vst.msk [vmem:[#allocation2 + $0xa8] sm:$0x3f] %vm81_vm0, %v5703_v20  ;;  %v5717_v22 = vld [vmem:[%s8713_s0 + $0xb8] sm:$0xff] }
   0xc   :  { %97 = vst.msk [vmem:[#allocation2 + $0x80] sm:$0xff] %vm79_vm1, %v5682_v17  ;;  %v5722_v23 = vld [vmem:[%s8713_s0 + $0xb0] sm:$0xff]  ;;  %v5727_v24 = vld [vmem:[%s8713_s0 + $0xc8] sm:$0xff]  ;;  %99 = vst.msk [vmem:[#allocation2 + $0x90] sm:$0xff] %vm79_vm1, %v5698_v19  ;;  %vm1271_vm12 = vcmask 195744   ;;  %vm1269_vm13 = vcmask 195746  }
   0xd   :  { %101 = vst.msk [vmem:[#allocation2 + $0xa0] sm:$0xff] %vm79_vm1, %v5708_v21  ;;  %v5744_v25 = vld [vmem:[%s8713_s0 + $0xc0] sm:$0xff]  ;;  %v5749_v26 = vld [vmem:[%s8713_s0 + $0xd8] sm:$0xff]  ;;  %103 = vst.msk [vmem:[#allocation2 + $0xb0] sm:$0xff] %vm79_vm1, %v5722_v23  ;;  %vm1501_vm14 = vcmask 226496   ;;  %vm1499_vm15 = vcmask 228544  }
   0xe   :  { %104 = vst.msk [vmem:[#allocation2 + $0xb8] sm:$0x3f] %vm81_vm0, %v5717_v22  ;;  %106 = vst.msk [vmem:[#allocation2 + $0xc8] sm:$0x3f] %vm81_vm0, %v5727_v24  ;;  %v5758_v27 = vld [vmem:[%s8713_s0 + $0xd0] sm:$0xff]  ;;  %v5763_v28 = vld [vmem:[%s8713_s0 + $0x108] sm:$0xff]  ;;  %207 = vrot.lane.b32.xlu1 %v5603_v6, %s5525_s18  ;;  %205 = vrot.lane.b32.xlu0 %v5608_v7, %s5525_s18 }
   0xf   :  { %108 = vst.msk [vmem:[#allocation2 + $0xd8] sm:$0x3f] %vm81_vm0, %v5749_v26  ;;  %v5768_v29 = vld [vmem:[%s8713_s0 + $0x100] sm:$0xff]  ;;  %110 = vst.msk [vmem:[#allocation2 + $0xe8] sm:$0x3f] %vm81_vm0, %v5763_v28  ;;  %v5781_v30 = vld [vmem:[%s8713_s0 + $0x118] sm:$0xff] }
  0x10   :  { %105 = vst.msk [vmem:[#allocation2 + $0xc0] sm:$0xff] %vm79_vm1, %v5744_v25  ;;  %109 = vst.msk [vmem:[#allocation2 + $0xe0] sm:$0xff] %vm79_vm1, %v5768_v29  ;;  %v5786_v31 = vld [vmem:[%s8713_s0 + $0x110] sm:$0xff]  ;;  %v5791_v32 = vld [vmem:[%s8713_s0 + $0x128] sm:$0xff] }
  0x11   :  { %107 = vst.msk [vmem:[#allocation2 + $0xd0] sm:$0xff] %vm79_vm1, %v5758_v27  ;;  %111 = vst.msk [vmem:[#allocation2 + $0xf0] sm:$0xff] %vm79_vm1, %v5786_v31  ;;  %v5802_v33 = vld [vmem:[%s8713_s0 + $0x120] sm:$0xff]  ;;  %v5807_v34 = vld [vmem:[%s8713_s0 + $0x138] sm:$0xff] }
  0x12   :  { %112 = vst.msk [vmem:[#allocation2 + $0xf8] sm:$0x3f] %vm81_vm0, %v5781_v30  ;;  %114 = vst.msk [vmem:[#allocation2 + $0x108] sm:$0x3f] %vm81_vm0, %v5791_v32  ;;  %v5812_v35 = vld [vmem:[%s8713_s0 + $0x130] sm:$0xff]  ;;  %v5827_v36 = vld [vmem:[%s8713_s0 + $0x148] sm:$0xff]  ;;  %211 = vrot.lane.b32.xlu1 %v5615_v8, %s5525_s18  ;;  %209 = vrot.lane.b32.xlu0 %v5620_v9, %s5525_s18 }
  0x13   :  { %113 = vst.msk [vmem:[#allocation2 + $0x100] sm:$0xff] %vm79_vm1, %v5802_v33  ;;  %115 = vst.msk [vmem:[#allocation2 + $0x110] sm:$0xff] %vm79_vm1, %v5812_v35  ;;  %v5832_v37 = vld [vmem:[%s8713_s0 + $0x140] sm:$0xff]  ;;  %v5841_v38 = vld [vmem:[%s8713_s0 + $0x158] sm:$0xff] }
  0x14   :  { %116 = vst.msk [vmem:[#allocation2 + $0x118] sm:$0x3f] %vm81_vm0, %v5807_v34  ;;  %118 = vst.msk [vmem:[#allocation2 + $0x128] sm:$0x3f] %vm81_vm0, %v5827_v36  ;;  %v5846_v39 = vld [vmem:[%s8713_s0 + $0x150] sm:$0xff]  ;;  %v5851_v40 = vld [vmem:[%s8713_s0 + $0x168] sm:$0xff] }
  0x15   :  { %117 = vst.msk [vmem:[#allocation2 + $0x120] sm:$0xff] %vm79_vm1, %v5832_v37  ;;  %119 = vst.msk [vmem:[#allocation2 + $0x130] sm:$0xff] %vm79_vm1, %v5846_v39  ;;  %v5862_v41 = vld [vmem:[%s8713_s0 + $0x160] sm:$0xff]  ;;  %v5867_v42 = vld [vmem:[%s8713_s0 + $0x178] sm:$0xff] }
  0x16   :  { %120 = vst.msk [vmem:[#allocation2 + $0x138] sm:$0x3f] %vm81_vm0, %v5841_v38  ;;  %122 = vst.msk [vmem:[#allocation2 + $0x148] sm:$0x3f] %vm81_vm0, %v5851_v40  ;;  %v5872_v43 = vld [vmem:[%s8713_s0 + $0x170] sm:$0xff]  ;;  %v5883_v44 = vld [vmem:[%s8713_s0 + $0x188] sm:$0xff]  ;;  %215 = vrot.lane.b32.xlu1 %v5625_v10, %s5525_s18  ;;  %213 = vrot.lane.b32.xlu0 %v5638_v11, %s5525_s18 }
  0x17   :  { %121 = vst.msk [vmem:[#allocation2 + $0x140] sm:$0xff] %vm79_vm1, %v5862_v41  ;;  %123 = vst.msk [vmem:[#allocation2 + $0x150] sm:$0xff] %vm79_vm1, %v5872_v43  ;;  %v5888_v45 = vld [vmem:[%s8713_s0 + $0x180] sm:$0xff]  ;;  %v5893_v46 = vld [vmem:[%s8713_s0 + $0x198] sm:$0xff] }
  0x18   :  { %124 = vst.msk [vmem:[#allocation2 + $0x158] sm:$0x3f] %vm81_vm0, %v5867_v42  ;;  %126 = vst.msk [vmem:[#allocation2 + $0x168] sm:$0x3f] %vm81_vm0, %v5883_v44  ;;  %v5908_v47 = vld [vmem:[%s8713_s0 + $0x190] sm:$0xff]  ;;  %v5913_v48 = vld [vmem:[%s8713_s0 + $0x1a8] sm:$0xff] }
  0x19   :  { %125 = vst.msk [vmem:[#allocation2 + $0x160] sm:$0xff] %vm79_vm1, %v5888_v45  ;;  %127 = vst.msk [vmem:[#allocation2 + $0x170] sm:$0xff] %vm79_vm1, %v5908_v47  ;;  %v5922_v49 = vld [vmem:[%s8713_s0 + $0x1a0] sm:$0xff]  ;;  %v5927_v50 = vld [vmem:[%s8713_s0 + $0x1b8] sm:$0xff] }
  0x1a   :  { %128 = vst.msk [vmem:[#allocation2 + $0x178] sm:$0x3f] %vm81_vm0, %v5893_v46  ;;  %130 = vst.msk [vmem:[#allocation2 + $0x188] sm:$0x3f] %vm81_vm0, %v5913_v48  ;;  %v5932_v51 = vld [vmem:[%s8713_s0 + $0x1b0] sm:$0xff]  ;;  %v5943_v52 = vld [vmem:[%s8713_s0 + $0x1c8] sm:$0xff]  ;;  %219 = vrot.lane.b32.xlu1 %v5643_v12, %s5525_s18  ;;  %217 = vrot.lane.b32.xlu0 %v5648_v13, %s5525_s18 }
  0x1b   :  { %129 = vst.msk [vmem:[#allocation2 + $0x180] sm:$0xff] %vm79_vm1, %v5922_v49  ;;  %131 = vst.msk [vmem:[#allocation2 + $0x190] sm:$0xff] %vm79_vm1, %v5932_v51  ;;  %v5948_v53 = vld [vmem:[%s8713_s0 + $0x1c0] sm:$0xff]  ;;  %v5953_v54 = vld [vmem:[%s8713_s0 + $0x1d8] sm:$0xff] }
  0x1c   :  { %132 = vst.msk [vmem:[#allocation2 + $0x198] sm:$0x3f] %vm81_vm0, %v5927_v50  ;;  %134 = vst.msk [vmem:[#allocation2 + $0x1a8] sm:$0x3f] %vm81_vm0, %v5943_v52  ;;  %v5964_v55 = vld [vmem:[%s8713_s0 + $0x1d0] sm:$0xff] }
  0x1d   :  { %133 = vst.msk [vmem:[#allocation2 + $0x1a0] sm:$0xff] %vm79_vm1, %v5948_v53  ;;  %135 = vst.msk [vmem:[#allocation2 + $0x1b0] sm:$0xff] %vm79_vm1, %v5964_v55  ;;  %vm1725_vm1 = vcmask 261345  }
  0x1e   :  { %136 = vst.msk [vmem:[#allocation2 + $0x1b8] sm:$0x3f] %vm81_vm0, %v5953_v54  ;;  %223 = vrot.lane.b32.xlu1 %v5661_v14, %s5525_s18  ;;  %221 = vrot.lane.b32.xlu0 %v5666_v15, %s5525_s18  ;;  %vm8722_vm0 = vcmask 260320  }
  0x22   :  { %227 = vrot.lane.b32.xlu1 %v5677_v16, %s5525_s18  ;;  %225 = vrot.lane.b32.xlu0 %v5682_v17, %s5525_s18 }
  0x26   :  { %231 = vrot.lane.b32.xlu1 %v5687_v18, %s5525_s18  ;;  %229 = vrot.lane.b32.xlu0 %v5698_v19, %s5525_s18 }
  0x2a   :  { %235 = vrot.lane.b32.xlu1 %v5703_v20, %s5525_s18  ;;  %233 = vrot.lane.b32.xlu0 %v5708_v21, %s5525_s18 }
  0x2e   :  { %239 = vrot.lane.b32.xlu1 %v5717_v22, %s5525_s18  ;;  %237 = vrot.lane.b32.xlu0 %v5722_v23, %s5525_s18 }
  0x32   :  { %243 = vrot.lane.b32.xlu1 %v5727_v24, %s5525_s18  ;;  %241 = vrot.lane.b32.xlu0 %v5744_v25, %s5525_s18 }
  0x36   :  { %247 = vrot.lane.b32.xlu1 %v5749_v26, %s5525_s18  ;;  %245 = vrot.lane.b32.xlu0 %v5758_v27, %s5525_s18 }
  0x3a   :  { %251 = vrot.lane.b32.xlu1 %v5763_v28, %s5525_s18  ;;  %249 = vrot.lane.b32.xlu0 %v5768_v29, %s5525_s18 }
  0x3e   :  { %255 = vrot.lane.b32.xlu1 %v5781_v30, %s5525_s18  ;;  %253 = vrot.lane.b32.xlu0 %v5786_v31, %s5525_s18 }
  0x42   :  { %259 = vrot.lane.b32.xlu1 %v5791_v32, %s5525_s18  ;;  %257 = vrot.lane.b32.xlu0 %v5802_v33, %s5525_s18 }
  0x46   :  { %263 = vrot.lane.b32.xlu1 %v5807_v34, %s5525_s18  ;;  %261 = vrot.lane.b32.xlu0 %v5812_v35, %s5525_s18 }
  0x4a   :  { %267 = vrot.lane.b32.xlu1 %v5827_v36, %s5525_s18  ;;  %265 = vrot.lane.b32.xlu0 %v5832_v37, %s5525_s18 }
  0x4e   :  { %271 = vrot.lane.b32.xlu1 %v5841_v38, %s5525_s18  ;;  %269 = vrot.lane.b32.xlu0 %v5846_v39, %s5525_s18 }
  0x52   :  { %275 = vrot.lane.b32.xlu1 %v5851_v40, %s5525_s18  ;;  %273 = vrot.lane.b32.xlu0 %v5862_v41, %s5525_s18 }
  0x56   :  { %279 = vrot.lane.b32.xlu1 %v5867_v42, %s5525_s18  ;;  %277 = vrot.lane.b32.xlu0 %v5872_v43, %s5525_s18 }
  0x5a   :  { %283 = vrot.lane.b32.xlu1 %v5883_v44, %s5525_s18  ;;  %281 = vrot.lane.b32.xlu0 %v5888_v45, %s5525_s18 }
  0x5e   :  { %287 = vrot.lane.b32.xlu1 %v5893_v46, %s5525_s18  ;;  %285 = vrot.lane.b32.xlu0 %v5908_v47, %s5525_s18 }
  0x62   :  { %291 = vrot.lane.b32.xlu1 %v5913_v48, %s5525_s18  ;;  %289 = vrot.lane.b32.xlu0 %v5922_v49, %s5525_s18 }
  0x66   :  { %295 = vrot.lane.b32.xlu1 %v5927_v50, %s5525_s18  ;;  %293 = vrot.lane.b32.xlu0 %v5932_v51, %s5525_s18 }
  0x6a   :  { %299 = vrot.lane.b32.xlu1 %v5943_v52, %s5525_s18  ;;  %297 = vrot.lane.b32.xlu0 %v5948_v53, %s5525_s18 }
  0x6e   :  { %303 = vrot.lane.b32.xlu1 %v5953_v54, %s5525_s18  ;;  %301 = vrot.lane.b32.xlu0 %v5964_v55, %s5525_s18  ;;  %s5527_s18 = smov 12  }
  0x72   :  { %421 = vrot.lane.b32.xlu1 %v5578_v3, %s5526_s21  ;;  %419 = vrot.lane.b32.xlu0 %v5564_v1, %s5526_s21 }
  0x74   :  { %v198_v56 = vpop.permute.xlu1 %197  ;;  %v194_v57 = vpop.permute.xlu0 %193 }
  0x75   :  { %365 = vst.msk [vmem:[#allocation2 + $0xf] sm:$0xfe] %vm361_vm2, %v198_v56  ;;  %362 = vst.msk [vmem:[#allocation2 - $0x1] sm:$0xfe] %vm361_vm2, %v194_v57 }
  0x76   :  { %425 = vrot.lane.b32.xlu1 %v5569_v2, %s5526_s21  ;;  %423 = vrot.lane.b32.xlu0 %v5559_v0, %s5526_s21 }
  0x78   :  { %v200_v58 = vpop.permute.xlu1 %199  ;;  %v196_v59 = vpop.permute.xlu0 %195 }
  0x79   :  { %366 = vst.msk [vmem:[#allocation2 + $0x17] sm:$0x7f] %vm363_vm3, %v200_v58  ;;  %364 = vst.msk [vmem:[#allocation2 + $0x7] sm:$0x7f] %vm363_vm3, %v196_v59 }
  0x7a   :  { %429 = vrot.lane.b32.xlu1 %v5585_v4, %s5526_s21  ;;  %427 = vrot.lane.b32.xlu0 %v5598_v5, %s5526_s21 }
  0x7c   :  { %v204_v60 = vpop.permute.xlu1 %203  ;;  %v202_v61 = vpop.permute.xlu0 %201 }
  0x7d   :  { %368 = vst.msk [vmem:[#allocation2 + $0x27] sm:$0x7f] %vm363_vm3, %v204_v60 }
  0x7e   :  { %367 = vst.msk [vmem:[#allocation2 + $0x1f] sm:$0xfe] %vm361_vm2, %v202_v61  ;;  %433 = vrot.lane.b32.xlu1 %v5603_v6, %s5526_s21  ;;  %431 = vrot.lane.b32.xlu0 %v5608_v7, %s5526_s21 }
  0x80   :  { %v208_v62 = vpop.permute.xlu1 %207  ;;  %v206_v63 = vpop.permute.xlu0 %205 }
  0x81   :  { %370 = vst.msk [vmem:[#allocation2 + $0x37] sm:$0x7f] %vm363_vm3, %v208_v62 }
  0x82   :  { %369 = vst.msk [vmem:[#allocation2 + $0x2f] sm:$0xfe] %vm361_vm2, %v206_v63  ;;  %437 = vrot.lane.b32.xlu1 %v5615_v8, %s5526_s21  ;;  %435 = vrot.lane.b32.xlu0 %v5620_v9, %s5526_s21 }
  0x84   :  { %v212_v1 = vpop.permute.xlu1 %211  ;;  %v210_v3 = vpop.permute.xlu0 %209 }
  0x85   :  { %372 = vst.msk [vmem:[#allocation2 + $0x47] sm:$0x7f] %vm363_vm3, %v212_v1 }
  0x86   :  { %371 = vst.msk [vmem:[#allocation2 + $0x3f] sm:$0xfe] %vm361_vm2, %v210_v3  ;;  %441 = vrot.lane.b32.xlu1 %v5625_v10, %s5526_s21  ;;  %439 = vrot.lane.b32.xlu0 %v5638_v11, %s5526_s21 }
  0x88   :  { %v216_v56 = vpop.permute.xlu1 %215  ;;  %v214_v57 = vpop.permute.xlu0 %213 }
  0x89   :  { %374 = vst.msk [vmem:[#allocation2 + $0x57] sm:$0x7f] %vm363_vm3, %v216_v56 }
  0x8a   :  { %373 = vst.msk [vmem:[#allocation2 + $0x4f] sm:$0xfe] %vm361_vm2, %v214_v57  ;;  %445 = vrot.lane.b32.xlu1 %v5643_v12, %s5526_s21  ;;  %443 = vrot.lane.b32.xlu0 %v5648_v13, %s5526_s21 }
  0x8c   :  { %v220_v58 = vpop.permute.xlu1 %219  ;;  %v218_v59 = vpop.permute.xlu0 %217 }
  0x8d   :  { %376 = vst.msk [vmem:[#allocation2 + $0x67] sm:$0x7f] %vm363_vm3, %v220_v58 }
  0x8e   :  { %375 = vst.msk [vmem:[#allocation2 + $0x5f] sm:$0xfe] %vm361_vm2, %v218_v59  ;;  %449 = vrot.lane.b32.xlu1 %v5661_v14, %s5526_s21  ;;  %447 = vrot.lane.b32.xlu0 %v5666_v15, %s5526_s21 }
  0x90   :  { %v224_v60 = vpop.permute.xlu1 %223  ;;  %v222_v61 = vpop.permute.xlu0 %221 }
  0x91   :  { %378 = vst.msk [vmem:[#allocation2 + $0x77] sm:$0x7f] %vm363_vm3, %v224_v60 }
  0x92   :  { %377 = vst.msk [vmem:[#allocation2 + $0x6f] sm:$0xfe] %vm361_vm2, %v222_v61  ;;  %453 = vrot.lane.b32.xlu1 %v5677_v16, %s5526_s21  ;;  %451 = vrot.lane.b32.xlu0 %v5682_v17, %s5526_s21 }
  0x94   :  { %v228_v62 = vpop.permute.xlu1 %227  ;;  %v226_v63 = vpop.permute.xlu0 %225 }
  0x95   :  { %380 = vst.msk [vmem:[#allocation2 + $0x87] sm:$0x7f] %vm363_vm3, %v228_v62 }
  0x96   :  { %379 = vst.msk [vmem:[#allocation2 + $0x7f] sm:$0xfe] %vm361_vm2, %v226_v63  ;;  %457 = vrot.lane.b32.xlu1 %v5687_v18, %s5526_s21  ;;  %455 = vrot.lane.b32.xlu0 %v5698_v19, %s5526_s21 }
  0x98   :  { %v232_v1 = vpop.permute.xlu1 %231  ;;  %v230_v3 = vpop.permute.xlu0 %229 }
  0x99   :  { %382 = vst.msk [vmem:[#allocation2 + $0x97] sm:$0x7f] %vm363_vm3, %v232_v1 }
  0x9a   :  { %381 = vst.msk [vmem:[#allocation2 + $0x8f] sm:$0xfe] %vm361_vm2, %v230_v3  ;;  %461 = vrot.lane.b32.xlu1 %v5703_v20, %s5526_s21  ;;  %459 = vrot.lane.b32.xlu0 %v5708_v21, %s5526_s21 }
  0x9c   :  { %v236_v56 = vpop.permute.xlu1 %235  ;;  %v234_v57 = vpop.permute.xlu0 %233 }
  0x9d   :  { %384 = vst.msk [vmem:[#allocation2 + $0xa7] sm:$0x7f] %vm363_vm3, %v236_v56 }
  0x9e   :  { %383 = vst.msk [vmem:[#allocation2 + $0x9f] sm:$0xfe] %vm361_vm2, %v234_v57  ;;  %465 = vrot.lane.b32.xlu1 %v5717_v22, %s5526_s21  ;;  %463 = vrot.lane.b32.xlu0 %v5722_v23, %s5526_s21 }
  0xa0   :  { %v240_v58 = vpop.permute.xlu1 %239  ;;  %v238_v59 = vpop.permute.xlu0 %237 }
  0xa1   :  { %386 = vst.msk [vmem:[#allocation2 + $0xb7] sm:$0x7f] %vm363_vm3, %v240_v58 }
  0xa2   :  { %385 = vst.msk [vmem:[#allocation2 + $0xaf] sm:$0xfe] %vm361_vm2, %v238_v59  ;;  %469 = vrot.lane.b32.xlu1 %v5727_v24, %s5526_s21  ;;  %467 = vrot.lane.b32.xlu0 %v5744_v25, %s5526_s21 }
  0xa4   :  { %v244_v60 = vpop.permute.xlu1 %243  ;;  %v242_v61 = vpop.permute.xlu0 %241 }
  0xa5   :  { %388 = vst.msk [vmem:[#allocation2 + $0xc7] sm:$0x7f] %vm363_vm3, %v244_v60 }
  0xa6   :  { %387 = vst.msk [vmem:[#allocation2 + $0xbf] sm:$0xfe] %vm361_vm2, %v242_v61  ;;  %473 = vrot.lane.b32.xlu1 %v5749_v26, %s5526_s21  ;;  %471 = vrot.lane.b32.xlu0 %v5758_v27, %s5526_s21 }
  0xa8   :  { %v248_v62 = vpop.permute.xlu1 %247  ;;  %v246_v63 = vpop.permute.xlu0 %245 }
  0xa9   :  { %390 = vst.msk [vmem:[#allocation2 + $0xd7] sm:$0x7f] %vm363_vm3, %v248_v62 }
  0xaa   :  { %389 = vst.msk [vmem:[#allocation2 + $0xcf] sm:$0xfe] %vm361_vm2, %v246_v63  ;;  %477 = vrot.lane.b32.xlu1 %v5763_v28, %s5526_s21  ;;  %475 = vrot.lane.b32.xlu0 %v5768_v29, %s5526_s21 }
  0xac   :  { %v252_v1 = vpop.permute.xlu1 %251  ;;  %v250_v3 = vpop.permute.xlu0 %249 }
  0xad   :  { %392 = vst.msk [vmem:[#allocation2 + $0xe7] sm:$0x7f] %vm363_vm3, %v252_v1 }
  0xae   :  { %391 = vst.msk [vmem:[#allocation2 + $0xdf] sm:$0xfe] %vm361_vm2, %v250_v3  ;;  %481 = vrot.lane.b32.xlu1 %v5781_v30, %s5526_s21  ;;  %479 = vrot.lane.b32.xlu0 %v5786_v31, %s5526_s21 }
  0xb0   :  { %v256_v56 = vpop.permute.xlu1 %255  ;;  %v254_v57 = vpop.permute.xlu0 %253 }
  0xb1   :  { %394 = vst.msk [vmem:[#allocation2 + $0xf7] sm:$0x7f] %vm363_vm3, %v256_v56 }
  0xb2   :  { %393 = vst.msk [vmem:[#allocation2 + $0xef] sm:$0xfe] %vm361_vm2, %v254_v57  ;;  %485 = vrot.lane.b32.xlu1 %v5791_v32, %s5526_s21  ;;  %483 = vrot.lane.b32.xlu0 %v5802_v33, %s5526_s21 }
  0xb4   :  { %v260_v28 = vpop.permute.xlu1 %259  ;;  %v258_v29 = vpop.permute.xlu0 %257 }
  0xb5   :  { %396 = vst.msk [vmem:[#allocation2 + $0x107] sm:$0x7f] %vm363_vm3, %v260_v28 }
  0xb6   :  { %395 = vst.msk [vmem:[#allocation2 + $0xff] sm:$0xfe] %vm361_vm2, %v258_v29  ;;  %489 = vrot.lane.b32.xlu1 %v5807_v34, %s5526_s21  ;;  %487 = vrot.lane.b32.xlu0 %v5812_v35, %s5526_s21 }
  0xb8   :  { %v264_v58 = vpop.permute.xlu1 %263  ;;  %v262_v59 = vpop.permute.xlu0 %261 }
  0xb9   :  { %398 = vst.msk [vmem:[#allocation2 + $0x117] sm:$0x7f] %vm363_vm3, %v264_v58 }
  0xba   :  { %397 = vst.msk [vmem:[#allocation2 + $0x10f] sm:$0xfe] %vm361_vm2, %v262_v59  ;;  %493 = vrot.lane.b32.xlu1 %v5827_v36, %s5526_s21  ;;  %491 = vrot.lane.b32.xlu0 %v5832_v37, %s5526_s21 }
  0xbc   :  { %v268_v60 = vpop.permute.xlu1 %267  ;;  %v266_v61 = vpop.permute.xlu0 %265 }
  0xbd   :  { %400 = vst.msk [vmem:[#allocation2 + $0x127] sm:$0x7f] %vm363_vm3, %v268_v60 }
  0xbe   :  { %399 = vst.msk [vmem:[#allocation2 + $0x11f] sm:$0xfe] %vm361_vm2, %v266_v61  ;;  %497 = vrot.lane.b32.xlu1 %v5841_v38, %s5526_s21  ;;  %495 = vrot.lane.b32.xlu0 %v5846_v39, %s5526_s21 }
  0xc0   :  { %v272_v62 = vpop.permute.xlu1 %271  ;;  %v270_v63 = vpop.permute.xlu0 %269 }
  0xc1   :  { %402 = vst.msk [vmem:[#allocation2 + $0x137] sm:$0x7f] %vm363_vm3, %v272_v62 }
  0xc2   :  { %401 = vst.msk [vmem:[#allocation2 + $0x12f] sm:$0xfe] %vm361_vm2, %v270_v63  ;;  %501 = vrot.lane.b32.xlu1 %v5851_v40, %s5526_s21  ;;  %499 = vrot.lane.b32.xlu0 %v5862_v41, %s5526_s21 }
  0xc4   :  { %v276_v1 = vpop.permute.xlu1 %275  ;;  %v274_v3 = vpop.permute.xlu0 %273 }
  0xc5   :  { %404 = vst.msk [vmem:[#allocation2 + $0x147] sm:$0x7f] %vm363_vm3, %v276_v1 }
  0xc6   :  { %403 = vst.msk [vmem:[#allocation2 + $0x13f] sm:$0xfe] %vm361_vm2, %v274_v3  ;;  %505 = vrot.lane.b32.xlu1 %v5867_v42, %s5526_s21  ;;  %503 = vrot.lane.b32.xlu0 %v5872_v43, %s5526_s21 }
  0xc8   :  { %v280_v56 = vpop.permute.xlu1 %279  ;;  %v278_v57 = vpop.permute.xlu0 %277 }
  0xc9   :  { %406 = vst.msk [vmem:[#allocation2 + $0x157] sm:$0x7f] %vm363_vm3, %v280_v56 }
  0xca   :  { %405 = vst.msk [vmem:[#allocation2 + $0x14f] sm:$0xfe] %vm361_vm2, %v278_v57  ;;  %509 = vrot.lane.b32.xlu1 %v5883_v44, %s5526_s21  ;;  %507 = vrot.lane.b32.xlu0 %v5888_v45, %s5526_s21 }
  0xcc   :  { %v284_v28 = vpop.permute.xlu1 %283  ;;  %v282_v29 = vpop.permute.xlu0 %281 }
  0xcd   :  { %408 = vst.msk [vmem:[#allocation2 + $0x167] sm:$0x7f] %vm363_vm3, %v284_v28 }
  0xce   :  { %407 = vst.msk [vmem:[#allocation2 + $0x15f] sm:$0xfe] %vm361_vm2, %v282_v29  ;;  %513 = vrot.lane.b32.xlu1 %v5893_v46, %s5526_s21  ;;  %511 = vrot.lane.b32.xlu0 %v5908_v47, %s5526_s21 }
  0xd0   :  { %v288_v58 = vpop.permute.xlu1 %287  ;;  %v286_v59 = vpop.permute.xlu0 %285 }
  0xd1   :  { %410 = vst.msk [vmem:[#allocation2 + $0x177] sm:$0x7f] %vm363_vm3, %v288_v58 }
  0xd2   :  { %409 = vst.msk [vmem:[#allocation2 + $0x16f] sm:$0xfe] %vm361_vm2, %v286_v59  ;;  %517 = vrot.lane.b32.xlu1 %v5913_v48, %s5526_s21  ;;  %515 = vrot.lane.b32.xlu0 %v5922_v49, %s5526_s21 }
  0xd4   :  { %v292_v60 = vpop.permute.xlu1 %291  ;;  %v290_v61 = vpop.permute.xlu0 %289 }
  0xd5   :  { %412 = vst.msk [vmem:[#allocation2 + $0x187] sm:$0x7f] %vm363_vm3, %v292_v60 }
  0xd6   :  { %411 = vst.msk [vmem:[#allocation2 + $0x17f] sm:$0xfe] %vm361_vm2, %v290_v61  ;;  %521 = vrot.lane.b32.xlu1 %v5927_v50, %s5526_s21  ;;  %519 = vrot.lane.b32.xlu0 %v5932_v51, %s5526_s21 }
  0xd8   :  { %v296_v62 = vpop.permute.xlu1 %295  ;;  %v294_v63 = vpop.permute.xlu0 %293 }
  0xd9   :  { %414 = vst.msk [vmem:[#allocation2 + $0x197] sm:$0x7f] %vm363_vm3, %v296_v62 }
  0xda   :  { %413 = vst.msk [vmem:[#allocation2 + $0x18f] sm:$0xfe] %vm361_vm2, %v294_v63  ;;  %525 = vrot.lane.b32.xlu1 %v5943_v52, %s5526_s21  ;;  %523 = vrot.lane.b32.xlu0 %v5948_v53, %s5526_s21 }
  0xdc   :  { %v300_v1 = vpop.permute.xlu1 %299  ;;  %v298_v3 = vpop.permute.xlu0 %297 }
  0xdd   :  { %416 = vst.msk [vmem:[#allocation2 + $0x1a7] sm:$0x7f] %vm363_vm3, %v300_v1 }
  0xde   :  { %415 = vst.msk [vmem:[#allocation2 + $0x19f] sm:$0xfe] %vm361_vm2, %v298_v3  ;;  %529 = vrot.lane.b32.xlu1 %v5953_v54, %s5526_s21  ;;  %527 = vrot.lane.b32.xlu0 %v5964_v55, %s5526_s21 }
  0xe0   :  { %v304_v56 = vpop.permute.xlu1 %303  ;;  %v302_v57 = vpop.permute.xlu0 %301 }
  0xe1   :  { %418 = vst.msk [vmem:[#allocation2 + $0x1b7] sm:$0x7f] %vm363_vm3, %v304_v56  ;;  %vm1951_vm3 = vcmask 294146  }
  0xe2   :  { %417 = vst.msk [vmem:[#allocation2 + $0x1af] sm:$0xfe] %vm361_vm2, %v302_v57  ;;  %651 = vrot.lane.b32.xlu1 %v5569_v2, %s5527_s18  ;;  %649 = vrot.lane.b32.xlu0 %v5559_v0, %s5527_s18  ;;  %vm8717_vm2 = vcmask 294144  }
  0xe4   :  { %v422_v28 = vpop.permute.xlu1 %421  ;;  %v420_v29 = vpop.permute.xlu0 %419 }
  0xe5   :  { %590 = vst.msk [vmem:[#allocation2 + $0x6] sm:$0xff] %vm589_vm4, %v422_v28 }
  0xe6   :  { %588 = vst.msk [vmem:[#allocation2 - $0x2] sm:$0xfc] %vm587_vm5, %v420_v29  ;;  %655 = vrot.lane.b32.xlu1 %v5585_v4, %s5527_s18  ;;  %653 = vrot.lane.b32.xlu0 %v5598_v5, %s5527_s18 }
  0xe8   :  { %v426_v58 = vpop.permute.xlu1 %425  ;;  %v424_v59 = vpop.permute.xlu0 %423 }
  0xe9   :  { %592 = vst.msk [vmem:[#allocation2 + $0x16] sm:$0xff] %vm589_vm4, %v426_v58 }
  0xea   :  { %591 = vst.msk [vmem:[#allocation2 + $0xe] sm:$0xfc] %vm587_vm5, %v424_v59  ;;  %659 = vrot.lane.b32.xlu1 %v5603_v6, %s5527_s18  ;;  %657 = vrot.lane.b32.xlu0 %v5608_v7, %s5527_s18 }
  0xec   :  { %v430_v60 = vpop.permute.xlu1 %429  ;;  %v428_v61 = vpop.permute.xlu0 %427 }
  0xed   :  { %594 = vst.msk [vmem:[#allocation2 + $0x26] sm:$0xff] %vm589_vm4, %v430_v60 }
  0xee   :  { %593 = vst.msk [vmem:[#allocation2 + $0x1e] sm:$0xfc] %vm587_vm5, %v428_v61  ;;  %663 = vrot.lane.b32.xlu1 %v5615_v8, %s5527_s18  ;;  %661 = vrot.lane.b32.xlu0 %v5620_v9, %s5527_s18 }
  0xf0   :  { %v434_v62 = vpop.permute.xlu1 %433  ;;  %v432_v63 = vpop.permute.xlu0 %431 }
  0xf1   :  { %596 = vst.msk [vmem:[#allocation2 + $0x36] sm:$0xff] %vm589_vm4, %v434_v62 }
  0xf2   :  { %595 = vst.msk [vmem:[#allocation2 + $0x2e] sm:$0xfc] %vm587_vm5, %v432_v63  ;;  %667 = vrot.lane.b32.xlu1 %v5625_v10, %s5527_s18  ;;  %665 = vrot.lane.b32.xlu0 %v5638_v11, %s5527_s18 }
  0xf4   :  { %v438_v1 = vpop.permute.xlu1 %437  ;;  %v436_v3 = vpop.permute.xlu0 %435 }
  0xf5   :  { %598 = vst.msk [vmem:[#allocation2 + $0x46] sm:$0xff] %vm589_vm4, %v438_v1 }
  0xf6   :  { %597 = vst.msk [vmem:[#allocation2 + $0x3e] sm:$0xfc] %vm587_vm5, %v436_v3  ;;  %671 = vrot.lane.b32.xlu1 %v5643_v12, %s5527_s18  ;;  %669 = vrot.lane.b32.xlu0 %v5648_v13, %s5527_s18 }
  0xf8   :  { %v442_v56 = vpop.permute.xlu1 %441  ;;  %v440_v57 = vpop.permute.xlu0 %439 }
  0xf9   :  { %600 = vst.msk [vmem:[#allocation2 + $0x56] sm:$0xff] %vm589_vm4, %v442_v56 }
  0xfa   :  { %599 = vst.msk [vmem:[#allocation2 + $0x4e] sm:$0xfc] %vm587_vm5, %v440_v57  ;;  %675 = vrot.lane.b32.xlu1 %v5661_v14, %s5527_s18  ;;  %673 = vrot.lane.b32.xlu0 %v5666_v15, %s5527_s18 }
  0xfc   :  { %v446_v28 = vpop.permute.xlu1 %445  ;;  %v444_v29 = vpop.permute.xlu0 %443 }
  0xfd   :  { %602 = vst.msk [vmem:[#allocation2 + $0x66] sm:$0xff] %vm589_vm4, %v446_v28  ;;  %v6307_v28 = vld [vmem:[%s8713_s0 + $0xe8] sm:$0xff] }
  0xfe   :  { %601 = vst.msk [vmem:[#allocation2 + $0x5e] sm:$0xfc] %vm587_vm5, %v444_v29  ;;  %679 = vrot.lane.b32.xlu1 %v5677_v16, %s5527_s18  ;;  %677 = vrot.lane.b32.xlu0 %v5682_v17, %s5527_s18  ;;  %v6312_v29 = vld [vmem:[%s8713_s0 + $0xe0] sm:$0xff] }
 0x100   :  { %v450_v58 = vpop.permute.xlu1 %449  ;;  %v448_v59 = vpop.permute.xlu0 %447 }
 0x101   :  { %604 = vst.msk [vmem:[#allocation2 + $0x76] sm:$0xff] %vm589_vm4, %v450_v58 }
 0x102   :  { %603 = vst.msk [vmem:[#allocation2 + $0x6e] sm:$0xfc] %vm587_vm5, %v448_v59  ;;  %683 = vrot.lane.b32.xlu1 %v5687_v18, %s5527_s18  ;;  %681 = vrot.lane.b32.xlu0 %v5698_v19, %s5527_s18 }
 0x104   :  { %v454_v60 = vpop.permute.xlu1 %453  ;;  %v452_v61 = vpop.permute.xlu0 %451 }
 0x105   :  { %606 = vst.msk [vmem:[#allocation2 + $0x86] sm:$0xff] %vm589_vm4, %v454_v60 }
 0x106   :  { %605 = vst.msk [vmem:[#allocation2 + $0x7e] sm:$0xfc] %vm587_vm5, %v452_v61  ;;  %687 = vrot.lane.b32.xlu1 %v5703_v20, %s5527_s18  ;;  %685 = vrot.lane.b32.xlu0 %v5708_v21, %s5527_s18 }
 0x108   :  { %v458_v62 = vpop.permute.xlu1 %457  ;;  %v456_v63 = vpop.permute.xlu0 %455 }
 0x109   :  { %608 = vst.msk [vmem:[#allocation2 + $0x96] sm:$0xff] %vm589_vm4, %v458_v62 }
 0x10a   :  { %607 = vst.msk [vmem:[#allocation2 + $0x8e] sm:$0xfc] %vm587_vm5, %v456_v63  ;;  %691 = vrot.lane.b32.xlu1 %v5717_v22, %s5527_s18  ;;  %689 = vrot.lane.b32.xlu0 %v5722_v23, %s5527_s18 }
 0x10c   :  { %v462_v1 = vpop.permute.xlu1 %461  ;;  %v460_v3 = vpop.permute.xlu0 %459 }
 0x10d   :  { %610 = vst.msk [vmem:[#allocation2 + $0xa6] sm:$0xff] %vm589_vm4, %v462_v1 }
 0x10e   :  { %609 = vst.msk [vmem:[#allocation2 + $0x9e] sm:$0xfc] %vm587_vm5, %v460_v3  ;;  %695 = vrot.lane.b32.xlu1 %v5727_v24, %s5527_s18  ;;  %693 = vrot.lane.b32.xlu0 %v5744_v25, %s5527_s18 }
 0x110   :  { %v466_v56 = vpop.permute.xlu1 %465  ;;  %v464_v57 = vpop.permute.xlu0 %463 }
 0x111   :  { %612 = vst.msk [vmem:[#allocation2 + $0xb6] sm:$0xff] %vm589_vm4, %v466_v56 }
 0x112   :  { %611 = vst.msk [vmem:[#allocation2 + $0xae] sm:$0xfc] %vm587_vm5, %v464_v57  ;;  %699 = vrot.lane.b32.xlu1 %v5749_v26, %s5527_s18  ;;  %697 = vrot.lane.b32.xlu0 %v5758_v27, %s5527_s18 }
 0x114   :  { %v470_v58 = vpop.permute.xlu1 %469  ;;  %v468_v59 = vpop.permute.xlu0 %467 }
 0x115   :  { %614 = vst.msk [vmem:[#allocation2 + $0xc6] sm:$0xff] %vm589_vm4, %v470_v58 }
 0x116   :  { %613 = vst.msk [vmem:[#allocation2 + $0xbe] sm:$0xfc] %vm587_vm5, %v468_v59  ;;  %703 = vrot.lane.b32.xlu1 %v6307_v28, %s5527_s18  ;;  %701 = vrot.lane.b32.xlu0 %v6312_v29, %s5527_s18 }
 0x118   :  { %v474_v60 = vpop.permute.xlu1 %473  ;;  %v472_v61 = vpop.permute.xlu0 %471 }
 0x119   :  { %616 = vst.msk [vmem:[#allocation2 + $0xd6] sm:$0xff] %vm589_vm4, %v474_v60 }
 0x11a   :  { %615 = vst.msk [vmem:[#allocation2 + $0xce] sm:$0xfc] %vm587_vm5, %v472_v61  ;;  %707 = vrot.lane.b32.xlu1 %v5781_v30, %s5527_s18  ;;  %705 = vrot.lane.b32.xlu0 %v5786_v31, %s5527_s18 }
 0x11c   :  { %v478_v62 = vpop.permute.xlu1 %477  ;;  %v476_v63 = vpop.permute.xlu0 %475 }
 0x11d   :  { %618 = vst.msk [vmem:[#allocation2 + $0xe6] sm:$0xff] %vm589_vm4, %v478_v62 }
 0x11e   :  { %617 = vst.msk [vmem:[#allocation2 + $0xde] sm:$0xfc] %vm587_vm5, %v476_v63  ;;  %711 = vrot.lane.b32.xlu1 %v5791_v32, %s5527_s18  ;;  %709 = vrot.lane.b32.xlu0 %v5802_v33, %s5527_s18 }
 0x120   :  { %v482_v1 = vpop.permute.xlu1 %481  ;;  %v480_v3 = vpop.permute.xlu0 %479 }
 0x121   :  { %620 = vst.msk [vmem:[#allocation2 + $0xf6] sm:$0xff] %vm589_vm4, %v482_v1 }
 0x122   :  { %619 = vst.msk [vmem:[#allocation2 + $0xee] sm:$0xfc] %vm587_vm5, %v480_v3  ;;  %715 = vrot.lane.b32.xlu1 %v5807_v34, %s5527_s18  ;;  %713 = vrot.lane.b32.xlu0 %v5812_v35, %s5527_s18 }
 0x124   :  { %v486_v56 = vpop.permute.xlu1 %485  ;;  %v484_v57 = vpop.permute.xlu0 %483 }
 0x125   :  { %622 = vst.msk [vmem:[#allocation2 + $0x106] sm:$0xff] %vm589_vm4, %v486_v56 }
 0x126   :  { %621 = vst.msk [vmem:[#allocation2 + $0xfe] sm:$0xfc] %vm587_vm5, %v484_v57  ;;  %719 = vrot.lane.b32.xlu1 %v5827_v36, %s5527_s18  ;;  %717 = vrot.lane.b32.xlu0 %v5832_v37, %s5527_s18 }
 0x128   :  { %v490_v58 = vpop.permute.xlu1 %489  ;;  %v488_v59 = vpop.permute.xlu0 %487 }
 0x129   :  { %624 = vst.msk [vmem:[#allocation2 + $0x116] sm:$0xff] %vm589_vm4, %v490_v58 }
 0x12a   :  { %623 = vst.msk [vmem:[#allocation2 + $0x10e] sm:$0xfc] %vm587_vm5, %v488_v59  ;;  %723 = vrot.lane.b32.xlu1 %v5841_v38, %s5527_s18  ;;  %721 = vrot.lane.b32.xlu0 %v5846_v39, %s5527_s18 }
 0x12c   :  { %v494_v60 = vpop.permute.xlu1 %493  ;;  %v492_v61 = vpop.permute.xlu0 %491 }
 0x12d   :  { %626 = vst.msk [vmem:[#allocation2 + $0x126] sm:$0xff] %vm589_vm4, %v494_v60 }
 0x12e   :  { %625 = vst.msk [vmem:[#allocation2 + $0x11e] sm:$0xfc] %vm587_vm5, %v492_v61  ;;  %727 = vrot.lane.b32.xlu1 %v5851_v40, %s5527_s18  ;;  %725 = vrot.lane.b32.xlu0 %v5862_v41, %s5527_s18 }
 0x130   :  { %v498_v62 = vpop.permute.xlu1 %497  ;;  %v496_v63 = vpop.permute.xlu0 %495 }
 0x131   :  { %628 = vst.msk [vmem:[#allocation2 + $0x136] sm:$0xff] %vm589_vm4, %v498_v62 }
 0x132   :  { %627 = vst.msk [vmem:[#allocation2 + $0x12e] sm:$0xfc] %vm587_vm5, %v496_v63  ;;  %731 = vrot.lane.b32.xlu1 %v5867_v42, %s5527_s18  ;;  %729 = vrot.lane.b32.xlu0 %v5872_v43, %s5527_s18 }
 0x134   :  { %v502_v1 = vpop.permute.xlu1 %501  ;;  %v500_v3 = vpop.permute.xlu0 %499 }
 0x135   :  { %630 = vst.msk [vmem:[#allocation2 + $0x146] sm:$0xff] %vm589_vm4, %v502_v1 }
 0x136   :  { %629 = vst.msk [vmem:[#allocation2 + $0x13e] sm:$0xfc] %vm587_vm5, %v500_v3  ;;  %735 = vrot.lane.b32.xlu1 %v5883_v44, %s5527_s18  ;;  %733 = vrot.lane.b32.xlu0 %v5888_v45, %s5527_s18 }
 0x138   :  { %v506_v56 = vpop.permute.xlu1 %505  ;;  %v504_v57 = vpop.permute.xlu0 %503 }
 0x139   :  { %632 = vst.msk [vmem:[#allocation2 + $0x156] sm:$0xff] %vm589_vm4, %v506_v56  ;;  %v6401_v56 = vld [vmem:[%s8713_s0 + $0x1e8] sm:$0xff] }
 0x13a   :  { %631 = vst.msk [vmem:[#allocation2 + $0x14e] sm:$0xfc] %vm587_vm5, %v504_v57  ;;  %739 = vrot.lane.b32.xlu1 %v5893_v46, %s5527_s18  ;;  %737 = vrot.lane.b32.xlu0 %v5908_v47, %s5527_s18  ;;  %v6406_v57 = vld [vmem:[%s8713_s0 + $0x1e0] sm:$0xff] }
 0x13c   :  { %v510_v58 = vpop.permute.xlu1 %509  ;;  %v508_v59 = vpop.permute.xlu0 %507 }
 0x13d   :  { %634 = vst.msk [vmem:[#allocation2 + $0x166] sm:$0xff] %vm589_vm4, %v510_v58 }
 0x13e   :  { %633 = vst.msk [vmem:[#allocation2 + $0x15e] sm:$0xfc] %vm587_vm5, %v508_v59  ;;  %743 = vrot.lane.b32.xlu1 %v5913_v48, %s5527_s18  ;;  %741 = vrot.lane.b32.xlu0 %v5922_v49, %s5527_s18 }
 0x140   :  { %v514_v60 = vpop.permute.xlu1 %513  ;;  %v512_v61 = vpop.permute.xlu0 %511 }
 0x141   :  { %636 = vst.msk [vmem:[#allocation2 + $0x176] sm:$0xff] %vm589_vm4, %v514_v60 }
 0x142   :  { %635 = vst.msk [vmem:[#allocation2 + $0x16e] sm:$0xfc] %vm587_vm5, %v512_v61  ;;  %747 = vrot.lane.b32.xlu1 %v5927_v50, %s5527_s18  ;;  %745 = vrot.lane.b32.xlu0 %v5932_v51, %s5527_s18 }
 0x144   :  { %v518_v62 = vpop.permute.xlu1 %517  ;;  %v516_v63 = vpop.permute.xlu0 %515 }
 0x145   :  { %638 = vst.msk [vmem:[#allocation2 + $0x186] sm:$0xff] %vm589_vm4, %v518_v62 }
 0x146   :  { %637 = vst.msk [vmem:[#allocation2 + $0x17e] sm:$0xfc] %vm587_vm5, %v516_v63  ;;  %751 = vrot.lane.b32.xlu1 %v5943_v52, %s5527_s18  ;;  %749 = vrot.lane.b32.xlu0 %v5948_v53, %s5527_s18 }
 0x148   :  { %v522_v1 = vpop.permute.xlu1 %521  ;;  %v520_v3 = vpop.permute.xlu0 %519 }
 0x149   :  { %640 = vst.msk [vmem:[#allocation2 + $0x196] sm:$0xff] %vm589_vm4, %v522_v1 }
 0x14a   :  { %639 = vst.msk [vmem:[#allocation2 + $0x18e] sm:$0xfc] %vm587_vm5, %v520_v3  ;;  %755 = vrot.lane.b32.xlu1 %v5953_v54, %s5527_s18  ;;  %753 = vrot.lane.b32.xlu0 %v5964_v55, %s5527_s18 }
 0x14c   :  { %v526_v58 = vpop.permute.xlu1 %525  ;;  %v524_v59 = vpop.permute.xlu0 %523 }
 0x14d   :  { %642 = vst.msk [vmem:[#allocation2 + $0x1a6] sm:$0xff] %vm589_vm4, %v526_v58 }
 0x14e   :  { %641 = vst.msk [vmem:[#allocation2 + $0x19e] sm:$0xfc] %vm587_vm5, %v524_v59  ;;  %759 = vrot.lane.b32.xlu1 %v6401_v56, %s5527_s18  ;;  %757 = vrot.lane.b32.xlu0 %v6406_v57, %s5527_s18 }
 0x150   :  { %v530_v60 = vpop.permute.xlu1 %529  ;;  %v528_v61 = vpop.permute.xlu0 %527 }
 0x151   :  { %644 = vst.msk [vmem:[#allocation2 + $0x1b6] sm:$0xff] %vm589_vm4, %v530_v60  ;;  %vm3979_vm4 = vcmask 293888  }
 0x152   :  { %643 = vst.msk [vmem:[#allocation2 + $0x1ae] sm:$0xfc] %vm587_vm5, %v528_v61  ;;  %877 = vrot.lane.b32.xlu1 %v5569_v2, %s5528_s30  ;;  %875 = vrot.lane.b32.xlu0 %v5559_v0, %s5528_s30  ;;  %vm4536_vm5 = vcmask 1040384  }
 0x154   :  { %v652_v62 = vpop.permute.xlu1 %651  ;;  %v650_v63 = vpop.permute.xlu0 %649 }
 0x155   :  { %820 = vst.msk [vmem:[#allocation2 + $0x8] sm:$0x3f] %vm819_vm6, %v652_v62 }
 0x156   :  { %818 = vst.msk [vmem:[#allocation2] sm:$0xff] %vm817_vm7, %v650_v63  ;;  %881 = vrot.lane.b32.xlu1 %v5585_v4, %s5528_s30  ;;  %879 = vrot.lane.b32.xlu0 %v5598_v5, %s5528_s30 }
 0x158   :  { %v656_v1 = vpop.permute.xlu1 %655  ;;  %v654_v3 = vpop.permute.xlu0 %653 }
 0x159   :  { %822 = vst.msk [vmem:[#allocation2 + $0x18] sm:$0x3f] %vm819_vm6, %v656_v1 }
 0x15a   :  { %821 = vst.msk [vmem:[#allocation2 + $0x10] sm:$0xff] %vm817_vm7, %v654_v3  ;;  %885 = vrot.lane.b32.xlu1 %v5603_v6, %s5528_s30  ;;  %883 = vrot.lane.b32.xlu0 %v5608_v7, %s5528_s30 }
 0x15c   :  { %v660_v58 = vpop.permute.xlu1 %659  ;;  %v658_v59 = vpop.permute.xlu0 %657 }
 0x15d   :  { %824 = vst.msk [vmem:[#allocation2 + $0x28] sm:$0x3f] %vm819_vm6, %v660_v58 }
 0x15e   :  { %823 = vst.msk [vmem:[#allocation2 + $0x20] sm:$0xff] %vm817_vm7, %v658_v59  ;;  %889 = vrot.lane.b32.xlu1 %v5615_v8, %s5528_s30  ;;  %887 = vrot.lane.b32.xlu0 %v5620_v9, %s5528_s30 }
 0x160   :  { %v664_v60 = vpop.permute.xlu1 %663  ;;  %v662_v61 = vpop.permute.xlu0 %661 }
 0x161   :  { %826 = vst.msk [vmem:[#allocation2 + $0x38] sm:$0x3f] %vm819_vm6, %v664_v60 }
 0x162   :  { %825 = vst.msk [vmem:[#allocation2 + $0x30] sm:$0xff] %vm817_vm7, %v662_v61  ;;  %893 = vrot.lane.b32.xlu1 %v5625_v10, %s5528_s30  ;;  %891 = vrot.lane.b32.xlu0 %v5638_v11, %s5528_s30 }
 0x164   :  { %v668_v62 = vpop.permute.xlu1 %667  ;;  %v666_v63 = vpop.permute.xlu0 %665 }
 0x165   :  { %828 = vst.msk [vmem:[#allocation2 + $0x48] sm:$0x3f] %vm819_vm6, %v668_v62 }
 0x166   :  { %827 = vst.msk [vmem:[#allocation2 + $0x40] sm:$0xff] %vm817_vm7, %v666_v63  ;;  %897 = vrot.lane.b32.xlu1 %v5643_v12, %s5528_s30  ;;  %895 = vrot.lane.b32.xlu0 %v5648_v13, %s5528_s30 }
 0x168   :  { %v672_v1 = vpop.permute.xlu1 %671  ;;  %v670_v3 = vpop.permute.xlu0 %669 }
 0x169   :  { %830 = vst.msk [vmem:[#allocation2 + $0x58] sm:$0x3f] %vm819_vm6, %v672_v1 }
 0x16a   :  { %829 = vst.msk [vmem:[#allocation2 + $0x50] sm:$0xff] %vm817_vm7, %v670_v3  ;;  %901 = vrot.lane.b32.xlu1 %v5661_v14, %s5528_s30  ;;  %899 = vrot.lane.b32.xlu0 %v5666_v15, %s5528_s30 }
 0x16c   :  { %v676_v58 = vpop.permute.xlu1 %675  ;;  %v674_v59 = vpop.permute.xlu0 %673 }
 0x16d   :  { %832 = vst.msk [vmem:[#allocation2 + $0x68] sm:$0x3f] %vm819_vm6, %v676_v58 }
 0x16e   :  { %831 = vst.msk [vmem:[#allocation2 + $0x60] sm:$0xff] %vm817_vm7, %v674_v59  ;;  %905 = vrot.lane.b32.xlu1 %v5677_v16, %s5528_s30  ;;  %903 = vrot.lane.b32.xlu0 %v5682_v17, %s5528_s30 }
 0x170   :  { %v680_v60 = vpop.permute.xlu1 %679  ;;  %v678_v61 = vpop.permute.xlu0 %677 }
 0x171   :  { %834 = vst.msk [vmem:[#allocation2 + $0x78] sm:$0x3f] %vm819_vm6, %v680_v60 }
 0x172   :  { %833 = vst.msk [vmem:[#allocation2 + $0x70] sm:$0xff] %vm817_vm7, %v678_v61  ;;  %909 = vrot.lane.b32.xlu1 %v5687_v18, %s5528_s30  ;;  %907 = vrot.lane.b32.xlu0 %v5698_v19, %s5528_s30 }
 0x174   :  { %v684_v62 = vpop.permute.xlu1 %683  ;;  %v682_v63 = vpop.permute.xlu0 %681 }
 0x175   :  { %836 = vst.msk [vmem:[#allocation2 + $0x88] sm:$0x3f] %vm819_vm6, %v684_v62 }
 0x176   :  { %835 = vst.msk [vmem:[#allocation2 + $0x80] sm:$0xff] %vm817_vm7, %v682_v63  ;;  %913 = vrot.lane.b32.xlu1 %v5703_v20, %s5528_s30  ;;  %911 = vrot.lane.b32.xlu0 %v5708_v21, %s5528_s30 }
 0x178   :  { %v688_v1 = vpop.permute.xlu1 %687  ;;  %v686_v3 = vpop.permute.xlu0 %685 }
 0x179   :  { %838 = vst.msk [vmem:[#allocation2 + $0x98] sm:$0x3f] %vm819_vm6, %v688_v1 }
 0x17a   :  { %837 = vst.msk [vmem:[#allocation2 + $0x90] sm:$0xff] %vm817_vm7, %v686_v3  ;;  %917 = vrot.lane.b32.xlu1 %v5717_v22, %s5528_s30  ;;  %915 = vrot.lane.b32.xlu0 %v5722_v23, %s5528_s30 }
 0x17c   :  { %v692_v58 = vpop.permute.xlu1 %691  ;;  %v690_v59 = vpop.permute.xlu0 %689 }
 0x17d   :  { %840 = vst.msk [vmem:[#allocation2 + $0xa8] sm:$0x3f] %vm819_vm6, %v692_v58 }
 0x17e   :  { %839 = vst.msk [vmem:[#allocation2 + $0xa0] sm:$0xff] %vm817_vm7, %v690_v59  ;;  %921 = vrot.lane.b32.xlu1 %v5727_v24, %s5528_s30  ;;  %919 = vrot.lane.b32.xlu0 %v5744_v25, %s5528_s30 }
 0x180   :  { %v696_v60 = vpop.permute.xlu1 %695  ;;  %v694_v61 = vpop.permute.xlu0 %693 }
 0x181   :  { %842 = vst.msk [vmem:[#allocation2 + $0xb8] sm:$0x3f] %vm819_vm6, %v696_v60 }
 0x182   :  { %841 = vst.msk [vmem:[#allocation2 + $0xb0] sm:$0xff] %vm817_vm7, %v694_v61  ;;  %925 = vrot.lane.b32.xlu1 %v5749_v26, %s5528_s30  ;;  %923 = vrot.lane.b32.xlu0 %v5758_v27, %s5528_s30 }
 0x184   :  { %v700_v62 = vpop.permute.xlu1 %699  ;;  %v698_v63 = vpop.permute.xlu0 %697 }
 0x185   :  { %844 = vst.msk [vmem:[#allocation2 + $0xc8] sm:$0x3f] %vm819_vm6, %v700_v62 }
 0x186   :  { %843 = vst.msk [vmem:[#allocation2 + $0xc0] sm:$0xff] %vm817_vm7, %v698_v63  ;;  %929 = vrot.lane.b32.xlu1 %v6307_v28, %s5528_s30  ;;  %927 = vrot.lane.b32.xlu0 %v6312_v29, %s5528_s30 }
 0x188   :  { %v704_v1 = vpop.permute.xlu1 %703  ;;  %v702_v3 = vpop.permute.xlu0 %701 }
 0x189   :  { %846 = vst.msk [vmem:[#allocation2 + $0xd8] sm:$0x3f] %vm819_vm6, %v704_v1 }
 0x18a   :  { %845 = vst.msk [vmem:[#allocation2 + $0xd0] sm:$0xff] %vm817_vm7, %v702_v3  ;;  %933 = vrot.lane.b32.xlu1 %v5781_v30, %s5528_s30  ;;  %931 = vrot.lane.b32.xlu0 %v5786_v31, %s5528_s30 }
 0x18c   :  { %v708_v58 = vpop.permute.xlu1 %707  ;;  %v706_v59 = vpop.permute.xlu0 %705 }
 0x18d   :  { %848 = vst.msk [vmem:[#allocation2 + $0xe8] sm:$0x3f] %vm819_vm6, %v708_v58 }
 0x18e   :  { %847 = vst.msk [vmem:[#allocation2 + $0xe0] sm:$0xff] %vm817_vm7, %v706_v59  ;;  %937 = vrot.lane.b32.xlu1 %v5791_v32, %s5528_s30  ;;  %935 = vrot.lane.b32.xlu0 %v5802_v33, %s5528_s30 }
 0x190   :  { %v712_v28 = vpop.permute.xlu1 %711  ;;  %v710_v29 = vpop.permute.xlu0 %709 }
 0x191   :  { %850 = vst.msk [vmem:[#allocation2 + $0xf8] sm:$0x3f] %vm819_vm6, %v712_v28 }
 0x192   :  { %849 = vst.msk [vmem:[#allocation2 + $0xf0] sm:$0xff] %vm817_vm7, %v710_v29  ;;  %941 = vrot.lane.b32.xlu1 %v5807_v34, %s5528_s30  ;;  %939 = vrot.lane.b32.xlu0 %v5812_v35, %s5528_s30 }
 0x194   :  { %v716_v60 = vpop.permute.xlu1 %715  ;;  %v714_v61 = vpop.permute.xlu0 %713 }
 0x195   :  { %852 = vst.msk [vmem:[#allocation2 + $0x108] sm:$0x3f] %vm819_vm6, %v716_v60 }
 0x196   :  { %851 = vst.msk [vmem:[#allocation2 + $0x100] sm:$0xff] %vm817_vm7, %v714_v61  ;;  %945 = vrot.lane.b32.xlu1 %v5827_v36, %s5528_s30  ;;  %943 = vrot.lane.b32.xlu0 %v5832_v37, %s5528_s30 }
 0x198   :  { %v720_v62 = vpop.permute.xlu1 %719  ;;  %v718_v63 = vpop.permute.xlu0 %717 }
 0x199   :  { %854 = vst.msk [vmem:[#allocation2 + $0x118] sm:$0x3f] %vm819_vm6, %v720_v62 }
 0x19a   :  { %853 = vst.msk [vmem:[#allocation2 + $0x110] sm:$0xff] %vm817_vm7, %v718_v63  ;;  %949 = vrot.lane.b32.xlu1 %v5841_v38, %s5528_s30  ;;  %947 = vrot.lane.b32.xlu0 %v5846_v39, %s5528_s30 }
 0x19c   :  { %v724_v1 = vpop.permute.xlu1 %723  ;;  %v722_v3 = vpop.permute.xlu0 %721 }
 0x19d   :  { %856 = vst.msk [vmem:[#allocation2 + $0x128] sm:$0x3f] %vm819_vm6, %v724_v1 }
 0x19e   :  { %855 = vst.msk [vmem:[#allocation2 + $0x120] sm:$0xff] %vm817_vm7, %v722_v3  ;;  %953 = vrot.lane.b32.xlu1 %v5851_v40, %s5528_s30  ;;  %951 = vrot.lane.b32.xlu0 %v5862_v41, %s5528_s30 }
 0x1a0   :  { %v728_v58 = vpop.permute.xlu1 %727  ;;  %v726_v59 = vpop.permute.xlu0 %725 }
 0x1a1   :  { %858 = vst.msk [vmem:[#allocation2 + $0x138] sm:$0x3f] %vm819_vm6, %v728_v58 }
 0x1a2   :  { %857 = vst.msk [vmem:[#allocation2 + $0x130] sm:$0xff] %vm817_vm7, %v726_v59  ;;  %957 = vrot.lane.b32.xlu1 %v5867_v42, %s5528_s30  ;;  %955 = vrot.lane.b32.xlu0 %v5872_v43, %s5528_s30 }
 0x1a4   :  { %v732_v28 = vpop.permute.xlu1 %731  ;;  %v730_v29 = vpop.permute.xlu0 %729 }
 0x1a5   :  { %860 = vst.msk [vmem:[#allocation2 + $0x148] sm:$0x3f] %vm819_vm6, %v732_v28 }
 0x1a6   :  { %859 = vst.msk [vmem:[#allocation2 + $0x140] sm:$0xff] %vm817_vm7, %v730_v29  ;;  %961 = vrot.lane.b32.xlu1 %v5883_v44, %s5528_s30  ;;  %959 = vrot.lane.b32.xlu0 %v5888_v45, %s5528_s30 }
 0x1a8   :  { %v736_v60 = vpop.permute.xlu1 %735  ;;  %v734_v61 = vpop.permute.xlu0 %733 }
 0x1a9   :  { %862 = vst.msk [vmem:[#allocation2 + $0x158] sm:$0x3f] %vm819_vm6, %v736_v60 }
 0x1aa   :  { %861 = vst.msk [vmem:[#allocation2 + $0x150] sm:$0xff] %vm817_vm7, %v734_v61  ;;  %965 = vrot.lane.b32.xlu1 %v5893_v46, %s5528_s30  ;;  %963 = vrot.lane.b32.xlu0 %v5908_v47, %s5528_s30 }
 0x1ac   :  { %v740_v62 = vpop.permute.xlu1 %739  ;;  %v738_v63 = vpop.permute.xlu0 %737 }
 0x1ad   :  { %864 = vst.msk [vmem:[#allocation2 + $0x168] sm:$0x3f] %vm819_vm6, %v740_v62 }
 0x1ae   :  { %863 = vst.msk [vmem:[#allocation2 + $0x160] sm:$0xff] %vm817_vm7, %v738_v63  ;;  %969 = vrot.lane.b32.xlu1 %v5913_v48, %s5528_s30  ;;  %967 = vrot.lane.b32.xlu0 %v5922_v49, %s5528_s30 }
 0x1b0   :  { %v744_v1 = vpop.permute.xlu1 %743  ;;  %v742_v3 = vpop.permute.xlu0 %741 }
 0x1b1   :  { %866 = vst.msk [vmem:[#allocation2 + $0x178] sm:$0x3f] %vm819_vm6, %v744_v1 }
 0x1b2   :  { %865 = vst.msk [vmem:[#allocation2 + $0x170] sm:$0xff] %vm817_vm7, %v742_v3  ;;  %973 = vrot.lane.b32.xlu1 %v5927_v50, %s5528_s30  ;;  %971 = vrot.lane.b32.xlu0 %v5932_v51, %s5528_s30 }
 0x1b4   :  { %v748_v58 = vpop.permute.xlu1 %747  ;;  %v746_v59 = vpop.permute.xlu0 %745 }
 0x1b5   :  { %868 = vst.msk [vmem:[#allocation2 + $0x188] sm:$0x3f] %vm819_vm6, %v748_v58 }
 0x1b6   :  { %867 = vst.msk [vmem:[#allocation2 + $0x180] sm:$0xff] %vm817_vm7, %v746_v59  ;;  %977 = vrot.lane.b32.xlu1 %v5943_v52, %s5528_s30  ;;  %975 = vrot.lane.b32.xlu0 %v5948_v53, %s5528_s30 }
 0x1b8   :  { %v752_v28 = vpop.permute.xlu1 %751  ;;  %v750_v29 = vpop.permute.xlu0 %749 }
 0x1b9   :  { %870 = vst.msk [vmem:[#allocation2 + $0x198] sm:$0x3f] %vm819_vm6, %v752_v28 }
 0x1ba   :  { %869 = vst.msk [vmem:[#allocation2 + $0x190] sm:$0xff] %vm817_vm7, %v750_v29  ;;  %981 = vrot.lane.b32.xlu1 %v5953_v54, %s5528_s30  ;;  %979 = vrot.lane.b32.xlu0 %v5964_v55, %s5528_s30 }
 0x1bc   :  { %v756_v60 = vpop.permute.xlu1 %755  ;;  %v754_v61 = vpop.permute.xlu0 %753 }
 0x1bd   :  { %872 = vst.msk [vmem:[#allocation2 + $0x1a8] sm:$0x3f] %vm819_vm6, %v756_v60 }
 0x1be   :  { %871 = vst.msk [vmem:[#allocation2 + $0x1a0] sm:$0xff] %vm817_vm7, %v754_v61  ;;  %985 = vrot.lane.b32.xlu1 %v6401_v56, %s5528_s30  ;;  %983 = vrot.lane.b32.xlu0 %v6406_v57, %s5528_s30 }
 0x1c0   :  { %v760_v62 = vpop.permute.xlu1 %759  ;;  %v758_v63 = vpop.permute.xlu0 %757 }
 0x1c1   :  { %874 = vst.msk [vmem:[#allocation2 + $0x1b8] sm:$0x3f] %vm819_vm6, %v760_v62  ;;  %vm8719_vm6 = vcmask 1041409  }
 0x1c2   :  { %873 = vst.msk [vmem:[#allocation2 + $0x1b0] sm:$0xff] %vm817_vm7, %v758_v63  ;;  %1103 = vrot.lane.b32.xlu1 %v5569_v2, %s5529_s4  ;;  %1101 = vrot.lane.b32.xlu0 %v5559_v0, %s5529_s4  ;;  %vm4542_vm7 = vcmask 1042434  }
 0x1c4   :  { %v878_v1 = vpop.permute.xlu1 %877  ;;  %v876_v56 = vpop.permute.xlu0 %875 }
 0x1c5   :  { %1046 = vst.msk [vmem:[#allocation2 + $0x7] sm:$0x7f] %vm1045_vm8, %v878_v1 }
 0x1c6   :  { %1044 = vst.msk [vmem:[#allocation2 - $0x1] sm:$0xfe] %vm1043_vm9, %v876_v56  ;;  %1107 = vrot.lane.b32.xlu1 %v5585_v4, %s5529_s4  ;;  %1105 = vrot.lane.b32.xlu0 %v5598_v5, %s5529_s4 }
 0x1c8   :  { %v882_v57 = vpop.permute.xlu1 %881  ;;  %v880_v3 = vpop.permute.xlu0 %879 }
 0x1c9   :  { %1048 = vst.msk [vmem:[#allocation2 + $0x17] sm:$0x7f] %vm1045_vm8, %v882_v57 }
 0x1ca   :  { %1047 = vst.msk [vmem:[#allocation2 + $0xf] sm:$0xfe] %vm1043_vm9, %v880_v3  ;;  %1111 = vrot.lane.b32.xlu1 %v5603_v6, %s5529_s4  ;;  %1109 = vrot.lane.b32.xlu0 %v5608_v7, %s5529_s4 }
 0x1cc   :  { %v886_v0 = vpop.permute.xlu1 %885  ;;  %v884_v2 = vpop.permute.xlu0 %883 }
 0x1cd   :  { %1050 = vst.msk [vmem:[#allocation2 + $0x27] sm:$0x7f] %vm1045_vm8, %v886_v0 }
 0x1ce   :  { %1049 = vst.msk [vmem:[#allocation2 + $0x1f] sm:$0xfe] %vm1043_vm9, %v884_v2  ;;  %1115 = vrot.lane.b32.xlu1 %v5615_v8, %s5529_s4  ;;  %1113 = vrot.lane.b32.xlu0 %v5620_v9, %s5529_s4 }
 0x1d0   :  { %v890_v58 = vpop.permute.xlu1 %889  ;;  %v888_v59 = vpop.permute.xlu0 %887 }
 0x1d1   :  { %1052 = vst.msk [vmem:[#allocation2 + $0x37] sm:$0x7f] %vm1045_vm8, %v890_v58 }
 0x1d2   :  { %1051 = vst.msk [vmem:[#allocation2 + $0x2f] sm:$0xfe] %vm1043_vm9, %v888_v59  ;;  %1119 = vrot.lane.b32.xlu1 %v5625_v10, %s5529_s4  ;;  %1117 = vrot.lane.b32.xlu0 %v5638_v11, %s5529_s4 }
 0x1d4   :  { %v894_v28 = vpop.permute.xlu1 %893  ;;  %v892_v29 = vpop.permute.xlu0 %891 }
 0x1d5   :  { %1054 = vst.msk [vmem:[#allocation2 + $0x47] sm:$0x7f] %vm1045_vm8, %v894_v28 }
 0x1d6   :  { %1053 = vst.msk [vmem:[#allocation2 + $0x3f] sm:$0xfe] %vm1043_vm9, %v892_v29  ;;  %1123 = vrot.lane.b32.xlu1 %v5643_v12, %s5529_s4  ;;  %1121 = vrot.lane.b32.xlu0 %v5648_v13, %s5529_s4 }
 0x1d8   :  { %v898_v60 = vpop.permute.xlu1 %897  ;;  %v896_v61 = vpop.permute.xlu0 %895 }
 0x1d9   :  { %1056 = vst.msk [vmem:[#allocation2 + $0x57] sm:$0x7f] %vm1045_vm8, %v898_v60 }
 0x1da   :  { %1055 = vst.msk [vmem:[#allocation2 + $0x4f] sm:$0xfe] %vm1043_vm9, %v896_v61  ;;  %1127 = vrot.lane.b32.xlu1 %v5661_v14, %s5529_s4  ;;  %1125 = vrot.lane.b32.xlu0 %v5666_v15, %s5529_s4 }
 0x1dc   :  { %v902_v62 = vpop.permute.xlu1 %901  ;;  %v900_v63 = vpop.permute.xlu0 %899 }
 0x1dd   :  { %1058 = vst.msk [vmem:[#allocation2 + $0x67] sm:$0x7f] %vm1045_vm8, %v902_v62  ;;  %v5371_v62 = vld [vmem:[%s8714_s1 + $0x10] ss:$0 sps:$4 sm:$0x33]  }
 0x1de   :  { %1057 = vst.msk [vmem:[#allocation2 + $0x5f] sm:$0xfe] %vm1043_vm9, %v900_v63  ;;  %1131 = vrot.lane.b32.xlu1 %v5677_v16, %s5529_s4  ;;  %1129 = vrot.lane.b32.xlu0 %v5682_v17, %s5529_s4 }
 0x1e0   :  { %v906_v1 = vpop.permute.xlu1 %905  ;;  %v904_v56 = vpop.permute.xlu0 %903 }
 0x1e1   :  { %1060 = vst.msk [vmem:[#allocation2 + $0x77] sm:$0x7f] %vm1045_vm8, %v906_v1 }
 0x1e2   :  { %1059 = vst.msk [vmem:[#allocation2 + $0x6f] sm:$0xfe] %vm1043_vm9, %v904_v56  ;;  %1135 = vrot.lane.b32.xlu1 %v5687_v18, %s5529_s4  ;;  %1133 = vrot.lane.b32.xlu0 %v5698_v19, %s5529_s4  ;;  %v5372_v56 = vld [vmem:[%s8714_s1 + $0x8] sm:$0xff]  }
 0x1e4   :  { %v910_v57 = vpop.permute.xlu1 %909  ;;  %v908_v3 = vpop.permute.xlu0 %907 }
 0x1e5   :  { %1062 = vst.msk [vmem:[#allocation2 + $0x87] sm:$0x7f] %vm1045_vm8, %v910_v57 }
 0x1e6   :  { %1061 = vst.msk [vmem:[#allocation2 + $0x7f] sm:$0xfe] %vm1043_vm9, %v908_v3  ;;  %1139 = vrot.lane.b32.xlu1 %v5703_v20, %s5529_s4  ;;  %1137 = vrot.lane.b32.xlu0 %v5708_v21, %s5529_s4 }
 0x1e8   :  { %v914_v0 = vpop.permute.xlu1 %913  ;;  %v912_v2 = vpop.permute.xlu0 %911 }
 0x1e9   :  { %1064 = vst.msk [vmem:[#allocation2 + $0x97] sm:$0x7f] %vm1045_vm8, %v914_v0  ;;  %v5373_v0 = vld [vmem:[%s8714_s1] sm:$0xff]  }
 0x1ea   :  { %1063 = vst.msk [vmem:[#allocation2 + $0x8f] sm:$0xfe] %vm1043_vm9, %v912_v2  ;;  %1333 = vrot.lane.b32.xlu1 %v5585_v4, %s5530_s5  ;;  %1331 = vrot.lane.b32.xlu0 %v5598_v5, %s5530_s5 }
 0x1ec   :  { %v918_v58 = vpop.permute.xlu1 %917  ;;  %v916_v59 = vpop.permute.xlu0 %915 }
 0x1ed   :  { %1066 = vst.msk [vmem:[#allocation2 + $0xa7] sm:$0x7f] %vm1045_vm8, %v918_v58 }
 0x1ee   :  { %1065 = vst.msk [vmem:[#allocation2 + $0x9f] sm:$0xfe] %vm1043_vm9, %v916_v59  ;;  %1559 = vrot.lane.b32.xlu1 %v5585_v4, %s5531_s6  ;;  %1557 = vrot.lane.b32.xlu0 %v5598_v5, %s5531_s6 }
 0x1f0   :  { %v922_v28 = vpop.permute.xlu1 %921  ;;  %v920_v29 = vpop.permute.xlu0 %919 }
 0x1f1   :  { %1068 = vst.msk [vmem:[#allocation2 + $0xb7] sm:$0x7f] %vm1045_vm8, %v922_v28 }
 0x1f2   :  { %1067 = vst.msk [vmem:[#allocation2 + $0xaf] sm:$0xfe] %vm1043_vm9, %v920_v29  ;;  %1785 = vrot.lane.b32.xlu1 %v5585_v4, %s5532_s7  ;;  %1783 = vrot.lane.b32.xlu0 %v5598_v5, %s5532_s7  ;;  %v5533_v4 = vmov 0.0   ;;  %v4057_v5 = vsel %vm4055_vm10, %v5371_v62, 0  ;;  %vm8718_vm10 = vcmask 1045509  }
 0x1f3   :  { %5248 = vmatprep.subr.bf16.mxu0 %v5533_v4  ;;  %5354 = vmatprep.subr.bf16.mxu1 %v5533_v4 }
 0x1f4   :  { %v926_v60 = vpop.permute.xlu1 %925  ;;  %v924_v61 = vpop.permute.xlu0 %923  ;;  %5249 = vmatpush3.bf16.msra.mxu0 %v4057_v5  ;;  %5357 = vmatpush3.bf16.msra.mxu1 %v4057_v5 }
 0x1f5   :  { %1070 = vst.msk [vmem:[#allocation2 + $0xc7] sm:$0x7f] %vm1045_vm8, %v926_v60  ;;  %5250 = vmatprep.subr.bf16.mxu0 %v5533_v4  ;;  %5355 = vmatprep.subr.bf16.mxu1 %v5533_v4 }
 0x1f6   :  { %1069 = vst.msk [vmem:[#allocation2 + $0xbf] sm:$0xfe] %vm1043_vm9, %v924_v61  ;;  %1337 = vrot.lane.b32.xlu1 %v5603_v6, %s5530_s5  ;;  %1335 = vrot.lane.b32.xlu0 %v5608_v7, %s5530_s5 }
 0x1f7   :  { %5254 = vmatprep.mubr.msk.bf16.mxu0 %vm8720_vm11, %v5533_v4  ;;  %5306 = vmatprep.mubr.msk.bf16.mxu1 %vm8720_vm11, %v5533_v4 }
 0x1f8   :  { %v930_v63 = vpop.permute.xlu1 %929  ;;  %v928_v1 = vpop.permute.xlu0 %927  ;;  %5251 = vmatpush3.bf16.msra.mxu0 %v5372_v56  ;;  %5358 = vmatpush3.bf16.msra.mxu1 %v5372_v56 }
 0x1f9   :  { %1072 = vst.msk [vmem:[#allocation2 + $0xd7] sm:$0x7f] %vm1045_vm8, %v930_v63  ;;  %5252 = vmatprep.subr.bf16.mxu0 %v5533_v4  ;;  %5356 = vmatprep.subr.bf16.mxu1 %v5533_v4 }
 0x1fa   :  { %1071 = vst.msk [vmem:[#allocation2 + $0xcf] sm:$0xfe] %vm1043_vm9, %v928_v1  ;;  %1563 = vrot.lane.b32.xlu1 %v5603_v6, %s5531_s6  ;;  %1561 = vrot.lane.b32.xlu0 %v5608_v7, %s5531_s6 }
 0x1fc   :  { %v934_v57 = vpop.permute.xlu1 %933  ;;  %v932_v3 = vpop.permute.xlu0 %931  ;;  %5253 = vmatpush3.bf16.msra.mxu0 %v5373_v0  ;;  %5359 = vmatpush3.bf16.msra.mxu1 %v5373_v0 }
 0x1fd   :  { %1074 = vst.msk [vmem:[#allocation2 + $0xe7] sm:$0x7f] %vm1045_vm8, %v934_v57 }
 0x1fe   :  { %1073 = vst.msk [vmem:[#allocation2 + $0xdf] sm:$0xfe] %vm1043_vm9, %v932_v3  ;;  %1789 = vrot.lane.b32.xlu1 %v5603_v6, %s5532_s7  ;;  %1787 = vrot.lane.b32.xlu0 %v5608_v7, %s5532_s7 }
 0x200   :  { %v938_v2 = vpop.permute.xlu1 %937  ;;  %v936_v58 = vpop.permute.xlu0 %935 }
 0x201   :  { %1076 = vst.msk [vmem:[#allocation2 + $0xf7] sm:$0x7f] %vm1045_vm8, %v938_v2 }
 0x202   :  { %1075 = vst.msk [vmem:[#allocation2 + $0xef] sm:$0xfe] %vm1043_vm9, %v936_v58  ;;  %1341 = vrot.lane.b32.xlu1 %v5615_v8, %s5530_s5  ;;  %1339 = vrot.lane.b32.xlu0 %v5620_v9, %s5530_s5 }
 0x204   :  { %v942_v6 = vpop.permute.xlu1 %941  ;;  %v940_v7 = vpop.permute.xlu0 %939 }
 0x205   :  { %1078 = vst.msk [vmem:[#allocation2 + $0x107] sm:$0x7f] %vm1045_vm8, %v942_v6 }
 0x206   :  { %1077 = vst.msk [vmem:[#allocation2 + $0xff] sm:$0xfe] %vm1043_vm9, %v940_v7  ;;  %1567 = vrot.lane.b32.xlu1 %v5615_v8, %s5531_s6  ;;  %1565 = vrot.lane.b32.xlu0 %v5620_v9, %s5531_s6 }
 0x208   :  { %v946_v59 = vpop.permute.xlu1 %945  ;;  %v944_v28 = vpop.permute.xlu0 %943 }
 0x209   :  { %1080 = vst.msk [vmem:[#allocation2 + $0x117] sm:$0x7f] %vm1045_vm8, %v946_v59 }
 0x20a   :  { %1079 = vst.msk [vmem:[#allocation2 + $0x10f] sm:$0xfe] %vm1043_vm9, %v944_v28  ;;  %1163 = vrot.lane.b32.xlu1 %v5791_v32, %s5529_s4  ;;  %1161 = vrot.lane.b32.xlu0 %v5802_v33, %s5529_s4 }
 0x20c   :  { %v950_v29 = vpop.permute.xlu1 %949  ;;  %v948_v60 = vpop.permute.xlu0 %947 }
 0x20d   :  { %1082 = vst.msk [vmem:[#allocation2 + $0x127] sm:$0x7f] %vm1045_vm8, %v950_v29 }
 0x20e   :  { %1081 = vst.msk [vmem:[#allocation2 + $0x11f] sm:$0xfe] %vm1043_vm9, %v948_v60  ;;  %1793 = vrot.lane.b32.xlu1 %v5615_v8, %s5532_s7  ;;  %1791 = vrot.lane.b32.xlu0 %v5620_v9, %s5532_s7 }
 0x210   :  { %v954_v61 = vpop.permute.xlu1 %953  ;;  %v952_v62 = vpop.permute.xlu0 %951 }
 0x211   :  { %1084 = vst.msk [vmem:[#allocation2 + $0x137] sm:$0x7f] %vm1045_vm8, %v954_v61 }
 0x212   :  { %1083 = vst.msk [vmem:[#allocation2 + $0x12f] sm:$0xfe] %vm1043_vm9, %v952_v62  ;;  %1393 = vrot.lane.b32.xlu1 %v5807_v34, %s5530_s5  ;;  %1391 = vrot.lane.b32.xlu0 %v5812_v35, %s5530_s5 }
 0x214   :  { %v958_v5 = vpop.permute.xlu1 %957  ;;  %v956_v63 = vpop.permute.xlu0 %955 }
 0x215   :  { %1086 = vst.msk [vmem:[#allocation2 + $0x147] sm:$0x7f] %vm1045_vm8, %v958_v5 }
 0x216   :  { %1085 = vst.msk [vmem:[#allocation2 + $0x13f] sm:$0xfe] %vm1043_vm9, %v956_v63  ;;  %1159 = vrot.lane.b32.xlu1 %v5781_v30, %s5529_s4  ;;  %1157 = vrot.lane.b32.xlu0 %v5786_v31, %s5529_s4 }
 0x218   :  { %v962_v8 = vpop.permute.xlu1 %961  ;;  %v960_v9 = vpop.permute.xlu0 %959 }
 0x219   :  { %1088 = vst.msk [vmem:[#allocation2 + $0x157] sm:$0x7f] %vm1045_vm8, %v962_v8 }
 0x21a   :  { %1087 = vst.msk [vmem:[#allocation2 + $0x14f] sm:$0xfe] %vm1043_vm9, %v960_v9  ;;  %1619 = vrot.lane.b32.xlu1 %v5807_v34, %s5531_s6  ;;  %1617 = vrot.lane.b32.xlu0 %v5812_v35, %s5531_s6 }
 0x21c   :  { %v966_v1 = vpop.permute.xlu1 %965  ;;  %v964_v56 = vpop.permute.xlu0 %963 }
 0x21d   :  { %1090 = vst.msk [vmem:[#allocation2 + $0x167] sm:$0x7f] %vm1045_vm8, %v966_v1 }
 0x21e   :  { %1089 = vst.msk [vmem:[#allocation2 + $0x15f] sm:$0xfe] %vm1043_vm9, %v964_v56  ;;  %1389 = vrot.lane.b32.xlu1 %v5791_v32, %s5530_s5  ;;  %1387 = vrot.lane.b32.xlu0 %v5802_v33, %s5530_s5 }
 0x220   :  { %v970_v30 = vpop.permute.xlu1 %969  ;;  %v968_v31 = vpop.permute.xlu0 %967 }
 0x221   :  { %1092 = vst.msk [vmem:[#allocation2 + $0x177] sm:$0x7f] %vm1045_vm8, %v970_v30 }
 0x222   :  { %1091 = vst.msk [vmem:[#allocation2 + $0x16f] sm:$0xfe] %vm1043_vm9, %v968_v31  ;;  %1845 = vrot.lane.b32.xlu1 %v5807_v34, %s5532_s7  ;;  %1843 = vrot.lane.b32.xlu0 %v5812_v35, %s5532_s7 }
 0x224   :  { %v974_v57 = vpop.permute.xlu1 %973  ;;  %v972_v3 = vpop.permute.xlu0 %971 }
 0x225   :  { %1094 = vst.msk [vmem:[#allocation2 + $0x187] sm:$0x7f] %vm1045_vm8, %v974_v57 }
 0x226   :  { %1093 = vst.msk [vmem:[#allocation2 + $0x17f] sm:$0xfe] %vm1043_vm9, %v972_v3  ;;  %1615 = vrot.lane.b32.xlu1 %v5791_v32, %s5531_s6  ;;  %1613 = vrot.lane.b32.xlu0 %v5802_v33, %s5531_s6 }
 0x228   :  { %v978_v0 = vpop.permute.xlu1 %977  ;;  %v976_v2 = vpop.permute.xlu0 %975 }
 0x229   :  { %1096 = vst.msk [vmem:[#allocation2 + $0x197] sm:$0x7f] %vm1045_vm8, %v978_v0 }
 0x22a   :  { %1095 = vst.msk [vmem:[#allocation2 + $0x18f] sm:$0xfe] %vm1043_vm9, %v976_v2  ;;  %1343 = vrot.lane.b32.xlu1 %v5638_v11, %s5530_s5  ;;  %1841 = vrot.lane.b32.xlu0 %v5791_v32, %s5532_s7 }
 0x22c   :  { %v982_v58 = vpop.permute.xlu1 %981  ;;  %v980_v6 = vpop.permute.xlu0 %979 }
 0x22d   :  { %1098 = vst.msk [vmem:[#allocation2 + $0x1a7] sm:$0x7f] %vm1045_vm8, %v982_v58 }
 0x22e   :  { %1097 = vst.msk [vmem:[#allocation2 + $0x19f] sm:$0xfe] %vm1043_vm9, %v980_v6  ;;  %1569 = vrot.lane.b32.xlu1 %v5638_v11, %s5531_s6  ;;  %1345 = vrot.lane.b32.xlu0 %v5625_v10, %s5530_s5 }
 0x230   :  { %v986_v7 = vpop.permute.xlu1 %985  ;;  %v984_v59 = vpop.permute.xlu0 %983 }
 0x231   :  { %1100 = vst.msk [vmem:[#allocation2 + $0x1b7] sm:$0x7f] %vm1045_vm8, %v986_v7  ;;  %v2125_v7 = vlaneseq  ;;  %vm4545_vm8 = vcmask 1043459  }
 0x232   :  { %1099 = vst.msk [vmem:[#allocation2 + $0x1af] sm:$0xfe] %vm1043_vm9, %v984_v59  ;;  %1165 = vrot.lane.b32.xlu1 %v5812_v35, %s5529_s4  ;;  %1571 = vrot.lane.b32.xlu0 %v5625_v10, %s5531_s6  ;;  %vm4548_vm9 = vcmask 1044484  }
 0x234   :  { %v1104_v32 = vpop.permute.xlu1 %1103  ;;  %v1102_v28 = vpop.permute.xlu0 %1101 }
 0x235   :  { %1272 = vst.msk [vmem:[#allocation2 + $0x6] sm:$0xff] %vm1271_vm12, %v1104_v32 }
 0x236   :  { %1270 = vst.msk [vmem:[#allocation2 - $0x2] sm:$0xfc] %vm1269_vm13, %v1102_v28  ;;  %1795 = vrot.lane.b32.xlu1 %v5638_v11, %s5532_s7  ;;  %1167 = vrot.lane.b32.xlu0 %v5807_v34, %s5529_s4  ;;  %v2126_v28 = vshrl.u32 %v2125_v7, 7 }
 0x238   :  { %v1108_v29 = vpop.permute.xlu1 %1107  ;;  %v1106_v60 = vpop.permute.xlu0 %1105 }
 0x239   :  { %1274 = vst.msk [vmem:[#allocation2 + $0x16] sm:$0xff] %vm1271_vm12, %v1108_v29 }
 0x23a   :  { %1273 = vst.msk [vmem:[#allocation2 + $0xe] sm:$0xfc] %vm1269_vm13, %v1106_v60  ;;  %1395 = vrot.lane.b32.xlu1 %v5832_v37, %s5530_s5  ;;  %1797 = vrot.lane.b32.xlu0 %v5625_v10, %s5532_s7 }
 0x23c   :  { %v1112_v35 = vpop.permute.xlu1 %1111  ;;  %v1110_v61 = vpop.permute.xlu0 %1109 }
 0x23d   :  { %1276 = vst.msk [vmem:[#allocation2 + $0x26] sm:$0xff] %vm1271_vm12, %v1112_v35 }
 0x23e   :  { %1275 = vst.msk [vmem:[#allocation2 + $0x1e] sm:$0xfc] %vm1269_vm13, %v1110_v61  ;;  %1621 = vrot.lane.b32.xlu1 %v5832_v37, %s5531_s6  ;;  %1397 = vrot.lane.b32.xlu0 %v5827_v36, %s5530_s5 }
 0x240   :  { %v1116_v11 = vpop.permute.xlu1 %1115  ;;  %v1114_v34 = vpop.permute.xlu0 %1113 }
 0x241   :  { %1278 = vst.msk [vmem:[#allocation2 + $0x36] sm:$0xff] %vm1271_vm12, %v1116_v11 }
 0x242   :  { %1277 = vst.msk [vmem:[#allocation2 + $0x2e] sm:$0xfc] %vm1269_vm13, %v1114_v34  ;;  %1847 = vrot.lane.b32.xlu1 %v5832_v37, %s5532_s7  ;;  %1623 = vrot.lane.b32.xlu0 %v5827_v36, %s5531_s6 }
 0x244   :  { %v1120_v10 = vpop.permute.xlu1 %1119  ;;  %v1118_v62 = vpop.permute.xlu0 %1117 }
 0x245   :  { %1280 = vst.msk [vmem:[#allocation2 + $0x46] sm:$0xff] %vm1271_vm12, %v1120_v10 }
 0x246   :  { %1279 = vst.msk [vmem:[#allocation2 + $0x3e] sm:$0xfc] %vm1269_vm13, %v1118_v62  ;;  %1169 = vrot.lane.b32.xlu1 %v5832_v37, %s5529_s4  ;;  %1849 = vrot.lane.b32.xlu0 %v5827_v36, %s5532_s7 }
 0x248   :  { %v1124_v5 = vpop.permute.xlu1 %1123  ;;  %v1122_v63 = vpop.permute.xlu0 %1121 }
 0x249   :  { %1282 = vst.msk [vmem:[#allocation2 + $0x56] sm:$0xff] %vm1271_vm12, %v1124_v5 }
 0x24a   :  { %1281 = vst.msk [vmem:[#allocation2 + $0x4e] sm:$0xfc] %vm1269_vm13, %v1122_v63  ;;  %1347 = vrot.lane.b32.xlu1 %v5648_v13, %s5530_s5  ;;  %1171 = vrot.lane.b32.xlu0 %v5827_v36, %s5529_s4 }
 0x24c   :  { %v1128_v8 = vpop.permute.xlu1 %1127  ;;  %v1126_v9 = vpop.permute.xlu0 %1125 }
 0x24d   :  { %1284 = vst.msk [vmem:[#allocation2 + $0x66] sm:$0xff] %vm1271_vm12, %v1128_v8 }
 0x24e   :  { %1283 = vst.msk [vmem:[#allocation2 + $0x5e] sm:$0xfc] %vm1269_vm13, %v1126_v9  ;;  %1399 = vrot.lane.b32.xlu1 %v5846_v39, %s5530_s5  ;;  %1349 = vrot.lane.b32.xlu0 %v5643_v12, %s5530_s5 }
 0x250   :  { %v1132_v37 = vpop.permute.xlu1 %1131  ;;  %v1130_v1 = vpop.permute.xlu0 %1129 }
 0x251   :  { %1286 = vst.msk [vmem:[#allocation2 + $0x76] sm:$0xff] %vm1271_vm12, %v1132_v37 }
 0x252   :  { %1285 = vst.msk [vmem:[#allocation2 + $0x6e] sm:$0xfc] %vm1269_vm13, %v1130_v1  ;;  %1573 = vrot.lane.b32.xlu1 %v5648_v13, %s5531_s6  ;;  %1401 = vrot.lane.b32.xlu0 %v5841_v38, %s5530_s5 }
 0x254   :  { %v1136_v36 = vpop.permute.xlu1 %1135  ;;  %v1134_v56 = vpop.permute.xlu0 %1133 }
 0x255   :  { %1288 = vst.msk [vmem:[#allocation2 + $0x86] sm:$0xff] %vm1271_vm12, %v1136_v36 }
 0x256   :  { %1287 = vst.msk [vmem:[#allocation2 + $0x7e] sm:$0xfc] %vm1269_vm13, %v1134_v56  ;;  %1625 = vrot.lane.b32.xlu1 %v5846_v39, %s5531_s6  ;;  %1575 = vrot.lane.b32.xlu0 %v5643_v12, %s5531_s6 }
 0x258   :  { %v1140_v30 = vpop.permute.xlu1 %1139  ;;  %v1138_v31 = vpop.permute.xlu0 %1137 }
 0x259   :  { %1290 = vst.msk [vmem:[#allocation2 + $0x96] sm:$0xff] %vm1271_vm12, %v1140_v30 }
 0x25a   :  { %1289 = vst.msk [vmem:[#allocation2 + $0x8e] sm:$0xfc] %vm1269_vm13, %v1138_v31  ;;  %1799 = vrot.lane.b32.xlu1 %v5648_v13, %s5532_s7  ;;  %1627 = vrot.lane.b32.xlu0 %v5841_v38, %s5531_s6 }
 0x25c   :  { %v1334_v57 = vpop.permute.xlu1 %1333  ;;  %v1332_v3 = vpop.permute.xlu0 %1331 }
 0x25d   :  { %1502 = vst.msk [vmem:[#allocation2 + $0x8] sm:$0x3f] %vm1501_vm14, %v1334_v57 }
 0x25e   :  { %1500 = vst.msk [vmem:[#allocation2] sm:$0xff] %vm1499_vm15, %v1332_v3  ;;  %1851 = vrot.lane.b32.xlu1 %v5846_v39, %s5532_s7  ;;  %1801 = vrot.lane.b32.xlu0 %v5643_v12, %s5532_s7  ;;  %v5535_v12 = vmov 1983009808  }
 0x25f   :  { %v2123_v6 = vunpack.c.l.s4 %v5535_v12 }
 0x260   :  { %v1560_v13 = vpop.permute.xlu1 %1559  ;;  %v1558_v0 = vpop.permute.xlu0 %1557 }
 0x261   :  { %1728 = vst.msk [vmem:[#allocation2 + $0x7] sm:$0x7f] %vm8722_vm0, %v1560_v13  ;;  %v2124_v32 = vunpack.c.0.s8 %v2123_v6 }
 0x262   :  { %1726 = vst.msk [vmem:[#allocation2 - $0x1] sm:$0xfe] %vm1725_vm1, %v1558_v0  ;;  %1173 = vrot.lane.b32.xlu1 %v5846_v39, %s5529_s4  ;;  %1853 = vrot.lane.b32.xlu0 %v5841_v38, %s5532_s7 }
 0x263   :  { %v6861_v61 = vsub.s32 %v2124_v32, %v2126_v28 }
 0x264   :  { %v1786_v2 = vpop.permute.xlu1 %1785  ;;  %v1784_v58 = vpop.permute.xlu0 %1783 }
 0x265   :  { %1954 = vst.msk [vmem:[#allocation2 + $0x6] sm:$0xff] %vm8717_vm2, %v1786_v2 }
 0x266   :  { %1952 = vst.msk [vmem:[#allocation2 - $0x2] sm:$0xfc] %vm1951_vm3, %v1784_v58  ;;  %1403 = vrot.lane.b32.xlu1 %v5862_v41, %s5530_s5  ;;  %1175 = vrot.lane.b32.xlu0 %v5841_v38, %s5529_s4 }
 0x268   :  { %v1338_v39 = vpop.permute.xlu1 %1337  ;;  %v1336_v59 = vpop.permute.xlu0 %1335 }
 0x269   :  { %1504 = vst.msk [vmem:[#allocation2 + $0x18] sm:$0x3f] %vm1501_vm14, %v1338_v39 }
 0x26a   :  { %1503 = vst.msk [vmem:[#allocation2 + $0x10] sm:$0xff] %vm1499_vm15, %v1336_v59  ;;  %1351 = vrot.lane.b32.xlu1 %v5666_v15, %s5530_s5  ;;  %1405 = vrot.lane.b32.xlu0 %v5851_v40, %s5530_s5 }
 0x26c   :  { %v1564_v29 = vpop.permute.xlu1 %1563  ;;  %v1562_v60 = vpop.permute.xlu0 %1561  ;;  %v2010_v11 = vld [vmem:[#allocation2 + $0x8] sm:$0x3f] }
 0x26d   :  { %v2009_v35 = vld [vmem:[#allocation2] sm:$0xff]  ;;  %1730 = vst.msk [vmem:[#allocation2 + $0x17] sm:$0x7f] %vm8722_vm0, %v1564_v29  ;;  %v2145_v63 = vrot.slane %v2010_v11, %v6861_v61  ;;  %v2138_v36 = vcombine.high %v2010_v11, %v2010_v11 }
 0x26e   :  { %1729 = vst.msk [vmem:[#allocation2 + $0xf] sm:$0xfe] %vm1725_vm1, %v1562_v60  ;;  %v2121_v38 = vcombine.high %v2009_v35, %v2009_v35  ;;  %1629 = vrot.lane.b32.xlu1 %v5862_v41, %s5531_s6  ;;  %1353 = vrot.lane.b32.xlu0 %v5661_v14, %s5530_s5  ;;  %v2128_v5 = vrot.slane %v2009_v35, %v6861_v61 }
 0x26f   :  { %v2153_v56 = vcombine.high %v2145_v63, %v2145_v63  ;;  %v2152_v13 = vrot.slane %v2138_v36, %v6861_v61 }
 0x270   :  { %v2135_v34 = vrot.slane %v2121_v38, %v6861_v61  ;;  %v1790_v10 = vpop.permute.xlu1 %1789  ;;  %v1788_v62 = vpop.permute.xlu0 %1787  ;;  %v2136_v1 = vcombine.high %v2128_v5, %v2128_v5 }
 0x271   :  { %1956 = vst.msk [vmem:[#allocation2 + $0x16] sm:$0xff] %vm8717_vm2, %v1790_v10  ;;  %v3062_v58 = vcombine.low %v2145_v63, %v2153_v56 }
 0x272   :  { %1955 = vst.msk [vmem:[#allocation2 + $0xe] sm:$0xfc] %vm1951_vm3, %v1788_v62  ;;  %1577 = vrot.lane.b32.xlu1 %v5666_v15, %s5531_s6  ;;  %1631 = vrot.lane.b32.xlu0 %v5851_v40, %s5531_s6  ;;  %v2137_v8 = vcombine.high %v2135_v34, %v2135_v34  ;;  %v3045_v2 = vcombine.low %v2128_v5, %v2136_v1 }
 0x273   :  { %v3070_v32 = vrot.slane %v3062_v58, %v6861_v61 }
 0x274   :  { %v1342_v9 = vpop.permute.xlu1 %1341  ;;  %v1340_v37 = vpop.permute.xlu0 %1339  ;;  %v3046_v30 = vcombine.low %v2135_v34, %v2137_v8  ;;  %v3053_v59 = vrot.slane %v3045_v2, %v6861_v61 }
 0x275   :  { %1506 = vst.msk [vmem:[#allocation2 + $0x28] sm:$0x3f] %vm1501_vm14, %v1342_v9 }
 0x276   :  { %1505 = vst.msk [vmem:[#allocation2 + $0x20] sm:$0xff] %vm1499_vm15, %v1340_v37  ;;  %1855 = vrot.lane.b32.xlu1 %v5862_v41, %s5532_s7  ;;  %1579 = vrot.lane.b32.xlu0 %v5661_v14, %s5531_s6  ;;  %v3060_v12 = vrot.slane %v3046_v30, %v6861_v61 }
 0x278   :  { %v1568_v31 = vpop.permute.xlu1 %1567  ;;  %v1566_v57 = vpop.permute.xlu0 %1565  ;;  %v2012_v11 = vld [vmem:[#allocation2 + $0x18] sm:$0x3f] }
 0x279   :  { %v2011_v3 = vld [vmem:[#allocation2 + $0x10] sm:$0xff]  ;;  %1732 = vst.msk [vmem:[#allocation2 + $0x27] sm:$0x7f] %vm8722_vm0, %v1568_v31 }
 0x27a   :  { %1731 = vst.msk [vmem:[#allocation2 + $0x1f] sm:$0xfe] %vm1725_vm1, %v1566_v57  ;;  %v2161_v0 = vrot.slane %v2011_v3, %v6861_v61  ;;  %1803 = vrot.lane.b32.xlu1 %v5666_v15, %s5532_s7  ;;  %1857 = vrot.lane.b32.xlu0 %v5851_v40, %s5532_s7  ;;  %v2154_v29 = vcombine.high %v2011_v3, %v2011_v3 }
 0x27b   :  { %v3061_v15 = vcombine.low %v3053_v59, %v3060_v12 }
 0x27c   :  { %v3063_v6 = vcombine.low %v2152_v13, %v2161_v0  ;;  %v1164_v7 = vpop.permute.xlu1 %1163  ;;  %v1162_v39 = vpop.permute.xlu0 %1161  ;;  %v2168_v10 = vrot.slane %v2154_v29, %v6861_v61 }
 0x27d   :  { %1302 = vst.msk [vmem:[#allocation2 + $0xf6] sm:$0xff] %vm1271_vm12, %v1164_v7 }
 0x27e   :  { %1301 = vst.msk [vmem:[#allocation2 + $0xee] sm:$0xfc] %vm1269_vm13, %v1162_v39  ;;  %v3077_v28 = vrot.slane %v3063_v6, %v6861_v61  ;;  %1177 = vrot.lane.b32.xlu1 %v5862_v41, %s5529_s4  ;;  %1805 = vrot.lane.b32.xlu0 %v5661_v14, %s5532_s7  ;;  %v2171_v14 = vcombine.high %v2012_v11, %v2012_v11 }
 0x27f   :  { %v2178_v41 = vrot.slane %v2012_v11, %v6861_v61  ;;  %v2170_v63 = vcombine.high %v2168_v10, %v2168_v10 }
 0x280   :  { %v3078_v60 = vcombine.low %v3070_v32, %v3077_v28  ;;  %v1794_v35 = vpop.permute.xlu1 %1793  ;;  %v1792_v38 = vpop.permute.xlu0 %1791  ;;  %v2185_v8 = vrot.slane %v2171_v14, %v6861_v61 }
 0x281   :  { %1958 = vst.msk [vmem:[#allocation2 + $0x26] sm:$0xff] %vm8717_vm2, %v1794_v35  ;;  %v2186_v9 = vcombine.high %v2178_v41, %v2178_v41  ;;  %v3080_v30 = vcombine.low %v2170_v63, %v2178_v41 }
 0x282   :  { %1957 = vst.msk [vmem:[#allocation2 + $0x1e] sm:$0xfc] %vm1951_vm3, %v1792_v38  ;;  %v3927_v34 = vpack.c.bf16 %v3078_v60, %v3061_v15  ;;  %1407 = vrot.lane.b32.xlu1 %v5872_v43, %s5530_s5  ;;  %1179 = vrot.lane.b32.xlu0 %v5851_v40, %s5529_s4  ;;  %v2169_v40 = vcombine.high %v2161_v0, %v2161_v0 }
 0x283   :  { %v3096_v3 = vcombine.low %v2186_v9, %v2185_v8  ;;  %v3094_v2 = vrot.slane %v3080_v30, %v6861_v61 }
 0x284   :  { %5255 = vmatmul.mubr.msk.bf16.vlgmr.msra.gmra.mxu0 %vm3979_vm4, %v3927_v34  ;;  %v1394_v62 = vpop.permute.xlu1 %1393  ;;  %v1392_v5 = vpop.permute.xlu0 %1391  ;;  %v3079_v57 = vcombine.low %v2169_v40, %v2168_v10 }
 0x285   :  { %5258 = vmatprep.mubr.msk.bf16.mxu0 %vm8720_vm11, %v5533_v4  ;;  %1532 = vst.msk [vmem:[#allocation2 + $0xf8] sm:$0x3f] %vm1501_vm14, %v1394_v62  ;;  %v3104_v6 = vrot.slane %v3096_v3, %v6861_v61 }
 0x286   :  { %1531 = vst.msk [vmem:[#allocation2 + $0xf0] sm:$0xff] %vm1499_vm15, %v1392_v5  ;;  %1355 = vrot.lane.b32.xlu1 %v5682_v17, %s5530_s5  ;;  %1409 = vrot.lane.b32.xlu0 %v5867_v42, %s5530_s5  ;;  %v3087_v12 = vrot.slane %v3079_v57, %v6861_v61 }
 0x288   :  { %v1160_v37 = vpop.permute.xlu1 %1159  ;;  %v1158_v1 = vpop.permute.xlu0 %1157  ;;  %v3095_v32 = vcombine.low %v3087_v12, %v3094_v2 }
 0x289   :  { %v6918_v36 = vld [vmem:[#allocation2 + $0x20] sm:$0xff]  ;;  %1300 = vst.msk [vmem:[#allocation2 + $0xe6] sm:$0xff] %vm1271_vm12, %v1160_v37 }
 0x28a   :  { %1299 = vst.msk [vmem:[#allocation2 + $0xde] sm:$0xfc] %vm1269_vm13, %v1158_v1  ;;  %v2194_v56 = vrot.slane %v6918_v36, %v6861_v61  ;;  %1633 = vrot.lane.b32.xlu1 %v5872_v43, %s5531_s6  ;;  %1357 = vrot.lane.b32.xlu0 %v5677_v16, %s5530_s5 }
 0x28c   :  { %v2202_v31 = vcombine.high %v2194_v56, %v2194_v56  ;;  %v1620_v13 = vpop.permute.xlu1 %1619  ;;  %v1618_v0 = vpop.permute.xlu0 %1617 }
 0x28d   :  { %1758 = vst.msk [vmem:[#allocation2 + $0xf7] sm:$0x7f] %vm8722_vm0, %v1620_v13 }
 0x28e   :  { %1757 = vst.msk [vmem:[#allocation2 + $0xef] sm:$0xfe] %vm1725_vm1, %v1618_v0  ;;  %v3097_v58 = vcombine.low %v2194_v56, %v2202_v31  ;;  %1581 = vrot.lane.b32.xlu1 %v5682_v17, %s5531_s6  ;;  %1635 = vrot.lane.b32.xlu0 %v5867_v42, %s5531_s6 }
 0x290   :  { %v3111_v7 = vrot.slane %v3097_v58, %v6861_v61  ;;  %v1390_v39 = vpop.permute.xlu1 %1389  ;;  %v1388_v59 = vpop.permute.xlu0 %1387 }
 0x291   :  { %1530 = vst.msk [vmem:[#allocation2 + $0xe8] sm:$0x3f] %vm1501_vm14, %v1390_v39 }
 0x292   :  { %1529 = vst.msk [vmem:[#allocation2 + $0xe0] sm:$0xff] %vm1499_vm15, %v1388_v59  ;;  %v3112_v28 = vcombine.low %v3104_v6, %v3111_v7  ;;  %1859 = vrot.lane.b32.xlu1 %v5872_v43, %s5532_s7  ;;  %1583 = vrot.lane.b32.xlu0 %v5677_v16, %s5531_s6  ;;  %v2187_v7 = vcombine.high %v6918_v36, %v6918_v36 }
 0x294   :  { %v3928_v29 = vpack.c.bf16 %v3112_v28, %v3095_v32  ;;  %v1846_v15 = vpop.permute.xlu1 %1845  ;;  %v1844_v60 = vpop.permute.xlu0 %1843  ;;  %v2201_v36 = vrot.slane %v2187_v7, %v6861_v61 }
 0x295   :  { %1984 = vst.msk [vmem:[#allocation2 + $0xf6] sm:$0xff] %vm8717_vm2, %v1846_v15 }
 0x296   :  { %1983 = vst.msk [vmem:[#allocation2 + $0xee] sm:$0xfc] %vm1951_vm3, %v1844_v60  ;;  %5259 = vmatmul.mubr.msk.bf16.gmra.mxu0 %vm3979_vm4, %v3928_v29  ;;  %1807 = vrot.lane.b32.xlu1 %v5682_v17, %s5532_s7  ;;  %v2014_v29 = vld [vmem:[#allocation2 + $0x28] sm:$0x3f] }
 0x297   :  { %1861 = vrot.lane.b32.xlu0 %v5867_v42, %s5532_s7  ;;  %5262 = vmatprep.mubr.msk.bf16.mxu0 %vm8720_vm11, %v5533_v4 }
 0x298   :  { %v1616_v35 = vpop.permute.xlu1 %1615  ;;  %v1614_v38 = vpop.permute.xlu0 %1613 }
 0x299   :  { %1756 = vst.msk [vmem:[#allocation2 + $0xe7] sm:$0x7f] %vm8722_vm0, %v1616_v35 }
 0x29a   :  { %1755 = vst.msk [vmem:[#allocation2 + $0xdf] sm:$0xfe] %vm1725_vm1, %v1614_v38  ;;  %1181 = vrot.lane.b32.xlu1 %v5872_v43, %s5529_s4  ;;  %v2211_v38 = vrot.slane %v2014_v29, %v6861_v61 }
 0x29b   :  { %1809 = vrot.lane.b32.xlu0 %v5677_v16, %s5532_s7 }
 0x29c   :  { %v1344_v11 = vpop.permute.xlu1 %1343  ;;  %v1842_v17 = vpop.permute.xlu0 %1841  ;;  %v2040_v10 = vld [vmem:[#allocation2 + $0xf8] sm:$0x3f] }
 0x29d   :  { %v2039_v34 = vld [vmem:[#allocation2 + $0xf0] sm:$0xff]  ;;  %1507 = vst.msk [vmem:[#allocation2 + $0x30] sm:$0xff] %vm1499_vm15, %v1344_v11  ;;  %v2633_v41 = vcombine.high %v2040_v10, %v2040_v10  ;;  %v2640_v62 = vrot.slane %v2040_v10, %v6861_v61  ;;  %v2204_v10 = vcombine.high %v2014_v29, %v2014_v29 }
 0x29e   :  { %1982 = vst.msk [vmem:[#allocation2 + $0xe6] sm:$0xff] %vm8717_vm2, %v1842_v17  ;;  %v2616_v14 = vcombine.high %v2039_v34, %v2039_v34  ;;  %1411 = vrot.lane.b32.xlu1 %v5888_v45, %s5530_s5  ;;  %v2623_v16 = vrot.slane %v2039_v34, %v6861_v61  ;;  %v2203_v34 = vcombine.high %v2201_v36, %v2201_v36 }
 0x29f   :  { %1183 = vrot.lane.b32.xlu0 %v5867_v42, %s5529_s4  ;;  %v2647_v8 = vrot.slane %v2633_v41, %v6861_v61  ;;  %v2648_v9 = vcombine.high %v2640_v62, %v2640_v62 }
 0x2a0   :  { %v2630_v43 = vrot.slane %v2616_v14, %v6861_v61  ;;  %v1570_v5 = vpop.permute.xlu1 %1569  ;;  %v1346_v63 = vpop.permute.xlu0 %1345  ;;  %v2631_v42 = vcombine.high %v2623_v16, %v2623_v16  ;;  %v2219_v14 = vcombine.high %v2211_v38, %v2211_v38 }
 0x2a1   :  { %1733 = vst.msk [vmem:[#allocation2 + $0x2f] sm:$0xfe] %vm1725_vm1, %v1570_v5  ;;  %v3505_v57 = vcombine.low %v2648_v9, %v2647_v8 }
 0x2a2   :  { %1508 = vst.msk [vmem:[#allocation2 + $0x38] sm:$0x3f] %vm1501_vm14, %v1346_v63  ;;  %v2632_v40 = vcombine.high %v2630_v43, %v2630_v43  ;;  %1637 = vrot.lane.b32.xlu1 %v5888_v45, %s5531_s6  ;;  %v3488_v13 = vcombine.low %v2631_v42, %v2630_v43  ;;  %v2218_v43 = vrot.slane %v2204_v10, %v6861_v61 }
 0x2a3   :  { %1413 = vrot.lane.b32.xlu0 %v5883_v44, %s5530_s5  ;;  %v3519_v6 = vrot.slane %v3505_v57, %v6861_v61  ;;  %v3114_v9 = vcombine.low %v2211_v38, %v2219_v14 }
 0x2a4   :  { %v1166_v37 = vpop.permute.xlu1 %1165  ;;  %v1572_v1 = vpop.permute.xlu0 %1571  ;;  %v3504_v31 = vcombine.low %v2632_v40, %v2640_v62  ;;  %v3502_v59 = vrot.slane %v3488_v13, %v6861_v61 }
 0x2a5   :  { %v2038_v56 = vld [vmem:[#allocation2 + $0xe8] sm:$0x3f]  ;;  %1303 = vst.msk [vmem:[#allocation2 + $0xfe] sm:$0xfc] %vm1269_vm13, %v1166_v37 }
 0x2a6   :  { %1734 = vst.msk [vmem:[#allocation2 + $0x37] sm:$0x7f] %vm8722_vm0, %v1572_v1  ;;  %v2600_v30 = vcombine.high %v2038_v56, %v2038_v56  ;;  %1863 = vrot.lane.b32.xlu1 %v5888_v45, %s5532_s7  ;;  %v3512_v12 = vrot.slane %v3504_v31, %v6861_v61 }
 0x2a7   :  { %1639 = vrot.lane.b32.xlu0 %v5883_v44, %s5531_s6 }
 0x2a8   :  { %v2614_v3 = vrot.slane %v2600_v30, %v6861_v61  ;;  %v1796_v0 = vpop.permute.xlu1 %1795  ;;  %v1168_v2 = vpop.permute.xlu0 %1167  ;;  %v3520_v60 = vcombine.low %v3512_v12, %v3519_v6 }
 0x2a9   :  { %1959 = vst.msk [vmem:[#allocation2 + $0x2e] sm:$0xfc] %vm1951_vm3, %v1796_v0 }
 0x2aa   :  { %1304 = vst.msk [vmem:[#allocation2 + $0x106] sm:$0xff] %vm1271_vm12, %v1168_v2  ;;  %v3487_v58 = vcombine.low %v2614_v3, %v2623_v16  ;;  %1359 = vrot.lane.b32.xlu1 %v5698_v19, %s5530_s5 }
 0x2ab   :  { %1865 = vrot.lane.b32.xlu0 %v5883_v44, %s5532_s7 }
 0x2ac   :  { %v3495_v39 = vrot.slane %v3487_v58, %v6861_v61  ;;  %v1396_v32 = vpop.permute.xlu1 %1395  ;;  %v1798_v28 = vpop.permute.xlu0 %1797 }
 0x2ad   :  { %1533 = vst.msk [vmem:[#allocation2 + $0x100] sm:$0xff] %vm1499_vm15, %v1396_v32 }
 0x2ae   :  { %1960 = vst.msk [vmem:[#allocation2 + $0x36] sm:$0xff] %vm8717_vm2, %v1798_v28  ;;  %v3503_v15 = vcombine.low %v3495_v39, %v3502_v59  ;;  %1585 = vrot.lane.b32.xlu1 %v5698_v19, %s5531_s6 }
 0x2af   :  { %1361 = vrot.lane.b32.xlu0 %v5687_v18, %s5530_s5 }
 0x2b0   :  { %v3940_v35 = vpack.c.bf16 %v3520_v60, %v3503_v15  ;;  %v1622_v11 = vpop.permute.xlu1 %1621  ;;  %v1398_v17 = vpop.permute.xlu0 %1397 }
 0x2b1   :  { %1759 = vst.msk [vmem:[#allocation2 + $0xff] sm:$0xfe] %vm1725_vm1, %v1622_v11 }
 0x2b2   :  { %1534 = vst.msk [vmem:[#allocation2 + $0x108] sm:$0x3f] %vm1501_vm14, %v1398_v17  ;;  %5307 = vmatmul.mubr.msk.bf16.vlgmr.msra.gmra.mxu1 %vm3979_vm4, %v3940_v35  ;;  %1811 = vrot.lane.b32.xlu1 %v5698_v19, %s5532_s7  ;;  %v3113_v19 = vcombine.low %v2201_v36, %v2203_v34 }
 0x2b3   :  { %1587 = vrot.lane.b32.xlu0 %v5687_v18, %s5531_s6  ;;  %5310 = vmatprep.mubr.msk.bf16.mxu1 %vm8720_vm11, %v5533_v4 }
 0x2b4   :  { %v1848_v41 = vpop.permute.xlu1 %1847  ;;  %v1624_v62 = vpop.permute.xlu0 %1623  ;;  %v3121_v56 = vrot.slane %v3113_v19, %v6861_v61 }
 0x2b5   :  { %v2015_v16 = vld [vmem:[#allocation2 + $0x30] sm:$0xff]  ;;  %1985 = vst.msk [vmem:[#allocation2 + $0xfe] sm:$0xfc] %vm1951_vm3, %v1848_v41  ;;  %v2016_v36 = vld [vmem:[#allocation2 + $0x38] sm:$0x3f] }
 0x2b6   :  { %1760 = vst.msk [vmem:[#allocation2 + $0x107] sm:$0x7f] %vm8722_vm0, %v1624_v62  ;;  %v2220_v5 = vcombine.high %v2015_v16, %v2015_v16  ;;  %v2227_v63 = vrot.slane %v2015_v16, %v6861_v61  ;;  %1185 = vrot.lane.b32.xlu1 %v5888_v45, %s5529_s4  ;;  %v2237_v17 = vcombine.high %v2016_v36, %v2016_v36 }
 0x2b7   :  { %1813 = vrot.lane.b32.xlu0 %v5687_v18, %s5532_s7  ;;  %v3128_v18 = vrot.slane %v3114_v9, %v6861_v61  ;;  %v2244_v34 = vrot.slane %v2016_v36, %v6861_v61 }
 0x2b8   :  { %v7020_v40 = vrot.slane %v2220_v5, %v6861_v61  ;;  %v2235_v8 = vcombine.high %v2227_v63, %v2227_v63  ;;  %v3130_v42 = vcombine.low %v2218_v43, %v2227_v63  ;;  %v1170_v37 = vpop.permute.xlu1 %1169  ;;  %v1850_v1 = vpop.permute.xlu0 %1849  ;;  %v2251_v43 = vrot.slane %v2237_v17, %v6861_v61 }
 0x2b9   :  { %1305 = vst.msk [vmem:[#allocation2 + $0x10e] sm:$0xfc] %vm1269_vm13, %v1170_v37  ;;  %v3129_v13 = vcombine.low %v3121_v56, %v3128_v18  ;;  %v2252_v5 = vcombine.high %v2244_v34, %v2244_v34 }
 0x2ba   :  { %1986 = vst.msk [vmem:[#allocation2 + $0x106] sm:$0xff] %vm8717_vm2, %v1850_v1  ;;  %v3131_v30 = vcombine.low %v2235_v8, %v7020_v40  ;;  %1415 = vrot.lane.b32.xlu1 %v5908_v47, %s5530_s5  ;;  %v3138_v45 = vrot.slane %v3130_v42, %v6861_v61 }
 0x2bb   :  { %1187 = vrot.lane.b32.xlu0 %v5883_v44, %s5529_s4  ;;  %v3148_v18 = vcombine.low %v2252_v5, %v2251_v43 }
 0x2bc   :  { %v3145_v31 = vrot.slane %v3131_v30, %v6861_v61  ;;  %v1348_v57 = vpop.permute.xlu1 %1347  ;;  %v1172_v3 = vpop.permute.xlu0 %1171 }
 0x2bd   :  { %1509 = vst.msk [vmem:[#allocation2 + $0x40] sm:$0xff] %vm1499_vm15, %v1348_v57 }
 0x2be   :  { %1306 = vst.msk [vmem:[#allocation2 + $0x116] sm:$0xff] %vm1271_vm12, %v1172_v3  ;;  %v3146_v0 = vcombine.low %v3138_v45, %v3145_v31  ;;  %1641 = vrot.lane.b32.xlu1 %v5908_v47, %s5531_s6 }
 0x2bf   :  { %1417 = vrot.lane.b32.xlu0 %v5893_v46, %s5530_s5 }
 0x2c0   :  { %v3929_v44 = vpack.c.bf16 %v3146_v0, %v3129_v13  ;;  %v1400_v2 = vpop.permute.xlu1 %1399  ;;  %v1350_v58 = vpop.permute.xlu0 %1349 }
 0x2c1   :  { %1535 = vst.msk [vmem:[#allocation2 + $0x110] sm:$0xff] %vm1499_vm15, %v1400_v2  ;;  %v2041_v28 = vld [vmem:[#allocation2 + $0x100] sm:$0xff]  ;;  %v2042_v35 = vld [vmem:[#allocation2 + $0x108] sm:$0x3f] }
 0x2c2   :  { %1510 = vst.msk [vmem:[#allocation2 + $0x48] sm:$0x3f] %vm1501_vm14, %v1350_v58  ;;  %5263 = vmatmul.mubr.msk.bf16.gmra.mxu0 %vm3979_vm4, %v3929_v44  ;;  %1867 = vrot.lane.b32.xlu1 %v5908_v47, %s5532_s7  ;;  %v2649_v29 = vcombine.high %v2041_v28, %v2041_v28  ;;  %v2656_v10 = vrot.slane %v2041_v28, %v6861_v61 }
 0x2c3   :  { %1643 = vrot.lane.b32.xlu0 %v5893_v46, %s5531_s6  ;;  %5266 = vmatprep.mubr.msk.bf16.mxu0 %vm8720_vm11, %v5533_v4  ;;  %v2673_v14 = vrot.slane %v2042_v35, %v6861_v61  ;;  %v2666_v19 = vcombine.high %v2042_v35, %v2042_v35 }
 0x2c4   :  { %v1574_v12 = vpop.permute.xlu1 %1573  ;;  %v1402_v6 = vpop.permute.xlu0 %1401  ;;  %v2664_v63 = vcombine.high %v2656_v10, %v2656_v10 }
 0x2c5   :  { %1735 = vst.msk [vmem:[#allocation2 + $0x3f] sm:$0xfe] %vm1725_vm1, %v1574_v12  ;;  %v2681_v42 = vcombine.high %v2673_v14, %v2673_v14  ;;  %v2680_v31 = vrot.slane %v2666_v19, %v6861_v61 }
 0x2c6   :  { %1536 = vst.msk [vmem:[#allocation2 + $0x118] sm:$0x3f] %vm1501_vm14, %v1402_v6  ;;  %1363 = vrot.lane.b32.xlu1 %v5708_v21, %s5530_s5  ;;  %v3521_v57 = vcombine.low %v2656_v10, %v2664_v63 }
 0x2c7   :  { %1869 = vrot.lane.b32.xlu0 %v5893_v46, %s5532_s7  ;;  %v3538_v44 = vcombine.low %v2673_v14, %v2681_v42 }
 0x2c8   :  { %v1626_v7 = vpop.permute.xlu1 %1625  ;;  %v1576_v39 = vpop.permute.xlu0 %1575 }
 0x2c9   :  { %1761 = vst.msk [vmem:[#allocation2 + $0x10f] sm:$0xfe] %vm1725_vm1, %v1626_v7 }
 0x2ca   :  { %1736 = vst.msk [vmem:[#allocation2 + $0x47] sm:$0x7f] %vm8722_vm0, %v1576_v39  ;;  %1589 = vrot.lane.b32.xlu1 %v5708_v21, %s5531_s6 }
 0x2cb   :  { %1365 = vrot.lane.b32.xlu0 %v5703_v20, %s5530_s5 }
 0x2cc   :  { %v1800_v59 = vpop.permute.xlu1 %1799  ;;  %v1628_v32 = vpop.permute.xlu0 %1627 }
 0x2cd   :  { %1961 = vst.msk [vmem:[#allocation2 + $0x3e] sm:$0xfc] %vm1951_vm3, %v1800_v59  ;;  %v3162_v59 = vrot.slane %v3148_v18, %v6861_v61 }
 0x2ce   :  { %1762 = vst.msk [vmem:[#allocation2 + $0x117] sm:$0x7f] %vm8722_vm0, %v1628_v32  ;;  %1815 = vrot.lane.b32.xlu1 %v5708_v21, %s5532_s7  ;;  %v2663_v21 = vrot.slane %v2649_v29, %v6861_v61  ;;  %v3529_v32 = vrot.slane %v3521_v57, %v6861_v61 }
 0x2cf   :  { %1591 = vrot.lane.b32.xlu0 %v5703_v20, %s5531_s6 }
 0x2d0   :  { %v1852_v15 = vpop.permute.xlu1 %1851  ;;  %v1802_v60 = vpop.permute.xlu0 %1801 }
 0x2d1   :  { %1987 = vst.msk [vmem:[#allocation2 + $0x10e] sm:$0xfc] %vm1951_vm3, %v1852_v15  ;;  %v3546_v15 = vrot.slane %v3538_v44, %v6861_v61 }
 0x2d2   :  { %1962 = vst.msk [vmem:[#allocation2 + $0x46] sm:$0xff] %vm8717_vm2, %v1802_v60  ;;  %1189 = vrot.lane.b32.xlu1 %v5908_v47, %s5529_s4  ;;  %v2665_v47 = vcombine.high %v2663_v21, %v2663_v21 }
 0x2d3   :  { %1817 = vrot.lane.b32.xlu0 %v5703_v20, %s5532_s7  ;;  %v2236_v20 = vcombine.high %v7020_v40, %v7020_v40 }
 0x2d4   :  { %v1174_v38 = vpop.permute.xlu1 %1173  ;;  %v1854_v11 = vpop.permute.xlu0 %1853  ;;  %v3522_v1 = vcombine.low %v2663_v21, %v2665_v47 }
 0x2d5   :  { %1307 = vst.msk [vmem:[#allocation2 + $0x11e] sm:$0xfc] %vm1269_vm13, %v1174_v38  ;;  %v3147_v37 = vcombine.low %v2236_v20, %v2244_v34 }
 0x2d6   :  { %1988 = vst.msk [vmem:[#allocation2 + $0x116] sm:$0xff] %vm8717_vm2, %v1854_v11  ;;  %1367 = vrot.lane.b32.xlu1 %v5722_v23, %s5530_s5  ;;  %v3536_v12 = vrot.slane %v3522_v1, %v6861_v61 }
 0x2d7   :  { %1191 = vrot.lane.b32.xlu0 %v5893_v46, %s5529_s4  ;;  %v3155_v2 = vrot.slane %v3147_v37, %v6861_v61 }
 0x2d8   :  { %v1404_v41 = vpop.permute.xlu1 %1403  ;;  %v1176_v62 = vpop.permute.xlu0 %1175  ;;  %v3537_v21 = vcombine.low %v3529_v32, %v3536_v12 }
 0x2d9   :  { %v2017_v16 = vld [vmem:[#allocation2 + $0x40] sm:$0xff]  ;;  %1308 = vst.msk [vmem:[#allocation2 + $0x126] sm:$0xff] %vm1271_vm12, %v1176_v62  ;;  %v3163_v36 = vcombine.low %v3155_v2, %v3162_v59  ;;  %v2018_v42 = vld [vmem:[#allocation2 + $0x48] sm:$0x3f] }
 0x2da   :  { %v2253_v8 = vcombine.high %v2017_v16, %v2017_v16  ;;  %v2260_v9 = vrot.slane %v2017_v16, %v6861_v61  ;;  %1537 = vst.msk [vmem:[#allocation2 + $0x120] sm:$0xff] %vm1499_vm15, %v1404_v41  ;;  %1419 = vrot.lane.b32.xlu1 %v5922_v49, %s5530_s5  ;;  %v2277_v18 = vrot.slane %v2018_v42, %v6861_v61 }
 0x2db   :  { %1369 = vrot.lane.b32.xlu0 %v5717_v22, %s5530_s5 }
 0x2dc   :  { %v2267_v46 = vrot.slane %v2253_v8, %v6861_v61  ;;  %v2268_v40 = vcombine.high %v2260_v9, %v2260_v9  ;;  %v1352_v56 = vpop.permute.xlu1 %1351  ;;  %v1406_v30 = vpop.permute.xlu0 %1405 }
 0x2dd   :  { %v2043_v45 = vld [vmem:[#allocation2 + $0x110] sm:$0xff]  ;;  %1511 = vst.msk [vmem:[#allocation2 + $0x50] sm:$0xff] %vm1499_vm15, %v1352_v56  ;;  %v2044_v41 = vld [vmem:[#allocation2 + $0x118] sm:$0x3f] }
 0x2de   :  { %1538 = vst.msk [vmem:[#allocation2 + $0x128] sm:$0x3f] %vm1501_vm14, %v1406_v30  ;;  %v2269_v3 = vcombine.high %v2267_v46, %v2267_v46  ;;  %v3164_v13 = vcombine.low %v2260_v9, %v2268_v40  ;;  %v7097_v0 = vrot.slane %v2043_v45, %v6861_v61  ;;  %1593 = vrot.lane.b32.xlu1 %v5722_v23, %s5531_s6 }
 0x2df   :  { %1421 = vrot.lane.b32.xlu0 %v5913_v48, %s5530_s5  ;;  %v2682_v47 = vcombine.high %v2043_v45, %v2043_v45  ;;  %v2699_v5 = vcombine.high %v2044_v41, %v2044_v41  ;;  %v2706_v63 = vrot.slane %v2044_v41, %v6861_v61 }
 0x2e0   :  { %v3165_v58 = vcombine.low %v2267_v46, %v2269_v3  ;;  %v3539_v6 = vcombine.low %v2680_v31, %v7097_v0  ;;  %v1630_v7 = vpop.permute.xlu1 %1629  ;;  %v1354_v39 = vpop.permute.xlu0 %1353  ;;  %v3172_v28 = vrot.slane %v3164_v13, %v6861_v61  ;;  %v2270_v31 = vcombine.high %v2018_v42, %v2018_v42 }
 0x2e1   :  { %1763 = vst.msk [vmem:[#allocation2 + $0x11f] sm:$0xfe] %vm1725_vm1, %v1630_v7  ;;  %v2696_v43 = vrot.slane %v2682_v47, %v6861_v61  ;;  %v2713_v46 = vrot.slane %v2699_v5, %v6861_v61  ;;  %v2714_v40 = vcombine.high %v2706_v63, %v2706_v63 }
 0x2e2   :  { %1512 = vst.msk [vmem:[#allocation2 + $0x58] sm:$0x3f] %vm1501_vm14, %v1354_v39  ;;  %v3179_v29 = vrot.slane %v3165_v58, %v6861_v61  ;;  %v3553_v60 = vrot.slane %v3539_v6, %v6861_v61  ;;  %1645 = vrot.lane.b32.xlu1 %v5922_v49, %s5531_s6  ;;  %v2285_v58 = vcombine.high %v2277_v18, %v2277_v18 }
 0x2e3   :  { %1595 = vrot.lane.b32.xlu0 %v5717_v22, %s5531_s6  ;;  %v2698_v9 = vcombine.high %v2696_v43, %v2696_v43  ;;  %v3572_v57 = vcombine.low %v2714_v40, %v2713_v46  ;;  %v2284_v6 = vrot.slane %v2270_v31, %v6861_v61 }
 0x2e4   :  { %v3180_v35 = vcombine.low %v3172_v28, %v3179_v29  ;;  %v3554_v38 = vcombine.low %v3546_v15, %v3553_v60  ;;  %v1578_v11 = vpop.permute.xlu1 %1577  ;;  %v1632_v17 = vpop.permute.xlu0 %1631 }
 0x2e5   :  { %1737 = vst.msk [vmem:[#allocation2 + $0x4f] sm:$0xfe] %vm1725_vm1, %v1578_v11  ;;  %v3556_v30 = vcombine.low %v2698_v9, %v2706_v63  ;;  %v3580_v32 = vrot.slane %v3572_v57, %v6861_v61  ;;  %v3181_v11 = vcombine.low %v2277_v18, %v2285_v58 }
 0x2e6   :  { %1764 = vst.msk [vmem:[#allocation2 + $0x127] sm:$0x7f] %vm8722_vm0, %v1632_v17  ;;  %v3930_v34 = vpack.c.bf16 %v3180_v35, %v3163_v36  ;;  %v3941_v10 = vpack.c.bf16 %v3554_v38, %v3537_v21  ;;  %1819 = vrot.lane.b32.xlu1 %v5722_v23, %s5532_s7 }
 0x2e7   :  { %1647 = vrot.lane.b32.xlu0 %v5913_v48, %s5531_s6  ;;  %v3570_v44 = vrot.slane %v3556_v30, %v6861_v61 }
 0x2e8   :  { %5267 = vmatmul.mubr.msk.bf16.gmra.mxu0 %vm3979_vm4, %v3930_v34  ;;  %5311 = vmatmul.mubr.msk.bf16.gmra.mxu1 %vm3979_vm4, %v3941_v10  ;;  %v1856_v14 = vpop.permute.xlu1 %1855  ;;  %v1580_v20 = vpop.permute.xlu0 %1579 }
 0x2e9   :  { %5314 = vmatprep.mubr.msk.bf16.mxu1 %vm8720_vm11, %v5533_v4  ;;  %5270 = vmatprep.mubr.msk.bf16.mxu0 %vm8720_vm11, %v5533_v4  ;;  %1989 = vst.msk [vmem:[#allocation2 + $0x11e] sm:$0xfc] %vm1951_vm3, %v1856_v14 }
 0x2ea   :  { %1738 = vst.msk [vmem:[#allocation2 + $0x57] sm:$0x7f] %vm8722_vm0, %v1580_v20  ;;  %1871 = vrot.lane.b32.xlu1 %v5922_v49, %s5532_s7 }
 0x2eb   :  { %1821 = vrot.lane.b32.xlu0 %v5717_v22, %s5532_s7 }
 0x2ec   :  { %v1804_v62 = vpop.permute.xlu1 %1803  ;;  %v1858_v16 = vpop.permute.xlu0 %1857 }
 0x2ed   :  { %1963 = vst.msk [vmem:[#allocation2 + $0x4e] sm:$0xfc] %vm1951_vm3, %v1804_v62 }
 0x2ee   :  { %1990 = vst.msk [vmem:[#allocation2 + $0x126] sm:$0xff] %vm8717_vm2, %v1858_v16  ;;  %1141 = vrot.lane.b32.xlu1 %v5722_v23, %s5529_s4  ;;  %v2697_v23 = vcombine.high %v7097_v0, %v7097_v0  ;;  %v3189_v16 = vrot.slane %v3181_v11, %v6861_v61 }
 0x2ef   :  { %1873 = vrot.lane.b32.xlu0 %v5913_v48, %s5532_s7 }
 0x2f0   :  { %v1178_v19 = vpop.permute.xlu1 %1177  ;;  %v1806_v8 = vpop.permute.xlu0 %1805 }
 0x2f1   :  { %1309 = vst.msk [vmem:[#allocation2 + $0x12e] sm:$0xfc] %vm1269_vm13, %v1178_v19 }
 0x2f2   :  { %1964 = vst.msk [vmem:[#allocation2 + $0x56] sm:$0xff] %vm8717_vm2, %v1806_v8  ;;  %1371 = vrot.lane.b32.xlu1 %v5744_v25, %s5530_s5 }
 0x2f3   :  { %1143 = vrot.lane.b32.xlu0 %v5717_v22, %s5529_s4  ;;  %v3555_v22 = vcombine.low %v2697_v23, %v2696_v43 }
 0x2f4   :  { %v1408_v37 = vpop.permute.xlu1 %1407  ;;  %v1180_v1 = vpop.permute.xlu0 %1179 }
 0x2f5   :  { %v7153_v56 = vld [vmem:[#allocation2 + $0x120] sm:$0xff]  ;;  %1310 = vst.msk [vmem:[#allocation2 + $0x136] sm:$0xff] %vm1271_vm12, %v1180_v1  ;;  %v3563_v59 = vrot.slane %v3555_v22, %v6861_v61  ;;  %v2046_v23 = vld [vmem:[#allocation2 + $0x128] sm:$0x3f] }
 0x2f6   :  { %v2722_v45 = vrot.slane %v7153_v56, %v6861_v61  ;;  %1539 = vst.msk [vmem:[#allocation2 + $0x130] sm:$0xff] %vm1499_vm15, %v1408_v37  ;;  %1597 = vrot.lane.b32.xlu1 %v5744_v25, %s5531_s6  ;;  %v2715_v42 = vcombine.high %v7153_v56, %v7153_v56  ;;  %v2739_v1 = vrot.slane %v2046_v23, %v6861_v61 }
 0x2f7   :  { %1373 = vrot.lane.b32.xlu0 %v5727_v24, %s5530_s5  ;;  %v3571_v38 = vcombine.low %v3563_v59, %v3570_v44 }
 0x2f8   :  { %v2730_v3 = vcombine.high %v2722_v45, %v2722_v45  ;;  %v1356_v13 = vpop.permute.xlu1 %1355  ;;  %v1410_v0 = vpop.permute.xlu0 %1409  ;;  %v2729_v37 = vrot.slane %v2715_v42, %v6861_v61  ;;  %v2747_v31 = vcombine.high %v2739_v1, %v2739_v1 }
 0x2f9   :  { %v2019_v2 = vld [vmem:[#allocation2 + $0x50] sm:$0xff]  ;;  %1513 = vst.msk [vmem:[#allocation2 + $0x60] sm:$0xff] %vm1499_vm15, %v1356_v13  ;;  %v7175_v28 = vld [vmem:[#allocation2 + $0x58] sm:$0x3f] }
 0x2fa   :  { %1540 = vst.msk [vmem:[#allocation2 + $0x138] sm:$0x3f] %vm1501_vm14, %v1410_v0  ;;  %v3573_v12 = vcombine.low %v2722_v45, %v2730_v3  ;;  %v2286_v7 = vcombine.high %v2019_v2, %v2019_v2  ;;  %v2293_v39 = vrot.slane %v2019_v2, %v6861_v61  ;;  %1193 = vrot.lane.b32.xlu1 %v5922_v49, %s5529_s4 }
 0x2fb   :  { %1599 = vrot.lane.b32.xlu0 %v5727_v24, %s5531_s6  ;;  %v7183_v34 = vrot.slane %v7175_v28, %v6861_v61  ;;  %v2731_v18 = vcombine.high %v2729_v37, %v2729_v37  ;;  %v2732_v45 = vcombine.high %v2046_v23, %v2046_v23  ;;  %v2303_v13 = vcombine.high %v7175_v28, %v7175_v28 }
 0x2fc   :  { %v3587_v29 = vrot.slane %v3573_v12, %v6861_v61  ;;  %v2300_v15 = vrot.slane %v2286_v7, %v6861_v61  ;;  %v2301_v60 = vcombine.high %v2293_v39, %v2293_v39  ;;  %v3182_v36 = vcombine.low %v2284_v6, %v2293_v39  ;;  %v1634_v35 = vpop.permute.xlu1 %1633  ;;  %v1358_v21 = vpop.permute.xlu0 %1357 }
 0x2fd   :  { %1765 = vst.msk [vmem:[#allocation2 + $0x12f] sm:$0xfe] %vm1725_vm1, %v1634_v35  ;;  %v2746_v0 = vrot.slane %v2732_v45, %v6861_v61  ;;  %v3589_v58 = vcombine.low %v2729_v37, %v2731_v18 }
 0x2fe   :  { %1514 = vst.msk [vmem:[#allocation2 + $0x68] sm:$0x3f] %vm1501_vm14, %v1358_v21  ;;  %v3588_v49 = vcombine.low %v3580_v32, %v3587_v29  ;;  %v2302_v17 = vcombine.high %v2300_v15, %v2300_v15  ;;  %v3198_v10 = vcombine.low %v2301_v60, %v2300_v15  ;;  %1823 = vrot.lane.b32.xlu1 %v5744_v25, %s5532_s7 }
 0x2ff   :  { %1195 = vrot.lane.b32.xlu0 %v5913_v48, %s5529_s4  ;;  %v3196_v20 = vrot.slane %v3182_v36, %v6861_v61  ;;  %v2317_v29 = vrot.slane %v2303_v13, %v6861_v61  ;;  %v2318_v15 = vcombine.high %v7183_v34, %v7183_v34 }
 0x300   :  { %v3942_v14 = vpack.c.bf16 %v3588_v49, %v3571_v38  ;;  %v3199_v47 = vcombine.low %v2302_v17, %v7183_v34  ;;  %v1582_v41 = vpop.permute.xlu1 %1581  ;;  %v1636_v62 = vpop.permute.xlu0 %1635  ;;  %v3206_v43 = vrot.slane %v3198_v10, %v6861_v61 }
 0x301   :  { %1739 = vst.msk [vmem:[#allocation2 + $0x5f] sm:$0xfe] %vm1725_vm1, %v1582_v41  ;;  %v3197_v48 = vcombine.low %v3189_v16, %v3196_v20 }
 0x302   :  { %1766 = vst.msk [vmem:[#allocation2 + $0x137] sm:$0x7f] %vm8722_vm0, %v1636_v62  ;;  %5315 = vmatmul.mubr.msk.bf16.gmra.mxu1 %vm3979_vm4, %v3942_v14  ;;  %v3213_v5 = vrot.slane %v3199_v47, %v6861_v61  ;;  %1423 = vrot.lane.b32.xlu1 %v5932_v51, %s5530_s5  ;;  %v3215_v47 = vcombine.low %v2318_v15, %v2317_v29 }
 0x303   :  { %1825 = vrot.lane.b32.xlu0 %v5727_v24, %s5532_s7  ;;  %5318 = vmatprep.mubr.msk.bf16.mxu1 %vm8720_vm11, %v5533_v4 }
 0x304   :  { %v3214_v63 = vcombine.low %v3206_v43, %v3213_v5  ;;  %v1860_v19 = vpop.permute.xlu1 %1859  ;;  %v1584_v8 = vpop.permute.xlu0 %1583  ;;  %v3223_v42 = vrot.slane %v3215_v47, %v6861_v61 }
 0x305   :  { %1991 = vst.msk [vmem:[#allocation2 + $0x12e] sm:$0xfc] %vm1951_vm3, %v1860_v19 }
 0x306   :  { %1740 = vst.msk [vmem:[#allocation2 + $0x67] sm:$0x7f] %vm8722_vm0, %v1584_v8  ;;  %v3931_v9 = vpack.c.bf16 %v3214_v63, %v3197_v48  ;;  %1649 = vrot.lane.b32.xlu1 %v5932_v51, %s5531_s6 }
 0x307   :  { %1425 = vrot.lane.b32.xlu0 %v5927_v50, %s5530_s5 }
 0x308   :  { %5271 = vmatmul.mubr.msk.bf16.gmra.mxu0 %vm3979_vm4, %v3931_v9  ;;  %v1808_v46 = vpop.permute.xlu1 %1807 }
 0x309   :  { %v1862_v40 = vpop.permute.xlu0 %1861  ;;  %5274 = vmatprep.mubr.msk.bf16.mxu0 %vm8720_vm11, %v5533_v4  ;;  %1965 = vst.msk [vmem:[#allocation2 + $0x5e] sm:$0xfc] %vm1951_vm3, %v1808_v46 }
 0x30a   :  { %1992 = vst.msk [vmem:[#allocation2 + $0x136] sm:$0xff] %vm8717_vm2, %v1862_v40  ;;  %1875 = vrot.lane.b32.xlu1 %v5932_v51, %s5532_s7 }
 0x30b   :  { %1651 = vrot.lane.b32.xlu0 %v5927_v50, %s5531_s6 }
 0x30c   :  { %v1182_v56 = vpop.permute.xlu1 %1181 }
 0x30d   :  { %v1810_v30 = vpop.permute.xlu0 %1809  ;;  %1311 = vst.msk [vmem:[#allocation2 + $0x13e] sm:$0xfc] %vm1269_vm13, %v1182_v56 }
 0x30e   :  { %1966 = vst.msk [vmem:[#allocation2 + $0x66] sm:$0xff] %vm8717_vm2, %v1810_v30  ;;  %1145 = vrot.lane.b32.xlu1 %v5744_v25, %s5529_s4  ;;  %v3590_v25 = vcombine.low %v2739_v1, %v2747_v31 }
 0x30f   :  { %1877 = vrot.lane.b32.xlu0 %v5927_v50, %s5532_s7 }
 0x310   :  { %v1412_v22 = vpop.permute.xlu1 %1411  ;;  %v3604_v21 = vrot.slane %v3590_v25, %v6861_v61 }
 0x311   :  { %v1184_v57 = vpop.permute.xlu0 %1183  ;;  %v2047_v3 = vld [vmem:[#allocation2 + $0x130] sm:$0xff]  ;;  %v2048_v46 = vld [vmem:[#allocation2 + $0x138] sm:$0x3f] }
 0x312   :  { %1312 = vst.msk [vmem:[#allocation2 + $0x146] sm:$0xff] %vm1271_vm12, %v1184_v57  ;;  %v2748_v44 = vcombine.high %v2047_v3, %v2047_v3  ;;  %v2755_v2 = vrot.slane %v2047_v3, %v6861_v61  ;;  %1375 = vrot.lane.b32.xlu1 %v5758_v27, %s5530_s5  ;;  %v2765_v18 = vcombine.high %v2048_v46, %v2048_v46 }
 0x313   :  { %1541 = vst.msk [vmem:[#allocation2 + $0x140] sm:$0xff] %vm1499_vm15, %v1412_v22  ;;  %1147 = vrot.lane.b32.xlu0 %v5727_v24, %s5529_s4  ;;  %v3597_v24 = vrot.slane %v3589_v58, %v6861_v61  ;;  %v2772_v45 = vrot.slane %v2048_v46, %v6861_v61 }
 0x314   :  { %v7239_v12 = vrot.slane %v2748_v44, %v6861_v61  ;;  %v2763_v6 = vcombine.high %v2755_v2, %v2755_v2  ;;  %v3606_v7 = vcombine.low %v2746_v0, %v2755_v2  ;;  %v1638_v39 = vpop.permute.xlu1 %1637  ;;  %v2779_v3 = vrot.slane %v2765_v18, %v6861_v61 }
 0x315   :  { %v1414_v59 = vpop.permute.xlu0 %1413  ;;  %v2021_v32 = vld [vmem:[#allocation2 + $0x60] sm:$0xff]  ;;  %v7241_v28 = vld [vmem:[#allocation2 + $0x68] sm:$0x3f]  ;;  %1767 = vst.msk [vmem:[#allocation2 + $0x13f] sm:$0xfe] %vm1725_vm1, %v1638_v39  ;;  %v3605_v41 = vcombine.low %v3597_v24, %v3604_v21  ;;  %v2780_v13 = vcombine.high %v2772_v45, %v2772_v45 }
 0x316   :  { %1542 = vst.msk [vmem:[#allocation2 + $0x148] sm:$0x3f] %vm1501_vm14, %v1414_v59  ;;  %v3607_v60 = vcombine.low %v2763_v6, %v7239_v12  ;;  %v2319_v36 = vcombine.high %v2021_v32, %v2021_v32  ;;  %v2326_v35 = vrot.slane %v2021_v32, %v6861_v61  ;;  %1601 = vrot.lane.b32.xlu1 %v5758_v27, %s5531_s6 }
 0x317   :  { %1377 = vrot.lane.b32.xlu0 %v5749_v26, %s5530_s5  ;;  %v2343_v38 = vrot.slane %v7241_v28, %v6861_v61  ;;  %v3614_v11 = vrot.slane %v3606_v7, %v6861_v61  ;;  %v3624_v39 = vcombine.low %v2780_v13, %v2779_v3 }
 0x318   :  { %v3621_v49 = vrot.slane %v3607_v60, %v6861_v61  ;;  %v2333_v17 = vrot.slane %v2319_v36, %v6861_v61  ;;  %v2334_v34 = vcombine.high %v2326_v35, %v2326_v35  ;;  %v1864_v10 = vpop.permute.xlu1 %1863 }
 0x319   :  { %v1640_v14 = vpop.permute.xlu0 %1639  ;;  %v2351_v20 = vcombine.high %v2343_v38, %v2343_v38  ;;  %1993 = vst.msk [vmem:[#allocation2 + $0x13e] sm:$0xfc] %vm1951_vm3, %v1864_v10  ;;  %v3638_v60 = vrot.slane %v3624_v39, %v6861_v61 }
 0x31a   :  { %1768 = vst.msk [vmem:[#allocation2 + $0x147] sm:$0x7f] %vm8722_vm0, %v1640_v14  ;;  %v3622_v62 = vcombine.low %v3614_v11, %v3621_v49  ;;  %v2335_v16 = vcombine.high %v2333_v17, %v2333_v17  ;;  %v3216_v43 = vcombine.low %v2326_v35, %v2334_v34  ;;  %1197 = vrot.lane.b32.xlu1 %v5932_v51, %s5529_s4 }
 0x31b   :  { %1603 = vrot.lane.b32.xlu0 %v5749_v26, %s5531_s6  ;;  %v3233_v5 = vcombine.low %v2343_v38, %v2351_v20  ;;  %v2336_v38 = vcombine.high %v7241_v28, %v7241_v28 }
 0x31c   :  { %v3943_v48 = vpack.c.bf16 %v3622_v62, %v3605_v41  ;;  %v3230_v63 = vrot.slane %v3216_v43, %v6861_v61  ;;  %v3232_v19 = vcombine.low %v2333_v17, %v2335_v16  ;;  %v1360_v8 = vpop.permute.xlu1 %1359 }
 0x31d   :  { %v1866_v9 = vpop.permute.xlu0 %1865  ;;  %1515 = vst.msk [vmem:[#allocation2 + $0x70] sm:$0xff] %vm1499_vm15, %v1360_v8  ;;  %v3247_v23 = vrot.slane %v3233_v5, %v6861_v61  ;;  %v2350_v28 = vrot.slane %v2336_v38, %v6861_v61  ;;  %v7338_v8 = vld [vmem:[%s8713_s0 + $0xe0] sm:$0xff] }
 0x31e   :  { %1994 = vst.msk [vmem:[#allocation2 + $0x146] sm:$0xff] %vm8717_vm2, %v1866_v9  ;;  %5319 = vmatmul.mubr.msk.bf16.gmra.mxu1 %vm3979_vm4, %v3943_v48  ;;  %v3240_v51 = vrot.slane %v3232_v19, %v6861_v61  ;;  %1827 = vrot.lane.b32.xlu1 %v5758_v27, %s5532_s7  ;;  %v3231_v40 = vcombine.low %v3223_v42, %v3230_v63 }
 0x31f   :  { %1199 = vrot.lane.b32.xlu0 %v5927_v50, %s5529_s4  ;;  %5322 = vmatprep.mubr.msk.bf16.mxu1 %vm8720_vm11, %v5533_v4  ;;  %v2764_v50 = vcombine.high %v7239_v12, %v7239_v12 }
 0x320   :  { %v3248_v37 = vcombine.low %v3240_v51, %v3247_v23  ;;  %v1586_v1 = vpop.permute.xlu1 %1585 }
 0x321   :  { %v1362_v56 = vpop.permute.xlu0 %1361  ;;  %1741 = vst.msk [vmem:[#allocation2 + $0x6f] sm:$0xfe] %vm1725_vm1, %v1586_v1  ;;  %v3623_v25 = vcombine.low %v2764_v50, %v2772_v45 }
 0x322   :  { %1516 = vst.msk [vmem:[#allocation2 + $0x78] sm:$0x3f] %vm1501_vm14, %v1362_v56  ;;  %v3932_v30 = vpack.c.bf16 %v3248_v37, %v3231_v40  ;;  %1427 = vrot.lane.b32.xlu1 %v5948_v53, %s5530_s5 }
 0x323   :  { %1829 = vrot.lane.b32.xlu0 %v5749_v26, %s5532_s7  ;;  %v3631_v32 = vrot.slane %v3623_v25, %v6861_v61 }
 0x324   :  { %5275 = vmatmul.mubr.msk.bf16.gmra.mxu0 %vm3979_vm4, %v3932_v30  ;;  %v1812_v31 = vpop.permute.xlu1 %1811 }
 0x325   :  { %v1588_v22 = vpop.permute.xlu0 %1587  ;;  %v2049_v57 = vld [vmem:[#allocation2 + $0x140] sm:$0xff]  ;;  %5278 = vmatprep.mubr.msk.bf16.mxu0 %vm8720_vm11, %v5533_v4  ;;  %1967 = vst.msk [vmem:[#allocation2 + $0x6e] sm:$0xfc] %vm1951_vm3, %v1812_v31  ;;  %v2050_v56 = vld [vmem:[#allocation2 + $0x148] sm:$0x3f] }
 0x326   :  { %1742 = vst.msk [vmem:[#allocation2 + $0x77] sm:$0x7f] %vm8722_vm0, %v1588_v22  ;;  %v2781_v0 = vcombine.high %v2049_v57, %v2049_v57  ;;  %v2788_v44 = vrot.slane %v2049_v57, %v6861_v61  ;;  %1653 = vrot.lane.b32.xlu1 %v5948_v53, %s5531_s6  ;;  %v2798_v22 = vcombine.high %v2050_v56, %v2050_v56 }
 0x327   :  { %1429 = vrot.lane.b32.xlu0 %v5943_v52, %s5530_s5  ;;  %v2805_v57 = vrot.slane %v2050_v56, %v6861_v61 }
 0x328   :  { %v2795_v2 = vrot.slane %v2781_v0, %v6861_v61  ;;  %v2796_v58 = vcombine.high %v2788_v44, %v2788_v44  ;;  %v1186_v12 = vpop.permute.xlu1 %1185 }
 0x329   :  { %v1814_v6 = vpop.permute.xlu0 %1813  ;;  %1313 = vst.msk [vmem:[#allocation2 + $0x14e] sm:$0xfc] %vm1269_vm13, %v1186_v12 }
 0x32a   :  { %1968 = vst.msk [vmem:[#allocation2 + $0x76] sm:$0xff] %vm8717_vm2, %v1814_v6  ;;  %v2797_v7 = vcombine.high %v2795_v2, %v2795_v2  ;;  %v3640_v59 = vcombine.low %v2788_v44, %v2796_v58  ;;  %1149 = vrot.lane.b32.xlu1 %v5758_v27, %s5529_s4  ;;  %v3639_v27 = vcombine.low %v3631_v32, %v3638_v60  ;;  %v7374_v44 = vld [vmem:[%s8715_s2] ss:$0 sm:$0xff] }
 0x32b   :  { %1655 = vrot.lane.b32.xlu0 %v5943_v52, %s5531_s6  ;;  %v2813_v58 = vcombine.high %v2805_v57, %v2805_v57 }
 0x32c   :  { %v3641_v29 = vcombine.low %v2795_v2, %v2797_v7  ;;  %v1416_v15 = vpop.permute.xlu1 %1415  ;;  %v3648_v36 = vrot.slane %v3640_v59, %v6861_v61  ;;  %v2812_v2 = vrot.slane %v2798_v22, %v6861_v61 }
 0x32d   :  { %v1188_v24 = vpop.permute.xlu0 %1187 }
 0x32e   :  { %1314 = vst.msk [vmem:[#allocation2 + $0x156] sm:$0xff] %vm1271_vm12, %v1188_v24  ;;  %v3655_v35 = vrot.slane %v3641_v29, %v6861_v61  ;;  %1879 = vrot.lane.b32.xlu1 %v5948_v53, %s5532_s7 }
 0x32f   :  { %1543 = vst.msk [vmem:[#allocation2 + $0x150] sm:$0xff] %vm1499_vm15, %v1416_v15  ;;  %1151 = vrot.lane.b32.xlu0 %v5749_v26, %s5529_s4 }
 0x330   :  { %v3656_v21 = vcombine.low %v3648_v36, %v3655_v35  ;;  %v1642_v11 = vpop.permute.xlu1 %1641 }
 0x331   :  { %v1418_v49 = vpop.permute.xlu0 %1417  ;;  %v2023_v17 = vld [vmem:[#allocation2 + $0x70] sm:$0xff]  ;;  %v2024_v34 = vld [vmem:[#allocation2 + $0x78] sm:$0x3f]  ;;  %1769 = vst.msk [vmem:[#allocation2 + $0x14f] sm:$0xfe] %vm1725_vm1, %v1642_v11 }
 0x332   :  { %1544 = vst.msk [vmem:[#allocation2 + $0x158] sm:$0x3f] %vm1501_vm14, %v1418_v49  ;;  %v3944_v10 = vpack.c.bf16 %v3656_v21, %v3639_v27  ;;  %v2352_v14 = vcombine.high %v2023_v17, %v2023_v17  ;;  %v2359_v20 = vrot.slane %v2023_v17, %v6861_v61  ;;  %v2369_v47 = vcombine.high %v2024_v34, %v2024_v34 }
 0x333   :  { %1201 = vrot.lane.b32.xlu1 %v5948_v53, %s5529_s4  ;;  %1881 = vrot.lane.b32.xlu0 %v5943_v52, %s5532_s7  ;;  %v2376_v26 = vrot.slane %v2024_v34, %v6861_v61  ;;  %v3657_v27 = vcombine.low %v2805_v57, %v2813_v58  ;;  %v7456_v58 = vld [vmem:[%s8713_s0 + $0x1e8] sm:$0xff] }
 0x334   :  { %5323 = vmatmul.mubr.msk.bf16.gmra.mxu1 %vm3979_vm4, %v3944_v10  ;;  %v2366_v41 = vrot.slane %v2352_v14, %v6861_v61  ;;  %v2367_v62 = vcombine.high %v2359_v20, %v2359_v20  ;;  %v2383_v16 = vrot.slane %v2369_v47, %v6861_v61  ;;  %v1868_v43 = vpop.permute.xlu1 %1867  ;;  %v3249_v63 = vcombine.low %v2350_v28, %v2359_v20 }
 0x335   :  { %v1644_v5 = vpop.permute.xlu0 %1643  ;;  %v2384_v48 = vcombine.high %v2376_v26, %v2376_v26  ;;  %5326 = vmatprep.mubr.msk.bf16.mxu1 %vm8720_vm11, %v5533_v4  ;;  %1995 = vst.msk [vmem:[#allocation2 + $0x14e] sm:$0xfc] %vm1951_vm3, %v1868_v43  ;;  %v3665_v47 = vrot.slane %v3657_v27, %v6861_v61 }
 0x336   :  { %1770 = vst.msk [vmem:[#allocation2 + $0x157] sm:$0x7f] %vm8722_vm0, %v1644_v5  ;;  %v2368_v53 = vcombine.high %v2366_v41, %v2366_v41  ;;  %v3250_v19 = vcombine.low %v2367_v62, %v2366_v41  ;;  %v3257_v40 = vrot.slane %v3249_v63, %v6861_v61 }
 0x337   :  { %1379 = vrot.lane.b32.xlu1 %v7338_v8, %s5530_s5  ;;  %1203 = vrot.lane.b32.xlu0 %v5943_v52, %s5529_s4  ;;  %v3267_v9 = vcombine.low %v2384_v48, %v2383_v16  ;;  %v7355_v52 = vld [vmem:[%s8713_s0 + $0xe8] sm:$0xff] }
 0x338   :  { %v3264_v42 = vrot.slane %v3250_v19, %v6861_v61  ;;  %v3266_v51 = vcombine.low %v2368_v53, %v2376_v26  ;;  %v1364_v23 = vpop.permute.xlu1 %1363 }
 0x339   :  { %v1870_v46 = vpop.permute.xlu0 %1869  ;;  %1517 = vst.msk [vmem:[#allocation2 + $0x80] sm:$0xff] %vm1499_vm15, %v1364_v23  ;;  %v3281_v1 = vrot.slane %v3267_v9, %v6861_v61 }
 0x33a   :  { %1996 = vst.msk [vmem:[#allocation2 + $0x156] sm:$0xff] %vm8717_vm2, %v1870_v46  ;;  %v3274_v37 = vrot.slane %v3266_v51, %v6861_v61  ;;  %v3265_v30 = vcombine.low %v3257_v40, %v3264_v42 }
 0x33b   :  { %1431 = vrot.lane.b32.xlu1 %v5964_v55, %s5530_s5  ;;  %1381 = vrot.lane.b32.xlu0 %v7355_v52, %s5530_s5 }
 0x33c   :  { %v3282_v18 = vcombine.low %v3274_v37, %v3281_v1  ;;  %v1590_v45 = vpop.permute.xlu1 %1589  ;;  %v7440_v1 = vld [vmem:[%s8713_s0 + $0xf0] sm:$0xff] }
 0x33d   :  { %v1366_v50 = vpop.permute.xlu0 %1365  ;;  %1743 = vst.msk [vmem:[#allocation2 + $0x7f] sm:$0xfe] %vm1725_vm1, %v1590_v45 }
 0x33e   :  { %1518 = vst.msk [vmem:[#allocation2 + $0x88] sm:$0x3f] %vm1501_vm14, %v1366_v50  ;;  %v3933_v31 = vpack.c.bf16 %v3282_v18, %v3265_v30 }
 0x33f   :  { %1605 = vrot.lane.b32.xlu1 %v7338_v8, %s5531_s6  ;;  %1433 = vrot.lane.b32.xlu0 %v5953_v54, %s5530_s5 }
 0x340   :  { %5279 = vmatmul.mubr.msk.bf16.gmra.mxu0 %vm3979_vm4, %v3933_v31  ;;  %v1816_v3 = vpop.permute.xlu1 %1815 }
 0x341   :  { %v1592_v13 = vpop.permute.xlu0 %1591  ;;  %v2051_v0 = vld [vmem:[#allocation2 + $0x150] sm:$0xff]  ;;  %5282 = vmatprep.mubr.msk.bf16.mxu0 %vm8720_vm11, %v5533_v4  ;;  %1969 = vst.msk [vmem:[#allocation2 + $0x7e] sm:$0xfc] %vm1951_vm3, %v1816_v3  ;;  %v7382_v6 = vld [vmem:[#allocation2 + $0x158] sm:$0x3f] }
 0x342   :  { %1744 = vst.msk [vmem:[#allocation2 + $0x87] sm:$0x7f] %vm8722_vm0, %v1592_v13  ;;  %v2814_v25 = vcombine.high %v2051_v0, %v2051_v0  ;;  %v2821_v12 = vrot.slane %v2051_v0, %v6861_v61  ;;  %v7390_v35 = vrot.slane %v7382_v6, %v6861_v61  ;;  %v2831_v3 = vcombine.high %v7382_v6, %v7382_v6 }
 0x343   :  { %1657 = vrot.lane.b32.xlu1 %v5964_v55, %s5531_s6  ;;  %1607 = vrot.lane.b32.xlu0 %v7355_v52, %s5531_s6 }
 0x344   :  { %v4093_v7 = vpop.f32.mrf.mxu0  ;;  %v2828_v39 = vrot.slane %v2814_v25, %v6861_v61  ;;  %v2829_v59 = vcombine.high %v2821_v12, %v2821_v12  ;;  %v3658_v32 = vcombine.low %v2812_v2, %v2821_v12  ;;  %v1190_v15 = vpop.permute.xlu1 %1189 }
 0x345   :  { %v4094_v29 = vadd.f32 %v7374_v44, %v4093_v7  ;;  %v1818_v24 = vpop.permute.xlu0 %1817  ;;  %1315 = vst.msk [vmem:[#allocation2 + $0x15e] sm:$0xfc] %vm1269_vm13, %v1190_v15 }
 0x346   :  { %1970 = vst.msk [vmem:[#allocation2 + $0x86] sm:$0xff] %vm8717_vm2, %v1818_v24  ;;  %v5256_v60 = vpop.f32.mrf.mxu0  ;;  %v2830_v36 = vcombine.high %v2828_v39, %v2828_v39  ;;  %v3674_v21 = vcombine.low %v2829_v59, %v2828_v39  ;;  %v3672_v49 = vrot.slane %v3658_v32, %v6861_v61  ;;  %v7467_v39 = vld [vmem:[%s8713_s0 + $0xf8] sm:$0xff] }
 0x347   :  { %v4340_v38 = vmul.f32 0.70710677, %v4094_v29  ;;  %1831 = vrot.lane.b32.xlu1 %v7338_v8, %s5532_s7  ;;  %1659 = vrot.lane.b32.xlu0 %v5953_v54, %s5531_s6  ;;  %v4291_v46 = vmul.f32 0.5, %v4094_v29 }
 0x348   :  { %v4096_v11 = vpop.f32.mrf.mxu0  ;;  %v3675_v17 = vcombine.low %v2830_v36, %v7390_v35  ;;  %v1368_v10 = vpop.permute.xlu1 %1367  ;;  %v3682_v26 = vrot.slane %v3674_v21, %v6861_v61  ;;  %v3673_v62 = vcombine.low %v3665_v47, %v3672_v49  ;;  %v2845_v49 = vrot.slane %v2831_v3, %v6861_v61 }
 0x349   :  { %5419 = verf.f32 %v4340_v38  ;;  %v4097_v34 = vadd.f32 %v7374_v44, %v4096_v11  ;;  %v1192_v14 = vpop.permute.xlu0 %1191  ;;  %1519 = vst.msk [vmem:[#allocation2 + $0x90] sm:$0xff] %vm1499_vm15, %v1368_v10 }
 0x34a   :  { %1316 = vst.msk [vmem:[#allocation2 + $0x166] sm:$0xff] %vm1271_vm12, %v1192_v14  ;;  %v5257_v20 = vpop.f32.mrf.mxu0  ;;  %v3689_v28 = vrot.slane %v3675_v17, %v6861_v61  ;;  %v2846_v14 = vcombine.high %v7390_v35, %v7390_v35 }
 0x34b   :  { %v4341_v41 = vmul.f32 0.70710677, %v4097_v34  ;;  %1883 = vrot.lane.b32.xlu1 %v5964_v55, %s5532_s7  ;;  %1833 = vrot.lane.b32.xlu0 %v7355_v52, %s5532_s7  ;;  %v4292_v57 = vmul.f32 0.5, %v4097_v34 }
 0x34c   :  { %v3690_v16 = vcombine.low %v3682_v26, %v3689_v28  ;;  %v1420_v43 = vpop.permute.xlu1 %1419 }
 0x34d   :  { %5421 = verf.f32 %v4341_v41  ;;  %v1370_v5 = vpop.permute.xlu0 %1369  ;;  %1545 = vst.msk [vmem:[#allocation2 + $0x160] sm:$0xff] %vm1499_vm15, %v1420_v43  ;;  %v2025_v19 = vld [vmem:[#allocation2 + $0x80] sm:$0xff]  ;;  %v7443_v50 = vld [vmem:[#allocation2 + $0x88] sm:$0x3f] }
 0x34e   :  { %1520 = vst.msk [vmem:[#allocation2 + $0x98] sm:$0x3f] %vm1501_vm14, %v1370_v5  ;;  %v3945_v48 = vpack.c.bf16 %v3690_v16, %v3673_v62  ;;  %v2385_v42 = vcombine.high %v2025_v19, %v2025_v19  ;;  %v2392_v25 = vrot.slane %v2025_v19, %v6861_v61  ;;  %v2409_v59 = vrot.slane %v7443_v50, %v6861_v61 }
 0x34f   :  { %1205 = vrot.lane.b32.xlu1 %v5964_v55, %s5529_s4  ;;  %1885 = vrot.lane.b32.xlu0 %v5953_v54, %s5532_s7  ;;  %v2402_v16 = vcombine.high %v7443_v50, %v7443_v50 }
 0x350   :  { %5327 = vmatmul.mubr.msk.bf16.gmra.mxu1 %vm3979_vm4, %v3945_v48  ;;  %v1594_v53 = vpop.permute.xlu1 %1593  ;;  %v2399_v31 = vrot.slane %v2385_v42, %v6861_v61  ;;  %v2400_v11 = vcombine.high %v2392_v25, %v2392_v25  ;;  %v2417_v10 = vcombine.high %v2409_v59, %v2409_v59 }
 0x351   :  { %v1422_v63 = vpop.permute.xlu0 %1421  ;;  %5330 = vmatprep.mubr.msk.bf16.mxu1 %vm8720_vm11, %v5533_v4  ;;  %1745 = vst.msk [vmem:[#allocation2 + $0x8f] sm:$0xfe] %vm1725_vm1, %v1594_v53  ;;  %v7500_v53 = vcombine.low %v2846_v14, %v2845_v49 }
 0x352   :  { %1546 = vst.msk [vmem:[#allocation2 + $0x168] sm:$0x3f] %vm1501_vm14, %v1422_v63  ;;  %v2401_v60 = vcombine.high %v2399_v31, %v2399_v31  ;;  %v3283_v5 = vcombine.low %v2392_v25, %v2400_v11  ;;  %v3300_v48 = vcombine.low %v2409_v59, %v2417_v10 }
 0x353   :  { %1153 = vrot.lane.b32.xlu1 %v7338_v8, %s5529_s4  ;;  %1207 = vrot.lane.b32.xlu0 %v5953_v54, %s5529_s4  ;;  %v7431_v8 = vld [vmem:[%s8713_s0 + $0x1e0] sm:$0xff] }
 0x354   :  { %v1646_v55 = vpop.permute.xlu1 %1645  ;;  %v3284_v28 = vcombine.low %v2399_v31, %v2401_v60 }
 0x355   :  { %v1596_v9 = vpop.permute.xlu0 %1595  ;;  %1771 = vst.msk [vmem:[#allocation2 + $0x15f] sm:$0xfe] %vm1725_vm1, %v1646_v55 }
 0x356   :  { %v5420_v51 = vpop.eup %5419  ;;  %1746 = vst.msk [vmem:[#allocation2 + $0x97] sm:$0x7f] %vm8722_vm0, %v1596_v9  ;;  %v4101_v23 = vpop.f32.mrf.mxu0  ;;  %v3298_v42 = vrot.slane %v3284_v28, %v6861_v61 }
 0x357   :  { %v4438_v40 = vadd.f32 1.0, %v5420_v51  ;;  %v7426_v37 = vadd.f32 %v7374_v44, %v4101_v23  ;;  %1435 = vrot.lane.b32.xlu1 %v7431_v8, %s5530_s5  ;;  %1155 = vrot.lane.b32.xlu0 %v7355_v52, %s5529_s4 }
 0x358   :  { %v5260_v54 = vpop.f32.mrf.mxu0  ;;  %v1820_v18 = vpop.permute.xlu1 %1819 }
 0x359   :  { %v4487_v56 = vmul.f32 %v4438_v40, %v4291_v46  ;;  %v4342_v30 = vmul.f32 0.70710677, %v7426_v37  ;;  %v1648_v45 = vpop.permute.xlu0 %1647  ;;  %1971 = vst.msk [vmem:[#allocation2 + $0x8e] sm:$0xfc] %vm1951_vm3, %v1820_v18  ;;  %v2416_v46 = vrot.slane %v2402_v16, %v6861_v61  ;;  %v3308_v18 = vrot.slane %v3300_v48, %v6861_v61 }
 0x35a   :  { %v5422_v22 = vpop.eup %5421  ;;  %1772 = vst.msk [vmem:[#allocation2 + $0x167] sm:$0x7f] %vm8722_vm0, %v1648_v45  ;;  %v4104_v52 = vpop.f32.mrf.mxu0  ;;  %v3699_v45 = vrot.slane %v7500_v53, %v6861_v61 }
 0x35b   :  { %v4537_v13 = vsel %vm4536_vm5, %v4487_v56, 0.0  ;;  %v4538_v0 = vrot.slane %v4487_v56, 1  ;;  %v4541_v2 = vrot.slane %v4487_v56, 2  ;;  %1383 = vrot.lane.b32.xlu1 %v7440_v1, %s5530_s5  ;;  %1437 = vrot.lane.b32.xlu0 %v7456_v58, %s5530_s5  ;;  %v4439_v12 = vadd.f32 1.0, %v5422_v22 }
 0x35c   :  { %5423 = verf.f32 %v4342_v30  ;;  %v7462_v6 = vadd.f32 %v7374_v44, %v4104_v52  ;;  %v5261_v7 = vpop.f32.mrf.mxu0  ;;  %v1872_v15 = vpop.permute.xlu1 %1871  ;;  %v4544_v36 = vrot.slane %v4487_v56, 3  ;;  %v4559_v20 = vrot.slane %v4487_v56, 4 }
 0x35d   :  { %v4540_v32 = vsel %vm8719_vm6, %v4538_v0, %v4537_v13  ;;  %v4556_v29 = vsel %vm4536_vm5, %v4538_v0, 0.0  ;;  %v1822_v24 = vpop.permute.xlu0 %1821  ;;  %v7474_v21 = vmul.f32 %v4439_v12, %v4292_v57  ;;  %1997 = vst.msk [vmem:[#allocation2 + $0x15e] sm:$0xfc] %vm1951_vm3, %v1872_v15  ;;  %v3291_v56 = vrot.slane %v3283_v5, %v6861_v61 }
 0x35e   :  { %v4557_v27 = vsel %vm8719_vm6, %v4541_v2, %v4556_v29  ;;  %1972 = vst.msk [vmem:[#allocation2 + $0x96] sm:$0xff] %vm8717_vm2, %v1822_v24  ;;  %v4343_v38 = vmul.f32 0.70710677, %v7462_v6  ;;  %v4543_v17 = vsel %vm4542_vm7, %v4541_v2, %v4540_v32  ;;  %v4293_v57 = vmul.f32 0.5, %v7426_v37 }
 0x35f   :  { %1661 = vrot.lane.b32.xlu1 %v7431_v8, %s5531_s6  ;;  %1385 = vrot.lane.b32.xlu0 %v7467_v39, %s5530_s5  ;;  %v4558_v34 = vsel %vm4542_vm7, %v4544_v36, %v4557_v27  ;;  %v4547_v41 = vrot.slane %v7474_v21, 4  ;;  %v4550_v62 = vrot.slane %v7474_v21, 5  ;;  %v4546_v43 = vsel %vm4545_vm8, %v4544_v36, %v4543_v17 }
 0x360   :  { %5425 = verf.f32 %v4343_v38  ;;  %v1142_v47 = vpop.permute.xlu1 %1141  ;;  %v4560_v35 = vsel %vm4545_vm8, %v4559_v20, %v4558_v34  ;;  %v4553_v63 = vrot.slane %v7474_v21, 6  ;;  %v4563_v54 = vrot.slane %v7474_v21, 7 }
 0x361   :  { %v1874_v26 = vpop.permute.xlu0 %1873  ;;  %1291 = vst.msk [vmem:[#allocation2 + $0x9e] sm:$0xfc] %vm1269_vm13, %v1142_v47  ;;  %v4549_v51 = vsel %vm4548_vm9, %v4547_v41, %v4546_v43  ;;  %v4561_v23 = vsel %vm4548_vm9, %v4550_v62, %v4560_v35  ;;  %v3299_v13 = vcombine.low %v3291_v56, %v3298_v42  ;;  %v4294_v29 = vmul.f32 0.5, %v7462_v6  ;;  %v7564_v43 = vld [vmem:[%s8713_s0 + $0x1f0] sm:$0xff] }
 0x362   :  { %1998 = vst.msk [vmem:[#allocation2 + $0x166] sm:$0xff] %vm8717_vm2, %v1874_v26  ;;  %vm4554_vm2 = vcmask 1046534   ;;  %v4552_v31 = vsel %vm8718_vm10, %v4550_v62, %v4549_v51  ;;  %v4562_v22 = vsel %vm8718_vm10, %v4553_v63, %v4561_v23  ;;  %v4565_v32 = vsel %vm4536_vm5, %v4553_v63, 0.0 }
 0x363   :  { %1609 = vrot.lane.b32.xlu1 %v7440_v1, %s5531_s6  ;;  %1663 = vrot.lane.b32.xlu0 %v7456_v58, %s5531_s6  ;;  %v4577_v37 = vsel %vm4536_vm5, %v4563_v54, 0.0  ;;  %v7545_v21 = vsel %vm4554_vm2, %v4553_v63, %v4552_v31  ;;  %v7548_v38 = vsel %vm4554_vm2, %v4563_v54, %v4562_v22 }
 0x364   :  { %v1372_v19 = vpop.permute.xlu1 %1371 }
 0x365   :  { %v1144_v55 = vpop.permute.xlu0 %1143  ;;  %v7503_v9 = vld [vmem:[#allocation2 + $0x90] sm:$0xff] }
 0x366   :  { %1292 = vst.msk [vmem:[#allocation2 + $0xa6] sm:$0xff] %vm1271_vm12, %v1144_v55  ;;  %v7512_v40 = vrot.slane %v7503_v9, %v6861_v61  ;;  %v2418_v49 = vcombine.high %v7503_v9, %v7503_v9 }
 0x367   :  { %1521 = vst.msk [vmem:[#allocation2 + $0xa0] sm:$0xff] %vm1499_vm15, %v1372_v19  ;;  %1887 = vrot.lane.b32.xlu1 %v7431_v8, %s5532_s7  ;;  %1611 = vrot.lane.b32.xlu0 %v7467_v39, %s5531_s6 }
 0x368   :  { %v3301_v30 = vcombine.low %v2416_v46, %v7512_v40  ;;  %v1598_v52 = vpop.permute.xlu1 %1597  ;;  %v7577_v46 = vrot.slane %v2418_v49, %v6861_v61  ;;  %v2433_v53 = vcombine.high %v7512_v40, %v7512_v40 }
 0x369   :  { %v5424_v50 = vpop.eup %5423  ;;  %v1374_v3 = vpop.permute.xlu0 %1373  ;;  %v2053_v0 = vld [vmem:[#allocation2 + $0x160] sm:$0xff]  ;;  %v7528_v2 = vld [vmem:[#allocation2 + $0x168] sm:$0x3f]  ;;  %1747 = vst.msk [vmem:[#allocation2 + $0x9f] sm:$0xfe] %vm1725_vm1, %v1598_v52 }
 0x36a   :  { %v4440_v25 = vadd.f32 1.0, %v5424_v50  ;;  %1522 = vst.msk [vmem:[#allocation2 + $0xa8] sm:$0x3f] %vm1501_vm14, %v1374_v3  ;;  %v3315_v12 = vrot.slane %v3301_v30, %v6861_v61  ;;  %v2847_v7 = vcombine.high %v2053_v0, %v2053_v0  ;;  %v2854_v59 = vrot.slane %v2053_v0, %v6861_v61 }
 0x36b   :  { %1835 = vrot.lane.b32.xlu1 %v7440_v1, %s5532_s7  ;;  %1889 = vrot.lane.b32.xlu0 %v7456_v58, %s5532_s7  ;;  %v2871_v15 = vrot.slane %v7528_v2, %v6861_v61 }
 0x36c   :  { %v4489_v24 = vmul.f32 %v4440_v25, %v4293_v57  ;;  %v3316_v60 = vcombine.low %v3308_v18, %v3315_v12  ;;  %v2861_v36 = vrot.slane %v2847_v7, %v6861_v61  ;;  %v2862_v27 = vcombine.high %v2854_v59, %v2854_v59  ;;  %v1194_v6 = vpop.permute.xlu1 %1193  ;;  %v78_v57 = vld [vmem:[%s8713_s0 + $0x1f8] sm:$0xff] }
 0x36d   :  { %v1600_v11 = vpop.permute.xlu0 %1599  ;;  %v2879_v1 = vcombine.high %v2871_v15, %v2871_v15  ;;  %v5426_v17 = vpop.eup %5425  ;;  %1317 = vst.msk [vmem:[#allocation2 + $0x16e] sm:$0xfc] %vm1269_vm13, %v1194_v6 }
 0x36e   :  { %v4566_v34 = vrot.slane %v4489_v24, 7  ;;  %v4569_v10 = vrot.slane %v4489_v24, 1  ;;  %v4571_v14 = vrot.slane %v4489_v24, 2  ;;  %v4578_v20 = vsel %vm8719_vm6, %v4489_v24, %v4577_v37  ;;  %1748 = vst.msk [vmem:[#allocation2 + $0xa7] sm:$0x7f] %vm8722_vm0, %v1600_v11 }
 0x36f   :  { %v4581_v47 = vrot.slane %v4489_v24, 3  ;;  %v4441_v26 = vadd.f32 1.0, %v5426_v17  ;;  %1209 = vrot.lane.b32.xlu1 %v7431_v8, %s5529_s4  ;;  %1837 = vrot.lane.b32.xlu0 %v7467_v39, %s5532_s7  ;;  %v3934_v28 = vpack.c.bf16 %v3316_v60, %v3299_v13  ;;  %v2863_v41 = vcombine.high %v2861_v36, %v2861_v36 }
 0x370   :  { %v4567_v62 = vsel %vm8719_vm6, %v4566_v34, %v4565_v32  ;;  %v4579_v16 = vsel %vm4542_vm7, %v4569_v10, %v4578_v20  ;;  %v3692_v35 = vcombine.low %v2854_v59, %v2862_v27  ;;  %v3709_v5 = vcombine.low %v2871_v15, %v2879_v1  ;;  %v1824_v39 = vpop.permute.xlu1 %1823  ;;  %v2028_v59 = vld [vmem:[#allocation2 + $0x98] sm:$0x3f] }
 0x371   :  { %v4568_v48 = vsel %vm4542_vm7, %v4489_v24, %v4567_v62  ;;  %v4490_v63 = vmul.f32 %v4441_v26, %v4294_v29  ;;  %v4580_v8 = vsel %vm4545_vm8, %v4571_v14, %v4579_v16  ;;  %5283 = vmatmul.mubr.msk.bf16.gmra.mxu0 %vm3979_vm4, %v3934_v28  ;;  %v1196_v19 = vpop.permute.xlu0 %1195  ;;  %v3708_v55 = vcombine.low %v2861_v36, %v2863_v41 }
 0x372   :  { %v4570_v9 = vsel %vm4545_vm8, %v4569_v10, %v4568_v48  ;;  %v4582_v42 = vsel %vm4548_vm9, %v4581_v47, %v4580_v8  ;;  %1973 = vst.msk [vmem:[#allocation2 + $0x9e] sm:$0xfc] %vm1951_vm3, %v1824_v39  ;;  %v4197_v51 = vpop.f32.mrf.mxu1  ;;  %v3706_v23 = vrot.slane %v3692_v35, %v6861_v61  ;;  %5286 = vmatprep.mubr.msk.bf16.mxu0 %vm8720_vm11, %v5533_v4 }
 0x373   :  { %1318 = vst.msk [vmem:[#allocation2 + $0x176] sm:$0xff] %vm1271_vm12, %v1196_v19  ;;  %v4572_v54 = vsel %vm4548_vm9, %v4571_v14, %v4570_v9  ;;  %v4573_v56 = vrot.slane %v4490_v63, 3  ;;  %v4575_v30 = vrot.slane %v4490_v63, 4  ;;  %v4584_v18 = vrot.slane %v4490_v63, 5  ;;  %1439 = vrot.lane.b32.xlu1 %v7564_v43, %s5530_s5  ;;  %1211 = vrot.lane.b32.xlu0 %v7456_v58, %s5529_s4 }
 0x374   :  { %v4598_v50 = vrot.slane %v4490_v63, 6  ;;  %v7585_v31 = vadd.f32 %v7374_v44, %v4197_v51  ;;  %v5308_v22 = vpop.f32.mrf.mxu1  ;;  %v3716_v52 = vrot.slane %v3708_v55, %v6861_v61  ;;  %v3723_v3 = vrot.slane %v3709_v5, %v6861_v61  ;;  %v1424_v12 = vpop.permute.xlu1 %1423 }
 0x375   :  { %v4574_v13 = vsel %vm8718_vm10, %v4573_v56, %v4572_v54  ;;  %v4583_v0 = vsel %vm8718_vm10, %v4575_v30, %v4582_v42  ;;  %v4586_v25 = vsel %vm4536_vm5, %v4575_v30, 0.0  ;;  %v4597_v58 = vsel %vm4536_vm5, %v4584_v18, 0.0  ;;  %v1826_v7 = vpop.permute.xlu0 %1825  ;;  %1547 = vst.msk [vmem:[#allocation2 + $0x170] sm:$0xff] %vm1499_vm15, %v1424_v12 }
 0x376   :  { %v4576_v32 = vsel %vm4554_vm2, %v4575_v30, %v4574_v13  ;;  %v4585_v37 = vsel %vm4554_vm2, %v4584_v18, %v4583_v0  ;;  %v7599_v29 = vsel %vm8719_vm6, %v4584_v18, %v4586_v25  ;;  %v7602_v15 = vsel %vm8719_vm6, %v4598_v50, %v4597_v58  ;;  %v4200_v24 = vpop.f32.mrf.mxu1 }
 0x377   :  { %vm8723_vm10 = vcmask 294144   ;;  %v5131_v60 = vmax.f32 %v7545_v21, %v7548_v38  ;;  %v5132_v36 = vmax.f32 %v4576_v32, %v4585_v37  ;;  %v4366_v27 = vmul.f32 0.70710677, %v7585_v31  ;;  %1665 = vrot.lane.b32.xlu1 %v7564_v43, %s5531_s6  ;;  %1441 = vrot.lane.b32.xlu0 %v78_v57, %s5530_s5 }
 0x378   :  { %1974 = vst.msk [vmem:[#allocation2 + $0xa6] sm:$0xff] %vm8723_vm10, %v1826_v7  ;;  %v7610_v6 = vadd.f32 %v7374_v44, %v4200_v24  ;;  %v5309_v11 = vpop.f32.mrf.mxu1  ;;  %v3707_v1 = vcombine.low %v3699_v45, %v3706_v23  ;;  %v3724_v49 = vcombine.low %v3716_v52, %v3723_v3  ;;  %v2435_v17 = vcombine.high %v2028_v59, %v2028_v59  ;;  %v1650_v10 = vpop.permute.xlu1 %1649 }
 0x379   :  { %v2442_v21 = vrot.slane %v2028_v59, %v6861_v61  ;;  %v5159_v38 = vmax.f32 %v5131_v60, %v5132_v36  ;;  %5427 = verf.f32 %v4366_v27  ;;  %v1426_v14 = vpop.permute.xlu0 %1425  ;;  %1773 = vst.msk [vmem:[#allocation2 + $0x16f] sm:$0xfe] %vm1725_vm1, %v1650_v10  ;;  %v2434_v47 = vcombine.high %v7577_v46, %v7577_v46 }
 0x37a   :  { %v4367_v34 = vmul.f32 0.70710677, %v7610_v6  ;;  %v3946_v20 = vpack.c.bf16 %v3724_v49, %v3707_v1  ;;  %1548 = vst.msk [vmem:[#allocation2 + $0x178] sm:$0x3f] %vm1501_vm14, %v1426_v14  ;;  %v2449_v45 = vrot.slane %v2435_v17, %v6861_v61  ;;  %v3317_v35 = vcombine.low %v2433_v53, %v7577_v46 }
 0x37b   :  { %5173 = vst [vmem:[%s8716_s3] sm:$0x7f] %v5159_v38  ;;  %1891 = vrot.lane.b32.xlu1 %v7564_v43, %s5532_s7  ;;  %1667 = vrot.lane.b32.xlu0 %v78_v57, %s5531_s6  ;;  %v2450_v26 = vcombine.high %v2442_v21, %v2442_v21  ;;  %v3318_v43 = vcombine.low %v2434_v47, %v2442_v21 }
 0x37c   :  { %5429 = verf.f32 %v4367_v34  ;;  %5331 = vmatmul.mubr.msk.bf16.gmra.mxu1 %vm3979_vm4, %v3946_v20  ;;  %v1876_v28 = vpop.permute.xlu1 %1875  ;;  %v3325_v9 = vrot.slane %v3317_v35, %v6861_v61  ;;  %v2864_v22 = vcombine.high %v7528_v2, %v7528_v2 }
 0x37d   :  { %v1652_v41 = vpop.permute.xlu0 %1651  ;;  %5334 = vmatprep.mubr.msk.bf16.mxu1 %vm8720_vm11, %v5533_v4  ;;  %1999 = vst.msk [vmem:[#allocation2 + $0x16e] sm:$0xfc] %vm1951_vm3, %v1876_v28  ;;  %v3334_v5 = vcombine.low %v2450_v26, %v2449_v45  ;;  %v3332_v39 = vrot.slane %v3318_v43, %v6861_v61 }
 0x37e   :  { %1774 = vst.msk [vmem:[#allocation2 + $0x177] sm:$0x7f] %vm8722_vm0, %v1652_v41  ;;  %v2878_v24 = vrot.slane %v2864_v22, %v6861_v61 }
 0x37f   :  { %v7634_v62 = vld [vmem:[#allocation2 + $0xa0] sm:$0xff]  ;;  %1839 = vrot.lane.b32.xlu1 %v5802_v33, %s5532_s7  ;;  %1893 = vrot.lane.b32.xlu0 %v78_v57, %s5532_s7  ;;  %v3342_v42 = vrot.slane %v3334_v5, %v6861_v61  ;;  %v3333_v18 = vcombine.low %v3325_v9, %v3332_v39  ;;  %v4317_v57 = vmul.f32 0.5, %v7585_v31  ;;  %v4318_v31 = vmul.f32 0.5, %v7610_v6 }
 0x380   :  { %v2458_v16 = vrot.slane %v7634_v62, %v6861_v61  ;;  %v1146_v48 = vpop.permute.xlu1 %1145 }
 0x381   :  { %v1878_v63 = vpop.permute.xlu0 %1877  ;;  %1293 = vst.msk [vmem:[#allocation2 + $0xae] sm:$0xfc] %vm1269_vm13, %v1146_v48 }
 0x382   :  { %v2466_v40 = vcombine.high %v2458_v16, %v2458_v16  ;;  %2000 = vst.msk [vmem:[#allocation2 + $0x176] sm:$0xff] %vm8723_vm10, %v1878_v63  ;;  %v4109_v8 = vpop.f32.mrf.mxu0  ;;  %vm8724_vm10 = vcmask 1045509  }
 0x383   :  { %v7650_v55 = vadd.f32 %v7374_v44, %v4109_v8 }
 0x384   :  { %v3335_v19 = vcombine.low %v2458_v16, %v2466_v40  ;;  %v5264_v33 = vpop.f32.mrf.mxu0  ;;  %v1376_v46 = vpop.permute.xlu1 %1375 }
 0x385   :  { %v4344_v23 = vmul.f32 0.70710677, %v7650_v55  ;;  %v1148_v54 = vpop.permute.xlu0 %1147 }
 0x386   :  { %v3349_v51 = vrot.slane %v3335_v19, %v6861_v61  ;;  %v5428_v56 = vpop.eup %5427  ;;  %1294 = vst.msk [vmem:[#allocation2 + $0xb6] sm:$0xff] %vm1271_vm12, %v1148_v54  ;;  %v4112_v30 = vpop.f32.mrf.mxu0 }
 0x387   :  { %v4464_v52 = vadd.f32 1.0, %v5428_v56  ;;  %5431 = verf.f32 %v4344_v23  ;;  %1523 = vst.msk [vmem:[#allocation2 + $0xb0] sm:$0xff] %vm1499_vm15, %v1376_v46  ;;  %v7662_v3 = vadd.f32 %v7374_v44, %v4112_v30 }
 0x388   :  { %v3350_v50 = vcombine.low %v3342_v42, %v3349_v51  ;;  %v5265_v0 = vpop.f32.mrf.mxu0  ;;  %v1602_v59 = vpop.permute.xlu1 %1601 }
 0x389   :  { %v5430_v13 = vpop.eup %5429  ;;  %v7664_v58 = vmul.f32 %v4464_v52, %v4317_v57  ;;  %v4345_v7 = vmul.f32 0.70710677, %v7662_v3  ;;  %v1378_v32 = vpop.permute.xlu0 %1377  ;;  %v2055_v2 = vld [vmem:[#allocation2 + $0x170] sm:$0xff]  ;;  %1749 = vst.msk [vmem:[#allocation2 + $0xaf] sm:$0xfe] %vm1725_vm1, %v1602_v59  ;;  %v4295_v0 = vmul.f32 0.5, %v7650_v55 }
 0x38a   :  { %v3935_v25 = vpack.c.bf16 %v3350_v50, %v3333_v18  ;;  %v4465_v12 = vadd.f32 1.0, %v5430_v13  ;;  %1524 = vst.msk [vmem:[#allocation2 + $0xb8] sm:$0x3f] %vm1501_vm14, %v1378_v32  ;;  %v2056_v37 = vld [vmem:[#allocation2 + $0x178] sm:$0x3f]  ;;  %v2880_v60 = vcombine.high %v2055_v2, %v2055_v2  ;;  %v2887_v36 = vrot.slane %v2055_v2, %v6861_v61 }
 0x38b   :  { %v4847_v27 = vrot.slane %v7664_v58, 2  ;;  %v7675_v11 = vrot.slane %v7664_v58, 3  ;;  %v4861_v1 = vrot.slane %v7664_v58, 4  ;;  %v4872_v6 = vrot.slane %v7664_v58, 5  ;;  %v2030_v32 = vld [vmem:[#allocation2 + $0xa8] sm:$0x3f] }
 0x38c   :  { %5287 = vmatmul.mubr.msk.bf16.gmra.mxu0 %vm3979_vm4, %v3935_v25  ;;  %v4514_v49 = vmul.f32 %v4465_v12, %v4318_v31  ;;  %5433 = verf.f32 %v4345_v7  ;;  %v2894_v17 = vrot.slane %v2880_v60, %v6861_v61  ;;  %v2895_v21 = vcombine.high %v2887_v36, %v2887_v36  ;;  %v1198_v10 = vpop.permute.xlu1 %1197 }
 0x38d   :  { %5290 = vmatprep.mubr.msk.bf16.mxu0 %vm8720_vm11, %v5533_v4  ;;  %v4859_v38 = vsel %vm4536_vm5, %v4847_v27, 0.0  ;;  %v4870_v34 = vsel %vm4536_vm5, %v7675_v11, 0.0  ;;  %v1604_v14 = vpop.permute.xlu0 %1603  ;;  %v2897_v20 = vcombine.high %v2056_v37, %v2056_v37  ;;  %v2904_v47 = vrot.slane %v2056_v37, %v6861_v61  ;;  %1319 = vst.msk [vmem:[#allocation2 + $0x17e] sm:$0xfc] %vm1269_vm13, %v1198_v10 }
 0x38e   :  { %v4860_v53 = vsel %vm8719_vm6, %v7675_v11, %v4859_v38  ;;  %v4871_v45 = vsel %vm8719_vm6, %v4861_v1, %v4870_v34  ;;  %v4863_v26 = vrot.slane %v4514_v49, 5  ;;  %v4865_v28 = vrot.slane %v4514_v49, 6  ;;  %1750 = vst.msk [vmem:[#allocation2 + $0xb7] sm:$0x7f] %vm8722_vm0, %v1604_v14  ;;  %vm8725_vm6 = vmmov %vm8724_vm10 }
 0x38f   :  { %v4862_v41 = vsel %vm4542_vm7, %v4861_v1, %v4860_v53  ;;  %v4873_v16 = vsel %vm4542_vm7, %v4872_v6, %v4871_v45  ;;  %v4867_v43 = vrot.slane %v4514_v49, 7  ;;  %v4877_v40 = vrot.slane %v4514_v49, 1 }
 0x390   :  { %v4864_v35 = vsel %vm4545_vm8, %v4863_v26, %v4862_v41  ;;  %v4874_v5 = vsel %vm4545_vm8, %v4865_v28, %v4873_v16  ;;  %v2896_v48 = vcombine.high %v2894_v17, %v2894_v17  ;;  %v2911_v63 = vrot.slane %v2897_v20, %v6861_v61  ;;  %v1828_v19 = vpop.permute.xlu1 %1827 }
 0x391   :  { %v4866_v8 = vsel %vm4548_vm9, %v4865_v28, %v4864_v35  ;;  %v4875_v39 = vsel %vm4548_vm9, %v4867_v43, %v4874_v5  ;;  %v1200_v33 = vpop.permute.xlu0 %1199  ;;  %v2912_v9 = vcombine.high %v2904_v47, %v2904_v47  ;;  %v3725_v42 = vcombine.low %v2878_v24, %v2887_v36  ;;  %1975 = vst.msk [vmem:[#allocation2 + $0xae] sm:$0xfc] %vm1951_vm3, %v1828_v19 }
 0x392   :  { %v4868_v51 = vsel %vm8724_vm10, %v4867_v43, %v4866_v8  ;;  %v4876_v23 = vsel %vm8725_vm6, %v4514_v49, %v4875_v39  ;;  %1320 = vst.msk [vmem:[#allocation2 + $0x186] sm:$0xff] %vm1271_vm12, %v1200_v33  ;;  %v3726_v46 = vcombine.low %v2895_v21, %v2894_v17  ;;  %v3742_v54 = vcombine.low %v2896_v48, %v2904_v47 }
 0x393   :  { %v7705_v56 = vsel %vm4554_vm2, %v4514_v49, %v4868_v51  ;;  %v7708_v30 = vsel %vm4554_vm2, %v4877_v40, %v4876_v23  ;;  %v3743_v18 = vcombine.low %v2912_v9, %v2911_v63  ;;  %v2451_v50 = vcombine.high %v7634_v62, %v7634_v62 }
 0x394   :  { %v5432_v22 = vpop.eup %5431  ;;  %v5146_v57 = vmax.f32 %v7705_v56, %v7708_v30  ;;  %v3740_v52 = vrot.slane %v3726_v46, %v6861_v61  ;;  %v3750_v13 = vrot.slane %v3742_v54, %v6861_v61  ;;  %v1428_v12 = vpop.permute.xlu1 %1427  ;;  %vm8726_vm6 = vcmask 294144  }
 0x395   :  { %v4442_v25 = vadd.f32 1.0, %v5432_v22  ;;  %v1830_v7 = vpop.permute.xlu0 %1829  ;;  %v3757_v59 = vrot.slane %v3743_v18, %v6861_v61  ;;  %1549 = vst.msk [vmem:[#allocation2 + $0x180] sm:$0xff] %vm1499_vm15, %v1428_v12  ;;  %v3733_v62 = vrot.slane %v3725_v42, %v6861_v61  ;;  %v2465_v37 = vrot.slane %v2451_v50, %v6861_v61 }
 0x396   :  { %1976 = vst.msk [vmem:[#allocation2 + $0xb6] sm:$0xff] %vm8726_vm6, %v1830_v7  ;;  %v2475_v49 = vrot.slane %v2030_v32, %v6861_v61  ;;  %v4296_v17 = vmul.f32 0.5, %v7662_v3  ;;  %v2468_v34 = vcombine.high %v2030_v32, %v2030_v32  ;;  %vm8727_vm6 = vmmov %vm8724_vm10 }
 0x397   :  { %v4491_v2 = vmul.f32 %v4442_v25, %v4295_v0  ;;  %v3758_v31 = vcombine.low %v3750_v13, %v3757_v59  ;;  %v3741_v24 = vcombine.low %v3733_v62, %v3740_v52  ;;  %v2467_v47 = vcombine.high %v2465_v37, %v2465_v37 }
 0x398   :  { %v1654_v1 = vpop.permute.xlu1 %1653  ;;  %v2483_v40 = vcombine.high %v2475_v49, %v2475_v49  ;;  %v2482_v33 = vrot.slane %v2468_v34, %v6861_v61 }
 0x399   :  { %v5434_v60 = vpop.eup %5433  ;;  %v4588_v36 = vrot.slane %v4491_v2, 6  ;;  %v4590_v55 = vrot.slane %v4491_v2, 7  ;;  %v1430_v6 = vpop.permute.xlu0 %1429  ;;  %v3947_v38 = vpack.c.bf16 %v3758_v31, %v3741_v24  ;;  %1775 = vst.msk [vmem:[#allocation2 + $0x17f] sm:$0xfe] %vm1725_vm1, %v1654_v1  ;;  %v4593_v10 = vrot.slane %v4491_v2, 1 }
 0x39a   :  { %v4443_v21 = vadd.f32 1.0, %v5434_v60  ;;  %1550 = vst.msk [vmem:[#allocation2 + $0x188] sm:$0x3f] %vm1501_vm14, %v1430_v6  ;;  %v4603_v45 = vrot.slane %v4491_v2, 2  ;;  %v3351_v9 = vcombine.low %v2465_v37, %v2467_v47  ;;  %v3352_v18 = vcombine.low %v2475_v49, %v2483_v40 }
 0x39b   :  { %v4600_v14 = vsel %vm4542_vm7, %v4590_v55, %v7602_v15  ;;  %v4589_v20 = vsel %vm4542_vm7, %v4588_v36, %v7599_v29  ;;  %5335 = vmatmul.mubr.msk.bf16.gmra.mxu1 %vm3979_vm4, %v3947_v38 }
 0x39c   :  { %v4601_v53 = vsel %vm4545_vm8, %v4491_v2, %v4600_v14  ;;  %v7731_v26 = vmul.f32 %v4443_v21, %v4296_v17  ;;  %v4591_v3 = vsel %vm4545_vm8, %v4590_v55, %v4589_v20  ;;  %v1150_v16 = vpop.permute.xlu1 %1149  ;;  %5338 = vmatprep.mubr.msk.bf16.mxu1 %vm8720_vm11, %v5533_v4  ;;  %v3359_v22 = vrot.slane %v3351_v9, %v6861_v61 }
 0x39d   :  { %v4592_v28 = vsel %vm4548_vm9, %v4491_v2, %v4591_v3  ;;  %v4602_v41 = vsel %vm4548_vm9, %v4593_v10, %v4601_v53  ;;  %v1656_v43 = vpop.permute.xlu0 %1655  ;;  %v2031_v15 = vld [vmem:[#allocation2 + $0xb0] sm:$0xff]  ;;  %1295 = vst.msk [vmem:[#allocation2 + $0xbe] sm:$0xfc] %vm1269_vm13, %v1150_v16  ;;  %v3366_v25 = vrot.slane %v3352_v18, %v6861_v61 }
 0x39e   :  { %v4594_v29 = vsel %vm8724_vm10, %v4593_v10, %v4592_v28  ;;  %v4595_v35 = vrot.slane %v7731_v26, 2  ;;  %v4604_v5 = vsel %vm8727_vm6, %v4603_v45, %v4602_v41  ;;  %v7743_v48 = vrot.slane %v7731_v26, 3  ;;  %1776 = vst.msk [vmem:[#allocation2 + $0x187] sm:$0x7f] %vm8722_vm0, %v1656_v43 }
 0x39f   :  { %v2484_v63 = vcombine.high %v2031_v15, %v2031_v15  ;;  %v2491_v8 = vrot.slane %v2031_v15, %v6861_v61  ;;  %vm8728_vm10 = vcmask 294144   ;;  %v3367_v32 = vcombine.low %v3359_v22, %v3366_v25 }
 0x3a0   :  { %v7751_v39 = vsel %vm4554_vm2, %v4595_v35, %v4594_v29  ;;  %v7755_v19 = vsel %vm4554_vm2, %v7743_v48, %v4604_v5  ;;  %v1880_v51 = vpop.permute.xlu1 %1879  ;;  %v4609_v41 = vrot.slane %v7731_v26, 4  ;;  %v4607_v29 = vsel %vm4536_vm5, %v4595_v35, 0.0 }
 0x3a1   :  { %v5133_v42 = vmax.f32 %v7751_v39, %v7755_v19  ;;  %v1152_v23 = vpop.permute.xlu0 %1151  ;;  %v7761_v46 = vrot.slane %v2484_v63, %v6861_v61  ;;  %2001 = vst.msk [vmem:[#allocation2 + $0x17e] sm:$0xfc] %vm1951_vm3, %v1880_v51  ;;  %v2499_v54 = vcombine.high %v2491_v8, %v2491_v8  ;;  %v3368_v50 = vcombine.low %v2482_v33, %v2491_v8  ;;  %v2032_v33 = vld [vmem:[#allocation2 + $0xb8] sm:$0x3f] }
 0x3a2   :  { %1296 = vst.msk [vmem:[#allocation2 + $0xc6] sm:$0xff] %vm1271_vm12, %v1152_v23  ;;  %v4618_v5 = vsel %vm4536_vm5, %v7743_v48, 0.0  ;;  %vm8729_vm6 = vcmask 1041409   ;;  %v4620_v18 = vrot.slane %v7731_v26, 5 }
 0x3a3   :  { %v3369_v52 = vcombine.low %v2499_v54, %v7761_v46  ;;  %v3376_v12 = vrot.slane %v3368_v50, %v6861_v61  ;;  %v4608_v9 = vsel %vm8729_vm6, %v7743_v48, %v4607_v29  ;;  %v2501_v50 = vcombine.high %v2032_v33, %v2032_v33 }
 0x3a4   :  { %v2508_v48 = vrot.slane %v2032_v33, %v6861_v61 }
 0x3a5   :  { %v1202_v13 = vpop.permute.xlu1 %1201  ;;  %v1882_v0 = vpop.permute.xlu0 %1881  ;;  %v3383_v7 = vrot.slane %v3369_v52, %v6861_v61 }
 0x3a6   :  { %1321 = vst.msk [vmem:[#allocation2 + $0x18e] sm:$0xfc] %vm1269_vm13, %v1202_v13 }
 0x3a7   :  { %2002 = vst.msk [vmem:[#allocation2 + $0x186] sm:$0xff] %vm8728_vm10, %v1882_v0  ;;  %v3384_v2 = vcombine.low %v3376_v12, %v3383_v7  ;;  %vm8730_vm10 = vmmov %vm8729_vm6  ;;  %v4610_v12 = vsel %vm4542_vm7, %v4609_v41, %v4608_v9  ;;  %vm8732_vm6 = vcmask 1045509  }
 0x3a8   :  { %v4117_v59 = vpop.f32.mrf.mxu0  ;;  %v4205_v62 = vpop.f32.mrf.mxu1  ;;  %v4619_v51 = vsel %vm8730_vm10, %v4609_v41, %v4618_v5  ;;  %vm8733_vm10 = vmmov %vm8732_vm6 }
 0x3a9   :  { %v4118_v31 = vadd.f32 %v7374_v44, %v4117_v59  ;;  %v1380_v37 = vpop.permute.xlu1 %1379  ;;  %v1204_v24 = vpop.permute.xlu0 %1203  ;;  %v3936_v36 = vpack.c.bf16 %v3384_v2, %v3367_v32  ;;  %v7776_v6 = vadd.f32 %v7374_v44, %v4205_v62  ;;  %v4621_v7 = vsel %vm4542_vm7, %v4620_v18, %v4619_v51 }
 0x3aa   :  { %1525 = vst.msk [vmem:[#allocation2 + $0xc0] sm:$0xff] %vm1499_vm15, %v1380_v37  ;;  %v5268_v60 = vpop.f32.mrf.mxu0  ;;  %v5312_v55 = vpop.f32.mrf.mxu1  ;;  %v2500_v2 = vcombine.high %v7761_v46, %v7761_v46 }
 0x3ab   :  { %1322 = vst.msk [vmem:[#allocation2 + $0x196] sm:$0xff] %vm1271_vm12, %v1204_v24  ;;  %v4346_v1 = vmul.f32 0.70710677, %v4118_v31  ;;  %5291 = vmatmul.mubr.msk.bf16.gmra.mxu0 %vm3979_vm4, %v3936_v36  ;;  %v4368_v14 = vmul.f32 0.70710677, %v7776_v6  ;;  %v4297_v63 = vmul.f32 0.5, %v4118_v31  ;;  %v2515_v55 = vrot.slane %v2501_v50, %v6861_v61 }
 0x3ac   :  { %v4120_v49 = vpop.f32.mrf.mxu0  ;;  %v4208_v17 = vpop.f32.mrf.mxu1  ;;  %5294 = vmatprep.mubr.msk.bf16.mxu0 %vm8720_vm11, %v5533_v4  ;;  %vm8731_vm11 = vcmask 294144  }
 0x3ad   :  { %5435 = verf.f32 %v4346_v1  ;;  %v1432_v21 = vpop.permute.xlu1 %1431  ;;  %v1382_v38 = vpop.permute.xlu0 %1381  ;;  %v7787_v53 = vadd.f32 %v7374_v44, %v4208_v17  ;;  %v7790_v28 = vadd.f32 %v7374_v44, %v4120_v49 }
 0x3ae   :  { %1551 = vst.msk [vmem:[#allocation2 + $0x190] sm:$0xff] %vm1499_vm15, %v1432_v21  ;;  %v5269_v34 = vpop.f32.mrf.mxu0  ;;  %v5313_v10 = vpop.f32.mrf.mxu1  ;;  %5437 = verf.f32 %v4368_v14  ;;  %v2057_v22 = vld [vmem:[#allocation2 + $0x180] sm:$0xff]  ;;  %v2516_v21 = vcombine.high %v2508_v48, %v2508_v48  ;;  %v4319_v14 = vmul.f32 0.5, %v7776_v6 }
 0x3af   :  { %1526 = vst.msk [vmem:[#allocation2 + $0xc8] sm:$0x3f] %vm1501_vm14, %v1382_v38  ;;  %v4369_v16 = vmul.f32 0.70710677, %v7787_v53  ;;  %v4347_v44 = vmul.f32 0.70710677, %v7790_v28  ;;  %v2913_v31 = vcombine.high %v2057_v22, %v2057_v22 }
 0x3b0   :  { %v7838_v6 = vcombine.low %v2516_v21, %v2515_v55 }
 0x3b1   :  { %v1606_v20 = vpop.permute.xlu1 %1605  ;;  %v1434_v47 = vpop.permute.xlu0 %1433  ;;  %5439 = verf.f32 %v4369_v16  ;;  %v7830_v16 = vcombine.low %v2500_v2, %v2508_v48 }
 0x3b2   :  { %1751 = vst.msk [vmem:[#allocation2 + $0xbf] sm:$0xfe] %vm1725_vm1, %v1606_v20  ;;  %5441 = verf.f32 %v4347_v44 }
 0x3b3   :  { %1552 = vst.msk [vmem:[#allocation2 + $0x198] sm:$0x3f] %vm1501_vm14, %v1434_v47 }
 0x3b5   :  { %v1658_v45 = vpop.permute.xlu1 %1657  ;;  %v1608_v3 = vpop.permute.xlu0 %1607 }
 0x3b6   :  { %1777 = vst.msk [vmem:[#allocation2 + $0x18f] sm:$0xfe] %vm1725_vm1, %v1658_v45  ;;  %v2058_v45 = vld [vmem:[#allocation2 + $0x188] sm:$0x3f] }
 0x3b7   :  { %1752 = vst.msk [vmem:[#allocation2 + $0xc7] sm:$0x7f] %vm8722_vm0, %v1608_v3  ;;  %v2927_v3 = vrot.slane %v2913_v31, %v6861_v61  ;;  %v2930_v44 = vcombine.high %v2058_v45, %v2058_v45 }
 0x3b9   :  { %v1832_v43 = vpop.permute.xlu1 %1831  ;;  %v1660_v15 = vpop.permute.xlu0 %1659  ;;  %v2929_v9 = vcombine.high %v2927_v3, %v2927_v3 }
 0x3ba   :  { %v5436_v40 = vpop.eup %5435  ;;  %1977 = vst.msk [vmem:[#allocation2 + $0xbe] sm:$0xfc] %vm1951_vm3, %v1832_v43  ;;  %v2920_v43 = vrot.slane %v2057_v22, %v6861_v61  ;;  %v4298_v22 = vmul.f32 0.5, %v7790_v28 }
 0x3bb   :  { %1778 = vst.msk [vmem:[#allocation2 + $0x197] sm:$0x7f] %vm8722_vm0, %v1660_v15  ;;  %v4444_v8 = vadd.f32 1.0, %v5436_v40  ;;  %v5438_v25 = vpop.eup %5437  ;;  %v3760_v31 = vcombine.low %v2927_v3, %v2929_v9 }
 0x3bc   :  { %v4466_v17 = vadd.f32 1.0, %v5438_v25 }
 0x3bd   :  { %v4493_v23 = vmul.f32 %v4444_v8, %v4297_v63  ;;  %v1884_v35 = vpop.permute.xlu1 %1883  ;;  %v1834_v54 = vpop.permute.xlu0 %1833  ;;  %v2937_v63 = vrot.slane %v2058_v45, %v6861_v61  ;;  %v7847_v8 = vld [vmem:[%s8715_s2] ss:$0 sm:$0xff]  ;;  %v3774_v45 = vrot.slane %v3760_v31, %v6861_v61 }
 0x3be   :  { %2003 = vst.msk [vmem:[#allocation2 + $0x18e] sm:$0xfc] %vm1951_vm3, %v1884_v35  ;;  %v7836_v40 = vmul.f32 %v4466_v17, %v4319_v14  ;;  %v5440_v51 = vpop.eup %5439  ;;  %v3393_v35 = vrot.slane %v7830_v16, %v6861_v61 }
 0x3bf   :  { %1978 = vst.msk [vmem:[#allocation2 + $0xc6] sm:$0xff] %vm8731_vm11, %v1834_v54  ;;  %v4611_v52 = vrot.slane %v4493_v23, 5  ;;  %v4613_v13 = vrot.slane %v4493_v23, 6  ;;  %v4615_v0 = vrot.slane %v4493_v23, 7  ;;  %v4625_v60 = vrot.slane %v4493_v23, 1  ;;  %v5442_v18 = vpop.eup %5441 }
 0x3c0   :  { %v2928_v54 = vcombine.high %v2920_v43, %v2920_v43  ;;  %v4880_v50 = vrot.slane %v7836_v40, 1  ;;  %v4884_v3 = vrot.slane %v7836_v40, 3 }
 0x3c1   :  { %v4612_v59 = vsel %vm4545_vm8, %v4611_v52, %v4610_v12  ;;  %v4622_v26 = vsel %vm4545_vm8, %v4613_v13, %v4621_v7  ;;  %v1206_v62 = vpop.permute.xlu1 %1205  ;;  %v1886_v32 = vpop.permute.xlu0 %1885  ;;  %v2944_v7 = vrot.slane %v2930_v44, %v6861_v61 }
 0x3c2   :  { %v4614_v37 = vsel %vm4548_vm9, %v4613_v13, %v4612_v59  ;;  %v4623_v24 = vsel %vm4548_vm9, %v4615_v0, %v4622_v26  ;;  %1323 = vst.msk [vmem:[#allocation2 + $0x19e] sm:$0xfc] %vm1269_vm13, %v1206_v62  ;;  %v4213_v36 = vpop.f32.mrf.mxu1  ;;  %v3400_v13 = vrot.slane %v7838_v6, %v6861_v61  ;;  %v2945_v59 = vcombine.high %v2937_v63, %v2937_v63 }
 0x3c3   :  { %2004 = vst.msk [vmem:[#allocation2 + $0x196] sm:$0xff] %vm8731_vm11, %v1886_v32  ;;  %v4616_v1 = vsel %vm8732_vm6, %v4615_v0, %v4614_v37  ;;  %v4624_v49 = vsel %vm8733_vm10, %v4493_v23, %v4623_v24  ;;  %v7850_v39 = vadd.f32 %v7847_v8, %v4213_v36  ;;  %v4320_v0 = vmul.f32 0.5, %v7787_v53 }
 0x3c4   :  { %v4617_v46 = vsel %vm4554_vm2, %v4493_v23, %v4616_v1  ;;  %v4626_v38 = vsel %vm4554_vm2, %v4625_v60, %v4624_v49  ;;  %v5316_v34 = vpop.f32.mrf.mxu1  ;;  %v4879_v26 = vsel %vm4536_vm5, %v7836_v40, 0.0  ;;  %v4467_v62 = vadd.f32 1.0, %v5440_v51 }
 0x3c5   :  { %v5134_v10 = vmax.f32 %v4617_v46, %v4626_v38  ;;  %v1154_v20 = vpop.permute.xlu1 %1153  ;;  %v1208_v47 = vpop.permute.xlu0 %1207  ;;  %v4370_v48 = vmul.f32 0.70710677, %v7850_v39  ;;  %v4882_v37 = vrot.slane %v7836_v40, 2  ;;  %v4445_v24 = vadd.f32 1.0, %v5442_v18 }
 0x3c6   :  { %1297 = vst.msk [vmem:[#allocation2 + $0xce] sm:$0xfc] %vm1269_vm13, %v1154_v20  ;;  %v4216_v41 = vpop.f32.mrf.mxu1  ;;  %v2033_v12 = vld [vmem:[#allocation2 + $0xc0] sm:$0xff]  ;;  %v3759_v36 = vcombine.low %v2920_v43, %v2928_v54  ;;  %v4892_v55 = vsel %vm4536_vm5, %v4880_v50, 0.0  ;;  %vm8734_vm11 = vcmask 1041409   ;;  %v3776_v38 = vcombine.low %v2937_v63, %v2945_v59 }
 0x3c7   :  { %1324 = vst.msk [vmem:[#allocation2 + $0x1a6] sm:$0xff] %vm1271_vm12, %v1208_v47  ;;  %v5160_v15 = vmax.f32 %v5133_v42, %v5134_v10  ;;  %v7853_v19 = vadd.f32 %v7847_v8, %v4216_v41  ;;  %5443 = verf.f32 %v4370_v48  ;;  %v2517_v49 = vcombine.high %v2033_v12, %v2033_v12  ;;  %vm8735_vm6 = vmmov %vm8734_vm11 }
 0x3c8   :  { %v4125_v29 = vpop.f32.mrf.mxu0  ;;  %v5317_v5 = vpop.f32.mrf.mxu1  ;;  %v4881_v17 = vsel %vm8734_vm11, %v4880_v50, %v4879_v26  ;;  %v2524_v46 = vrot.slane %v2033_v12, %v6861_v61  ;;  %v7884_v34 = vmul.f32 %v4467_v62, %v4320_v0  ;;  %v4893_v41 = vsel %vm8735_vm6, %v4882_v37, %v4892_v55 }
 0x3c9   :  { %5174 = vst [vmem:[%s8716_s3 + $0x8] sm:$0x7f] %v5160_v15  ;;  %v1436_v42 = vpop.permute.xlu1 %1435  ;;  %v1156_v33 = vpop.permute.xlu0 %1155  ;;  %v7862_v52 = vadd.f32 %v7847_v8, %v4125_v29  ;;  %v4371_v28 = vmul.f32 0.70710677, %v7853_v19  ;;  %v2531_v20 = vrot.slane %v2517_v49, %v6861_v61  ;;  %v7894_v43 = vmul.f32 %v4445_v24, %v4298_v22 }
 0x3ca   :  { %1553 = vst.msk [vmem:[#allocation2 + $0x1a0] sm:$0xff] %vm1499_vm15, %v1436_v42  ;;  %v5272_v23 = vpop.f32.mrf.mxu0  ;;  %v7875_v60 = vld [vmem:[#allocation2 + $0x190] sm:$0xff]  ;;  %v2532_v15 = vcombine.high %v2524_v46, %v2524_v46  ;;  %v4883_v29 = vsel %vm4542_vm7, %v4882_v37, %v4881_v17  ;;  %v3784_v9 = vrot.slane %v3776_v38, %v6861_v61  ;;  %v4886_v51 = vrot.slane %v7884_v34, 4 }
 0x3cb   :  { %1298 = vst.msk [vmem:[#allocation2 + $0xd6] sm:$0xff] %vm1271_vm12, %v1156_v33  ;;  %5445 = verf.f32 %v4371_v28  ;;  %v4348_v1 = vmul.f32 0.70710677, %v7862_v52  ;;  %v7889_v47 = vrot.slane %v7875_v60, %v6861_v61  ;;  %v2533_v5 = vcombine.high %v2531_v20, %v2531_v20 }
 0x3cc   :  { %v4128_v25 = vpop.f32.mrf.mxu0  ;;  %v3402_v42 = vcombine.low %v2524_v46, %v2532_v15  ;;  %v3767_v33 = vrot.slane %v3759_v36, %v6861_v61  ;;  %v4894_v23 = vsel %vm4542_vm7, %v4884_v3, %v4893_v41  ;;  %v4895_v0 = vrot.slane %v7836_v40, 4 }
 0x3cd   :  { %v1384_v32 = vpop.permute.xlu1 %1383  ;;  %v1438_v2 = vpop.permute.xlu0 %1437  ;;  %v7881_v21 = vadd.f32 %v7847_v8, %v4128_v25  ;;  %5447 = verf.f32 %v4348_v1  ;;  %v3777_v44 = vcombine.low %v2944_v7, %v7889_v47  ;;  %v3403_v54 = vcombine.low %v2531_v20, %v2533_v5 }
 0x3ce   :  { %1527 = vst.msk [vmem:[#allocation2 + $0xd0] sm:$0xff] %vm1499_vm15, %v1384_v32  ;;  %v5273_v53 = vpop.f32.mrf.mxu0  ;;  %v4628_v48 = vrot.slane %v7894_v43, 1  ;;  %v4885_v25 = vsel %vm4545_vm8, %v4884_v3, %v4883_v29  ;;  %v3775_v12 = vcombine.low %v3767_v33, %v3774_v45  ;;  %v4888_v7 = vrot.slane %v7884_v34, 5 }
 0x3cf   :  { %1554 = vst.msk [vmem:[#allocation2 + $0x1a8] sm:$0x3f] %vm1501_vm14, %v1438_v2  ;;  %v4349_v63 = vmul.f32 0.70710677, %v7881_v21  ;;  %v3791_v18 = vrot.slane %v3777_v44, %v6861_v61  ;;  %v3410_v59 = vrot.slane %v3402_v42, %v6861_v61  ;;  %v3417_v26 = vrot.slane %v3403_v54, %v6861_v61 }
 0x3d0   :  { %v4896_v28 = vsel %vm4545_vm8, %v4895_v0, %v4894_v23  ;;  %v3401_v40 = vcombine.low %v3393_v35, %v3400_v13  ;;  %v4630_v32 = vrot.slane %v7894_v43, 2  ;;  %v4887_v2 = vsel %vm4548_vm9, %v4886_v51, %v4885_v25 }
 0x3d1   :  { %v1662_v10 = vpop.permute.xlu1 %1661  ;;  %v1386_v14 = vpop.permute.xlu0 %1385  ;;  %v3792_v62 = vcombine.low %v3784_v9, %v3791_v18  ;;  %5449 = verf.f32 %v4349_v63  ;;  %v3418_v31 = vcombine.low %v3410_v59, %v3417_v26  ;;  %v4627_v36 = vsel %vm4536_vm5, %v7894_v43, 0.0 }
 0x3d2   :  { %1779 = vst.msk [vmem:[#allocation2 + $0x19f] sm:$0xfe] %vm1725_vm1, %v1662_v10  ;;  %v4640_v55 = vsel %vm4536_vm5, %v4628_v48, 0.0  ;;  %v4890_v1 = vrot.slane %v7884_v34, 6  ;;  %v4899_v6 = vrot.slane %v7884_v34, 7  ;;  %v4897_v35 = vsel %vm4548_vm9, %v4888_v7, %v4896_v28 }
 0x3d3   :  { %1528 = vst.msk [vmem:[#allocation2 + $0xd8] sm:$0x3f] %vm1501_vm14, %v1386_v14  ;;  %v3948_v37 = vpack.c.bf16 %v3792_v62, %v3775_v12  ;;  %v3937_v13 = vpack.c.bf16 %v3418_v31, %v3401_v40  ;;  %v2946_v49 = vcombine.high %v7875_v60, %v7875_v60  ;;  %v4632_v46 = vrot.slane %v7894_v43, 3  ;;  %v2060_v14 = vld [vmem:[#allocation2 + $0x198] sm:$0x3f] }
 0x3d4   :  { %v5444_v16 = vpop.eup %5443  ;;  %v4889_v38 = vsel %vm8733_vm10, %v4888_v7, %v4887_v2  ;;  %v4321_v34 = vmul.f32 0.5, %v7850_v39  ;;  %vm8736_vm11 = vmmov 0   ;;  %v7940_v20 = vsel %vm8735_vm6, %v4628_v48, %v4627_v36 }
 0x3d5   :  { %v1610_v50 = vpop.permute.xlu1 %1609  ;;  %v1664_v22 = vpop.permute.xlu0 %1663  ;;  %5339 = vmatmul.mubr.msk.bf16.gmra.mxu1 %vm3979_vm4, %v3948_v37  ;;  %v4468_v10 = vadd.f32 1.0, %v5444_v16  ;;  %v4322_v60 = vmul.f32 0.5, %v7853_v19  ;;  %5295 = vmatmul.mubr.msk.bf16.gmra.mxu0 %vm3979_vm4, %v3937_v13  ;;  %v4898_v15 = vsel %vm8733_vm10, %v4890_v1, %v4897_v35  ;;  %v4901_v29 = vsel %vm4536_vm5, %v4890_v1, 0.0  ;;  %v7956_v19 = vld [vmem:[#allocation2 + $0xc8] sm:$0x3f] }
 0x3d6   :  { %1753 = vst.msk [vmem:[#allocation2 + $0xcf] sm:$0xfe] %vm1725_vm1, %v1610_v50  ;;  %5342 = vmatprep.mubr.msk.bf16.mxu1 %vm8736_vm11, %v5533_v4  ;;  %v4913_v5 = vsel %vm4536_vm5, %v4899_v6, 0.0  ;;  %5298 = vmatprep.mubr.msk.bf16.mxu0 %vm8736_vm11, %v5533_v4  ;;  %v7959_v42 = vsel %vm4554_vm2, %v4890_v1, %v4889_v38  ;;  %v7964_v9 = vrot.slane %v2946_v49, %v6861_v61  ;;  %v4299_v35 = vmul.f32 0.5, %v7862_v52 }
 0x3d7   :  { %1780 = vst.msk [vmem:[#allocation2 + $0x1a7] sm:$0x7f] %vm8722_vm0, %v1664_v22  ;;  %v4517_v44 = vmul.f32 %v4468_v10, %v4321_v34  ;;  %v2963_v51 = vcombine.high %v2060_v14, %v2060_v14  ;;  %v2970_v59 = vrot.slane %v2060_v14, %v6861_v61  ;;  %v2541_v26 = vrot.slane %v7956_v19, %v6861_v61 }
 0x3d8   :  { %v5446_v17 = vpop.eup %5445  ;;  %v2962_v36 = vcombine.high %v7964_v9, %v7964_v9 }
 0x3d9   :  { %v1888_v24 = vpop.permute.xlu1 %1887  ;;  %v1612_v53 = vpop.permute.xlu0 %1611  ;;  %v4469_v3 = vadd.f32 1.0, %v5446_v17  ;;  %v4902_v54 = vrot.slane %v4517_v44, 7  ;;  %v4905_v18 = vrot.slane %v4517_v44, 1  ;;  %v4907_v50 = vrot.slane %v4517_v44, 2 }
 0x3da   :  { %2005 = vst.msk [vmem:[#allocation2 + $0x19e] sm:$0xfc] %vm1951_vm3, %v1888_v24  ;;  %v5448_v23 = vpop.eup %5447  ;;  %v4917_v48 = vrot.slane %v4517_v44, 3 }
 0x3db   :  { %1754 = vst.msk [vmem:[#allocation2 + $0xd7] sm:$0x7f] %vm8722_vm0, %v1612_v53  ;;  %vm8737_vm0 = vmmov %vm8735_vm6  ;;  %vm8738_vm6 = vcmask 294144   ;;  %v7961_v33 = vmul.f32 %v4469_v3, %v4322_v60  ;;  %v4446_v53 = vadd.f32 1.0, %v5448_v23  ;;  %v2961_v60 = vcombine.high %v7889_v47, %v7889_v47 }
 0x3dc   :  { %v7945_v45 = vsel %vm8737_vm0, %v4630_v32, %v4640_v55  ;;  %v4914_v22 = vsel %vm8737_vm0, %v4517_v44, %v4913_v5  ;;  %vm8739_vm10 = vmmov %vm8737_vm0  ;;  %v4900_v55 = vsel %vm4554_vm2, %v4899_v6, %v4898_v15  ;;  %v2977_v6 = vrot.slane %v2963_v51, %v6861_v61 }
 0x3dd   :  { %v1836_v41 = vpop.permute.xlu1 %1835  ;;  %v1890_v39 = vpop.permute.xlu0 %1889  ;;  %v7968_v25 = vrot.slane %v7961_v33, 4  ;;  %v4903_v62 = vsel %vm8739_vm10, %v4902_v54, %v4901_v29  ;;  %v4909_v28 = vrot.slane %v7961_v33, 3  ;;  %v4915_v40 = vsel %vm4542_vm7, %v4905_v18, %v4914_v22 }
 0x3de   :  { %1979 = vst.msk [vmem:[#allocation2 + $0xce] sm:$0xfc] %vm1951_vm3, %v1836_v41  ;;  %v4221_v63 = vpop.f32.mrf.mxu1  ;;  %v7977_v2 = vrot.slane %v7961_v33, 5  ;;  %v4904_v37 = vsel %vm4542_vm7, %v4517_v44, %v4903_v62  ;;  %v4916_v24 = vsel %vm4545_vm8, %v4907_v50, %v4915_v40  ;;  %v5450_v17 = vpop.eup %5449  ;;  %v2978_v15 = vcombine.high %v2970_v59, %v2970_v59 }
 0x3df   :  { %2006 = vst.msk [vmem:[#allocation2 + $0x1a6] sm:$0xff] %vm8738_vm6, %v1890_v39  ;;  %v4906_v1 = vsel %vm4545_vm8, %v4905_v18, %v4904_v37  ;;  %v4918_v16 = vsel %vm4548_vm9, %v4917_v48, %v4916_v24  ;;  %v7999_v41 = vadd.f32 %v7847_v8, %v4221_v63  ;;  %v8004_v5 = vmul.f32 %v4446_v53, %v4299_v35  ;;  %v8010_v63 = vld.sshfl [vmem:[#allocation2 + $0xe8] sm:$0x3f pattern:$0x76325410] }
 0x3e0   :  { %v5320_v0 = vpop.f32.mrf.mxu1  ;;  %v4908_v38 = vsel %vm4548_vm9, %v4907_v50, %v4906_v1  ;;  %v3794_v47 = vcombine.low %v2962_v36, %v2970_v59  ;;  %v2549_v44 = vcombine.high %v2541_v26, %v2541_v26  ;;  %v5147_v51 = vmax.f32 %v7959_v42, %v4900_v55 }
 0x3e1   :  { %v1210_v12 = vpop.permute.xlu1 %1209  ;;  %v1838_v7 = vpop.permute.xlu0 %1837  ;;  %v4447_v54 = vadd.f32 1.0, %v5450_v17  ;;  %v4643_v50 = vrot.slane %v7894_v43, 4  ;;  %v4631_v22 = vsel %vm4542_vm7, %v4630_v32, %v7940_v20  ;;  %v4642_v0 = vsel %vm4542_vm7, %v4632_v46, %v7945_v45 }
 0x3e2   :  { %1325 = vst.msk [vmem:[#allocation2 + $0x1ae] sm:$0xfc] %vm1269_vm13, %v1210_v12  ;;  %v4224_v31 = vpop.f32.mrf.mxu1  ;;  %vm8740_vm13 = vcmask 1045509   ;;  %v2534_v12 = vcombine.high %v7956_v19, %v7956_v19  ;;  %v4300_v59 = vmul.f32 0.5, %v7881_v21  ;;  %v4372_v62 = vmul.f32 0.70710677, %v7999_v41 }
 0x3e3   :  { %1980 = vst.msk [vmem:[#allocation2 + $0xd6] sm:$0xff] %vm8738_vm6, %v1838_v7  ;;  %v4919_v34 = vsel %vm8740_vm13, %v7968_v25, %v4918_v16  ;;  %vm8741_vm0 = vmmov %vm8740_vm13  ;;  %v4647_v45 = vrot.slane %v8004_v5, 7  ;;  %v3808_v40 = vrot.slane %v3794_v47, %v6861_v61  ;;  %v3810_v37 = vcombine.low %v2978_v15, %v2977_v6 }
 0x3e4   :  { %v4133_v13 = vpop.f32.mrf.mxu0  ;;  %v5321_v49 = vpop.f32.mrf.mxu1  ;;  %v4910_v3 = vsel %vm8741_vm0, %v4909_v28, %v4908_v38  ;;  %v4921_v52 = vsel %vm4554_vm2, %v7977_v2, %v4919_v34  ;;  %v3793_v28 = vcombine.low %v2961_v60, %v7964_v9  ;;  %v8032_v19 = vcombine.low %v2541_v26, %v2549_v44 }
 0x3e5   :  { %v1440_v10 = vpop.permute.xlu1 %1439  ;;  %v1212_v14 = vpop.permute.xlu0 %1211  ;;  %v4912_v29 = vsel %vm4554_vm2, %v7968_v25, %v4910_v3  ;;  %v8037_v21 = vmul.f32 %v4447_v54, %v4300_v59  ;;  %5451 = verf.f32 %v4372_v62  ;;  %v8040_v24 = vadd.f32 %v7847_v8, %v4224_v31 }
 0x3e6   :  { %1326 = vst.msk [vmem:[#allocation2 + $0x1b6] sm:$0xff] %vm1271_vm12, %v1212_v14  ;;  %v5276_v39 = vpop.f32.mrf.mxu0  ;;  %v5148_v23 = vmax.f32 %v4912_v29, %v4921_v52  ;;  %v8027_v20 = vld [vmem:[#allocation2 + $0x1a0] sm:$0xff]  ;;  %v8043_v53 = vadd.f32 %v7847_v8, %v4133_v13  ;;  %v4633_v9 = vsel %vm4545_vm8, %v4632_v46, %v4631_v22  ;;  %v4644_v26 = vsel %vm4545_vm8, %v4643_v50, %v4642_v0 }
 0x3e7   :  { %1555 = vst.msk [vmem:[#allocation2 + $0x1b0] sm:$0xff] %vm1499_vm15, %v1440_v10  ;;  %v2986_v1 = vrot.slane %v8027_v20, %v6861_v61  ;;  %v2548_v16 = vrot.slane %v2534_v12, %v6861_v61  ;;  %v4634_v35 = vrot.slane %v8004_v5, 4  ;;  %v4636_v31 = vrot.slane %v8004_v5, 5  ;;  %vm8744_vm15 = vmmov %vm8739_vm10 }
 0x3e8   :  { %v8008_v18 = vpop.f32.mrf.mxu0  ;;  %v5167_v7 = vmax.f32 %v5147_v51, %v5148_v23  ;;  %v4373_v13 = vmul.f32 0.70710677, %v8040_v24  ;;  %vm8742_vm12 = vcmask 260320   ;;  %v3801_v43 = vrot.slane %v3793_v28, %v6861_v61 }
 0x3e9   :  { %v1666_v48 = vpop.permute.xlu1 %1665  ;;  %v1442_v42 = vpop.permute.xlu0 %1441  ;;  %v4638_v49 = vrot.slane %v8004_v5, 6  ;;  %v4350_v17 = vmul.f32 0.70710677, %v8043_v53  ;;  %v3818_v38 = vrot.slane %v3810_v37, %v6861_v61  ;;  %v3427_v34 = vrot.slane %v8032_v19, %v6861_v61 }
 0x3ea   :  { %1781 = vst.msk [vmem:[#allocation2 + $0x1af] sm:$0xfe] %vm1725_vm1, %v1666_v48  ;;  %v5277_v32 = vpop.f32.mrf.mxu0  ;;  %5181 = vst [vmem:[%s8716_s3 + $0x40] sm:$0x7f] %v5167_v7  ;;  %v2035_v46 = vld [vmem:[#allocation2 + $0xd0] sm:$0xff]  ;;  %v4661_v10 = vsel %vm4536_vm5, %v4647_v45, 0.0  ;;  %5453 = verf.f32 %v4373_v13  ;;  %v3809_v60 = vcombine.low %v3801_v43, %v3808_v40  ;;  %v2994_v52 = vcombine.high %v2986_v1, %v2986_v1 }
 0x3eb   :  { %1556 = vst.msk [vmem:[#allocation2 + $0x1b8] sm:$0x3f] %vm1501_vm14, %v1442_v42  ;;  %v4650_v14 = vrot.slane %v8037_v21, 7  ;;  %5455 = verf.f32 %v4350_v17  ;;  %v2550_v39 = vcombine.high %v2035_v46, %v2035_v46  ;;  %v2557_v15 = vrot.slane %v2035_v46, %v6861_v61  ;;  %vm8743_vm14 = vmmov %vm8738_vm6  ;;  %v8078_v50 = vld [vmem:[#allocation2 + $0xd8] sm:$0x3f] }
 0x3ec   :  { %v8070_v29 = vsel %vm4536_vm5, %v7968_v25, 0.0  ;;  %v4934_v47 = vrot.slane %v7961_v33, 6  ;;  %v4635_v44 = vsel %vm4548_vm9, %v4634_v35, %v4633_v9  ;;  %v4645_v51 = vsel %vm4548_vm9, %v4636_v31, %v4644_v26  ;;  %vm8745_vm1 = vmmov %vm8739_vm10 }
 0x3ed   :  { %v1892_v36 = vpop.permute.xlu1 %1891  ;;  %v1668_v55 = vpop.permute.xlu0 %1667  ;;  %v4649_v23 = vsel %vm4536_vm5, %v4638_v49, 0.0  ;;  %v3811_v54 = vcombine.low %v2986_v1, %v2994_v52  ;;  %v2564_v22 = vrot.slane %v2550_v39, %v6861_v61  ;;  %v2565_v0 = vcombine.high %v2557_v15, %v2557_v15  ;;  %vm8747_vm10 = vmmov %vm8741_vm0  ;;  %v2062_v52 = vld [vmem:[#allocation2 + $0x1a8] sm:$0x3f] }
 0x3ee   :  { %2007 = vst.msk [vmem:[#allocation2 + $0x1ae] sm:$0xfc] %vm1951_vm3, %v1892_v36  ;;  %v4651_v25 = vsel %vm8744_vm15, %v4650_v14, %v4649_v23  ;;  %v4653_v48 = vrot.slane %v8037_v21, 1  ;;  %v4662_v42 = vsel %vm8745_vm1, %v8037_v21, %v4661_v10  ;;  %v8087_v12 = vadd.f32 %v7847_v8, %v8008_v18  ;;  %vm8748_vm6 = vmmov %vm8745_vm1 }
 0x3ef   :  { %1782 = vst.msk [vmem:[#allocation2 + $0x1b7] sm:$0x7f] %vm8742_vm12, %v1668_v55  ;;  %v3825_v59 = vrot.slane %v3811_v54, %v6861_v61  ;;  %v2566_v32 = vcombine.high %v2564_v22, %v2564_v22  ;;  %v3420_v28 = vcombine.low %v2548_v16, %v2557_v15  ;;  %v8096_v9 = vrot.slane %v8078_v50, %v6861_v61  ;;  %vm8749_vm13 = vmmov %vm8745_vm1 }
 0x3f0   :  { %v3436_v26 = vcombine.low %v2565_v0, %v2564_v22  ;;  %v2979_v18 = vcombine.high %v8027_v20, %v8027_v20  ;;  %v4646_v36 = vsel %vm8747_vm10, %v4638_v49, %v4645_v51  ;;  %v4323_v55 = vmul.f32 0.5, %v7999_v41  ;;  %vm8750_vm12 = vmmov %vm8741_vm0 }
 0x3f1   :  { %v1840_v6 = vpop.permute.xlu1 %1839  ;;  %v1894_v3 = vpop.permute.xlu0 %1893  ;;  %v3826_v1 = vcombine.low %v3818_v38, %v3825_v59  ;;  %v4652_v16 = vsel %vm4542_vm7, %v8037_v21, %v4651_v25  ;;  %v4663_v13 = vsel %vm4542_vm7, %v4653_v48, %v4662_v42  ;;  %v3437_v43 = vcombine.low %v2566_v32, %v8096_v9  ;;  %vm8752_vm15 = vmmov %vm8745_vm1 }
 0x3f2   :  { %1981 = vst.msk [vmem:[#allocation2 + $0xde] sm:$0xfc] %vm1951_vm3, %v1840_v6  ;;  %vm8746_vm3 = vmmov %vm8741_vm0  ;;  %v5452_v17 = vpop.eup %5451  ;;  %v4351_v20 = vmul.f32 0.70710677, %v8087_v12  ;;  %v3434_v41 = vrot.slane %v3420_v28, %v6861_v61  ;;  %v3444_v14 = vrot.slane %v3436_v26, %v6861_v61  ;;  %v2993_v39 = vrot.slane %v2979_v18, %v6861_v61 }
 0x3f3   :  { %2008 = vst.msk [vmem:[#allocation2 + $0x1b6] sm:$0xff] %vm8743_vm14, %v1894_v3  ;;  %v4637_v40 = vsel %vm8746_vm3, %v4636_v31, %v4635_v44  ;;  %v4655_v31 = vrot.slane %v8037_v21, 2  ;;  %v3949_v10 = vpack.c.bf16 %v3826_v1, %v3809_v60  ;;  %v4470_v38 = vadd.f32 1.0, %v5452_v17  ;;  %vm8751_vm14 = vmmov %vm8745_vm1 }
 0x3f4   :  { %v4229_v7 = vpop.f32.mrf.mxu1  ;;  %v3451_v6 = vrot.slane %v3437_v43, %v6861_v61  ;;  %v4933_v15 = vsel %vm4536_vm5, %v7977_v2, 0.0  ;;  %v8118_v44 = vsel %vm4554_vm2, %v4638_v49, %v4637_v40  ;;  %v8123_v60 = vsel %vm4554_vm2, %v4647_v45, %v4646_v36  ;;  %vm8753_vm1 = vmmov %vm8741_vm0 }
 0x3f5   :  { %v8091_v62 = vadd.f32 %v7847_v8, %v4229_v7  ;;  %v4324_v51 = vmul.f32 0.5, %v8040_v24  ;;  %5343 = vmatmul.mubr.msk.bf16.gmra.mxu1 %vm3979_vm4, %v3949_v10  ;;  %v8127_v23 = vmul.f32 %v4470_v38, %v4323_v55  ;;  %v4301_v54 = vmul.f32 0.5, %v8043_v53  ;;  %vm8754_vm3 = vmmov %vm8741_vm0 }
 0x3f6   :  { %v5324_v37 = vpop.f32.mrf.mxu1  ;;  %v4654_v22 = vsel %vm4545_vm8, %v4653_v48, %v4652_v16  ;;  %v3452_v0 = vcombine.low %v3444_v14, %v3451_v6  ;;  %5346 = vmatprep.mubr.msk.bf16.mxu1 %vm8736_vm11, %v5533_v4  ;;  %v4664_v5 = vsel %vm4545_vm8, %v4655_v31, %v4663_v13  ;;  %v3435_v45 = vcombine.low %v3427_v34, %v3434_v41  ;;  %vm8755_vm10 = vmmov %vm8741_vm0 }
 0x3f7   :  { %v4374_v35 = vmul.f32 0.70710677, %v8091_v62  ;;  %v5454_v49 = vpop.eup %5453  ;;  %v3003_v24 = vrot.slane %v2062_v52, %v6861_v61  ;;  %v4924_v42 = vrot.slane %v8127_v23, 6  ;;  %v2995_v53 = vcombine.high %v2993_v39, %v2993_v39 }
 0x3f8   :  { %v8108_v46 = vpop.f32.mrf.mxu1  ;;  %v5456_v25 = vpop.eup %5455  ;;  %v2996_v7 = vcombine.high %v2062_v52, %v2062_v52  ;;  %v2567_v48 = vcombine.high %v8078_v50, %v8078_v50  ;;  %v4926_v59 = vrot.slane %v8127_v23, 7  ;;  %v4471_v32 = vadd.f32 1.0, %v5454_v49 }
 0x3f9   :  { %5457 = verf.f32 %v4374_v35  ;;  %v4448_v28 = vadd.f32 1.0, %v5456_v25  ;;  %v3938_v40 = vpack.c.bf16 %v3452_v0, %v3435_v45  ;;  %v4923_v19 = vsel %vm8748_vm6, %v7977_v2, %v8070_v29  ;;  %vm8756_vm6 = vmmov %vm8741_vm0 }
 0x3fa   :  { %v5325_v3 = vpop.f32.mrf.mxu1  ;;  %5459 = verf.f32 %v4351_v20  ;;  %v4935_v34 = vsel %vm8749_vm13, %v4934_v47, %v4933_v15  ;;  %v4665_v37 = vrot.slane %v8037_v21, 3  ;;  %v2615_v18 = vcombine.high %v8010_v63, %v8010_v63  ;;  %v2063_v1 = vld [vmem:[#allocation2 + $0x1b0] sm:$0xff] }
 0x3fb   :  { %v5135_v50 = vmax.f32 %v8118_v44, %v8123_v60  ;;  %v8153_v36 = vmul.f32 %v4471_v32, %v4324_v51  ;;  %v8155_v55 = vmul.f32 %v4448_v28, %v4301_v54  ;;  %5299 = vmatmul.mubr.msk.bf16.gmra.mxu0 %vm3979_vm4, %v3938_v40  ;;  %v3011_v2 = vcombine.high %v3003_v24, %v3003_v24 }
 0x3fc   :  { %v4656_v33 = vsel %vm4548_vm9, %v4655_v31, %v4654_v22  ;;  %v4666_v29 = vsel %vm4548_vm9, %v4665_v37, %v4664_v5  ;;  %v8161_v21 = vmul.f32 0.5, %v8087_v12  ;;  %v8163_v35 = vcombine.low %v2993_v39, %v2995_v53  ;;  %5302 = vmatprep.mubr.msk.bf16.mxu0 %vm8736_vm11, %v5533_v4 }
 0x3fd   :  { %v4936_v16 = vsel %vm4542_vm7, %v4926_v59, %v4935_v34  ;;  %v4925_v13 = vsel %vm4542_vm7, %v4924_v42, %v4923_v19  ;;  %v8170_v43 = vrot.slane %v2996_v7, %v6861_v61  ;;  %v8173_v31 = vrot.slane %v2567_v48, %v6861_v61 }
 0x3fe   :  { %v4931_v12 = vrot.slane %v8153_v36, 2  ;;  %v4941_v17 = vrot.slane %v8153_v36, 3  ;;  %v4657_v20 = vrot.slane %v8155_v55, 3  ;;  %v8179_v10 = vrot.slane %v8155_v55, 4 }
 0x3ff   :  { %v4325_v38 = vmul.f32 0.5, %v8091_v62  ;;  %v3012_v14 = vcombine.high %v2063_v1, %v2063_v1  ;;  %v8183_v6 = vrot.slane %v2063_v1, %v6861_v61  ;;  %v8185_v3 = vcombine.low %v3003_v24, %v3011_v2 }
 0x400   :  { %v4141_v26 = vpop.f32.mrf.mxu0  ;;  %v4937_v39 = vsel %vm4545_vm8, %v8127_v23, %v4936_v16  ;;  %v4927_v15 = vsel %vm4545_vm8, %v4926_v59, %v4925_v13  ;;  %v4658_v44 = vsel %vm8741_vm0, %v4657_v20, %v4656_v33  ;;  %v3835_v51 = vrot.slane %v8163_v35, %v6861_v61  ;;  %vm8757_vm0 = vmmov %vm8749_vm13 }
 0x401   :  { %v4929_v62 = vrot.slane %v8127_v23, 1  ;;  %v4945_v54 = vrot.slane %v8153_v36, 4  ;;  %v4667_v22 = vsel %vm8750_vm12, %v8179_v10, %v4666_v29  ;;  %v8198_v0 = vadd.f32 %v7847_v8, %v4141_v26  ;;  %vm8759_vm12 = vmmov %vm8757_vm0 }
 0x402   :  { %v5280_v47 = vpop.f32.mrf.mxu0  ;;  %v4943_v49 = vsel %vm4536_vm5, %v4931_v12, 0.0  ;;  %v4954_v5 = vsel %vm4536_vm5, %v4941_v17, 0.0  ;;  %v4660_v45 = vsel %vm4554_vm2, %v8179_v10, %v4658_v44  ;;  %v8205_v24 = vrot.slane %v8155_v55, 5 }
 0x403   :  { %v4928_v25 = vsel %vm4548_vm9, %v8127_v23, %v4927_v15  ;;  %v4938_v42 = vsel %vm4548_vm9, %v4929_v62, %v4937_v39  ;;  %v8211_v7 = vrot.slane %v3012_v14, %v6861_v61  ;;  %v4939_v59 = vrot.slane %v8127_v23, 2  ;;  %v2037_v14 = vld [vmem:[#allocation2 + $0xe0] sm:$0xff] }
 0x404   :  { %v4144_v41 = vpop.f32.mrf.mxu0  ;;  %v4669_v32 = vsel %vm4554_vm2, %v8205_v24, %v4667_v22  ;;  %v3027_v28 = vcombine.high %v8183_v6, %v8183_v6  ;;  %v3844_v40 = vcombine.low %v8170_v43, %v8183_v6  ;;  %v4944_v19 = vsel %vm8751_vm14, %v4941_v17, %v4943_v49  ;;  %vm8761_vm14 = vmmov %vm8753_vm1 }
 0x405   :  { %v4955_v34 = vsel %vm8752_vm15, %v4945_v54, %v4954_v5  ;;  %v5136_v37 = vmax.f32 %v4660_v45, %v4669_v32  ;;  %v4930_v2 = vsel %vm8753_vm1, %v4929_v62, %v4928_v25  ;;  %v4940_v33 = vsel %vm8754_vm3, %v4939_v59, %v4938_v42  ;;  %vm8762_vm15 = vmmov %vm8753_vm1 }
 0x406   :  { %v5458_v52 = vpop.eup %5457  ;;  %v5281_v60 = vpop.f32.mrf.mxu0  ;;  %v4956_v23 = vrot.slane %v8153_v36, 5  ;;  %v4352_v29 = vmul.f32 0.70710677, %v8198_v0  ;;  %v4946_v13 = vsel %vm4542_vm7, %v4945_v54, %v4944_v19  ;;  %v4942_v6 = vsel %vm4554_vm2, %v4941_v17, %v4940_v33  ;;  %vm8763_vm3 = vmmov %vm8757_vm0 }
 0x407   :  { %v4472_v53 = vadd.f32 1.0, %v5458_v52  ;;  %v5460_v48 = vpop.eup %5459  ;;  %v5161_v47 = vmax.f32 %v5135_v50, %v5136_v37  ;;  %v8238_v44 = vadd.f32 %v7847_v8, %v4144_v41  ;;  %v3845_v62 = vcombine.low %v3027_v28, %v8211_v7 }
 0x408   :  { %v4449_v1 = vadd.f32 1.0, %v5460_v48  ;;  %v4957_v43 = vsel %vm4542_vm7, %v4956_v23, %v4955_v34  ;;  %5461 = verf.f32 %v4352_v29  ;;  %v2583_v54 = vcombine.high %v2037_v14, %v2037_v14  ;;  %v2064_v48 = vld [vmem:[#allocation2 + $0x1b8] sm:$0x3f] }
 0x409   :  { %v4521_v26 = vmul.f32 %v4472_v53, %v4325_v38  ;;  %v4932_v38 = vsel %vm4554_vm2, %v4931_v12, %v4930_v2  ;;  %5175 = vst [vmem:[%s8716_s3 + $0x10] sm:$0x7f] %v5161_v47  ;;  %v3842_v5 = vrot.slane %v8185_v3, %v6861_v61  ;;  %v2582_v41 = vcombine.high %v8096_v9, %v8096_v9 }
 0x40a   :  { %v5149_v25 = vmax.f32 %v4932_v38, %v4942_v6  ;;  %v3471_v53 = vcombine.low %v8010_v63, %v2615_v18  ;;  %v8256_v59 = vmul.f32 %v4449_v1, %v8161_v21  ;;  %v4353_v32 = vmul.f32 0.70710677, %v8238_v44 }
 0x40b   :  { %v4947_v35 = vrot.slane %v4521_v26, 5  ;;  %v4949_v16 = vrot.slane %v4521_v26, 6  ;;  %v4951_v20 = vrot.slane %v4521_v26, 7  ;;  %v4961_v15 = vrot.slane %v4521_v26, 1 }
 0x40c   :  { %v3843_v28 = vcombine.low %v3835_v51, %v3842_v5  ;;  %v3852_v3 = vrot.slane %v3844_v40, %v6861_v61  ;;  %v3859_v34 = vrot.slane %v3845_v62, %v6861_v61  ;;  %v2590_v37 = vrot.slane %v2037_v14, %v6861_v61 }
 0x40d   :  { %v4948_v50 = vsel %vm4545_vm8, %v4947_v35, %v4946_v13  ;;  %v4958_v36 = vsel %vm4545_vm8, %v4949_v16, %v4957_v43  ;;  %5463 = verf.f32 %v4353_v32  ;;  %v3453_v63 = vcombine.low %v2582_v41, %v8173_v31 }
 0x40e   :  { %v4950_v52 = vsel %vm4548_vm9, %v4949_v16, %v4948_v50  ;;  %v4959_v39 = vsel %vm4548_vm9, %v4951_v20, %v4958_v36  ;;  %v3028_v18 = vcombine.high %v8211_v7, %v8211_v7  ;;  %v3029_v21 = vcombine.high %v2064_v48, %v2064_v48 }
 0x40f   :  { %v4952_v12 = vsel %vm8755_vm10, %v4951_v20, %v4950_v52  ;;  %v4960_v17 = vsel %vm8756_vm6, %v4521_v26, %v4959_v39  ;;  %v3860_v51 = vcombine.low %v3852_v3, %v3859_v34  ;;  %v2598_v40 = vcombine.high %v2590_v37, %v2590_v37  ;;  %vm8764_vm10 = vmmov %vm8757_vm0 }
 0x410   :  { %v8240_v60 = vpop.f32.mrf.mxu1  ;;  %v4953_v22 = vsel %vm4554_vm2, %v4521_v26, %v4952_v12  ;;  %v4962_v49 = vsel %vm4554_vm2, %v4961_v15, %v4960_v17  ;;  %v2597_v26 = vrot.slane %v2583_v54, %v6861_v61  ;;  %v3036_v23 = vrot.slane %v2064_v48, %v6861_v61  ;;  %vm8765_vm6 = vmmov %vm8757_vm0 }
 0x411   :  { %v5150_v42 = vmax.f32 %v4953_v22, %v4962_v49  ;;  %v4670_v29 = vsel %vm4536_vm5, %v8179_v10, 0.0  ;;  %v3485_v47 = vrot.slane %v3471_v53, %v6861_v61  ;;  %v3043_v31 = vrot.slane %v3029_v21, %v6861_v61 }
 0x412   :  { %v5328_v45 = vpop.f32.mrf.mxu1  ;;  %v2599_v33 = vcombine.high %v2597_v26, %v2597_v26  ;;  %v3950_v1 = vpack.c.bf16 %v3860_v51, %v3843_v28  ;;  %v3454_v7 = vcombine.low %v2590_v37, %v2598_v40  ;;  %v3044_v16 = vcombine.high %v3036_v23, %v3036_v23 }
 0x413   :  { %v5168_v9 = vmax.f32 %v5149_v25, %v5150_v42  ;;  %v4681_v13 = vsel %vm4536_vm5, %v8205_v24, 0.0  ;;  %v4682_v43 = vrot.slane %v8155_v55, 6  ;;  %v4674_v20 = vrot.slane %v8256_v59, 7 }
 0x414   :  { %v8260_v19 = vpop.f32.mrf.mxu1  ;;  %v3470_v35 = vcombine.low %v2597_v26, %v2599_v33  ;;  %v3861_v14 = vcombine.low %v3028_v18, %v3036_v23  ;;  %5347 = vmatmul.mubr.msk.bf16.gmra.mxu1 %vm3979_vm4, %v3950_v1  ;;  %v3461_v10 = vrot.slane %v3453_v63, %v6861_v61  ;;  %v3468_v6 = vrot.slane %v3454_v7, %v6861_v61 }
 0x415   :  { %5182 = vst [vmem:[%s8716_s3 + $0x48] sm:$0x7f] %v5168_v9  ;;  %v5462_v38 = vpop.eup %5461  ;;  %v3862_v36 = vcombine.low %v3044_v16, %v3043_v31  ;;  %v4672_v52 = vrot.slane %v8256_v59, 6  ;;  %v4303_v39 = vmul.f32 0.5, %v8198_v0  ;;  %5350 = vmatprep.mubr.msk.bf16.mxu1 %vm8736_vm11, %v5533_v4  ;;  %v8291_v12 = vadd.f32 %v7847_v8, %v8108_v46  ;;  %vm8758_vm11 = vmmov %vm8757_vm0 }
 0x416   :  { %v5329_v2 = vpop.f32.mrf.mxu1  ;;  %v3478_v50 = vrot.slane %v3470_v35, %v6861_v61  ;;  %v4450_v15 = vadd.f32 1.0, %v5462_v38  ;;  %v3869_v55 = vrot.slane %v3861_v14, %v6861_v61  ;;  %v3469_v17 = vcombine.low %v3461_v10, %v3468_v6 }
 0x417   :  { %v3876_v54 = vrot.slane %v3862_v36, %v6861_v61  ;;  %v4683_v22 = vsel %vm8749_vm13, %v4682_v43, %v4681_v13  ;;  %v4671_v0 = vsel %vm8757_vm0, %v8205_v24, %v4670_v29  ;;  %v4375_v53 = vmul.f32 0.70710677, %v8291_v12  ;;  %vm8766_vm13 = vmmov %vm8757_vm0 }
 0x418   :  { %v3486_v62 = vcombine.low %v3478_v50, %v3485_v47  ;;  %v4499_v49 = vmul.f32 %v4450_v15, %v4303_v39  ;;  %v4684_v5 = vsel %vm4542_vm7, %v4674_v20, %v4683_v22  ;;  %v4673_v45 = vsel %vm4542_vm7, %v4672_v52, %v4671_v0  ;;  %vm8767_vm0 = vmmov %vm8753_vm1 }
 0x419   :  { %v3877_v4 = vcombine.low %v3869_v55, %v3876_v54  ;;  %v4238_v24 = vadd.f32 %v7847_v8, %v8240_v60  ;;  %v4677_v3 = vrot.slane %v8256_v59, 1  ;;  %v4685_v9 = vsel %vm4545_vm8, %v8256_v59, %v4684_v5 }
 0x41a   :  { %v3939_v41 = vpack.c.bf16 %v3486_v62, %v3469_v17  ;;  %v4679_v25 = vrot.slane %v4499_v49, 2  ;;  %v4689_v42 = vrot.slane %v4499_v49, 3  ;;  %v4693_v46 = vrot.slane %v4499_v49, 4  ;;  %v5464_v28 = vpop.eup %5463 }
 0x41b   :  { %v3951_v61 = vpack.c.bf16 %v3877_v4, %v3877_v4  ;;  %v4675_v34 = vsel %vm4545_vm8, %v4674_v20, %v4673_v45  ;;  %v4304_v63 = vmul.f32 0.5, %v8238_v44  ;;  %v4451_v18 = vadd.f32 1.0, %v5464_v28  ;;  %v8344_v28 = vld [vmem:[%s8715_s2] ss:$0 sm:$0xff] }
 0x41c   :  { %5303 = vmatmul.mubr.msk.bf16.gmra.mxu0 %vm3979_vm4, %v3939_v41  ;;  %v4691_v48 = vsel %vm4536_vm5, %v4679_v25, 0.0  ;;  %v4702_v32 = vsel %vm4536_vm5, %v4689_v42, 0.0  ;;  %5465 = verf.f32 %v4375_v53  ;;  %v4704_v21 = vrot.slane %v4499_v49, 5 }
 0x41d   :  { %5351 = vmatmul.mubr.msk.bf16.gmra.mxu1 %vm3979_vm4, %v3951_v61  ;;  %v4692_v37 = vsel %vm8758_vm11, %v4689_v42, %v4691_v48  ;;  %v4703_v26 = vsel %vm8759_vm12, %v4693_v46, %v4702_v32  ;;  %v4241_v60 = vadd.f32 %v7847_v8, %v8260_v19  ;;  %v4676_v2 = vsel %vm4548_vm9, %v8256_v59, %v4675_v34  ;;  %vm8760_vm4 = vmmov %vm8753_vm1 }
 0x41e   :  { %v4686_v51 = vsel %vm4548_vm9, %v4677_v3, %v4685_v9  ;;  %v4500_v40 = vmul.f32 %v4451_v18, %v4304_v63  ;;  %v4376_v33 = vmul.f32 0.70710677, %v4238_v24  ;;  %v4687_v23 = vrot.slane %v8256_v59, 2  ;;  %vm8768_vm11 = vmmov %vm8767_vm0 }
 0x41f   :  { %v4694_v29 = vsel %vm4542_vm7, %v4693_v46, %v4692_v37  ;;  %v4705_v47 = vsel %vm4542_vm7, %v4704_v21, %v4703_v26  ;;  %v4678_v7 = vsel %vm8760_vm4, %v4677_v3, %v4676_v2  ;;  %v4377_v35 = vmul.f32 0.70710677, %v4241_v60  ;;  %vm8769_vm12 = vmmov %vm8767_vm0 }
 0x420   :  { %v4695_v44 = vrot.slane %v4500_v40, 5  ;;  %v4697_v31 = vrot.slane %v4500_v40, 6  ;;  %v4699_v1 = vrot.slane %v4500_v40, 7  ;;  %v4688_v19 = vsel %vm8761_vm14, %v4687_v23, %v4686_v51  ;;  %vm8770_vm4 = vmmov %vm8767_vm0 }
 0x421   :  { %v4680_v16 = vsel %vm4554_vm2, %v4679_v25, %v4678_v7  ;;  %5467 = verf.f32 %v4376_v33  ;;  %v4690_v59 = vsel %vm4554_vm2, %v4689_v42, %v4688_v19  ;;  %v4709_v38 = vrot.slane %v4500_v40, 1  ;;  %vm8771_vm14 = vmmov %vm8763_vm3 }
 0x422   :  { %v4696_v13 = vsel %vm4545_vm8, %v4695_v44, %v4694_v29  ;;  %v4706_v43 = vsel %vm4545_vm8, %v4697_v31, %v4705_v47  ;;  %5469 = verf.f32 %v4377_v35  ;;  %v5137_v52 = vmax.f32 %v4680_v16, %v4690_v59 }
 0x423   :  { %v4698_v20 = vsel %vm4548_vm9, %v4697_v31, %v4696_v13  ;;  %v4707_v14 = vsel %vm4548_vm9, %v4699_v1, %v4706_v43  ;;  %v4326_v41 = vmul.f32 0.5, %v8291_v12  ;;  %v4327_v46 = vmul.f32 0.5, %v4238_v24 }
 0x424   :  { %v4700_v10 = vsel %vm8762_vm15, %v4699_v1, %v4698_v20  ;;  %v4708_v6 = vsel %vm8753_vm1, %v4500_v40, %v4707_v14  ;;  %v4328_v34 = vmul.f32 0.5, %v4241_v60  ;;  %vm8772_vm15 = vmmov %vm8763_vm3 }
 0x425   :  { %v4701_v50 = vsel %vm4554_vm2, %v4500_v40, %v4700_v10  ;;  %v4710_v36 = vsel %vm4554_vm2, %v4709_v38, %v4708_v6  ;;  %vm8773_vm1 = vmmov %vm8763_vm3 }
 0x426   :  { %v5138_v39 = vmax.f32 %v4701_v50, %v4710_v36 }
 0x428   :  { %v5162_v15 = vmax.f32 %v5137_v52, %v5138_v39 }
 0x429   :  { %v5466_v17 = vpop.eup %5465 }
 0x42a   :  { %5176 = vst [vmem:[%s8716_s3 + $0x18] sm:$0x7f] %v5162_v15  ;;  %v4473_v49 = vadd.f32 1.0, %v5466_v17 }
 0x42c   :  { %v4522_v45 = vmul.f32 %v4473_v49, %v4326_v41 }
 0x42e   :  { %v5468_v5 = vpop.eup %5467  ;;  %v4964_v48 = vrot.slane %v4522_v45, 1  ;;  %v4966_v26 = vrot.slane %v4522_v45, 2  ;;  %v4963_v63 = vsel %vm4536_vm5, %v4522_v45, 0.0  ;;  %v4968_v29 = vrot.slane %v4522_v45, 3 }
 0x42f   :  { %v5470_v25 = vpop.eup %5469  ;;  %v4474_v42 = vadd.f32 1.0, %v5468_v5  ;;  %v4979_v35 = vrot.slane %v4522_v45, 4 }
 0x430   :  { %v4475_v32 = vadd.f32 1.0, %v5470_v25  ;;  %v4976_v18 = vsel %vm4536_vm5, %v4964_v48, 0.0  ;;  %v4965_v40 = vsel %vm8763_vm3, %v4964_v48, %v4963_v63  ;;  %vm8774_vm3 = vmmov %vm8767_vm0 }
 0x431   :  { %v4149_v55 = vpop.f32.mrf.mxu0  ;;  %v8347_v12 = vmul.f32 %v4474_v42, %v4327_v46  ;;  %v4977_v33 = vsel %vm8764_vm10, %v4966_v26, %v4976_v18  ;;  %v4967_v31 = vsel %vm4542_vm7, %v4966_v26, %v4965_v40  ;;  %vm8775_vm10 = vmmov %vm8767_vm0 }
 0x432   :  { %v4150_v62 = vadd.f32 %v7847_v8, %v4149_v55  ;;  %v4524_v21 = vmul.f32 %v4475_v32, %v4328_v34  ;;  %v4978_v19 = vsel %vm4542_vm7, %v4968_v29, %v4977_v33  ;;  %v4969_v38 = vsel %vm4545_vm8, %v4968_v29, %v4967_v31 }
 0x433   :  { %v5284_v54 = vpop.f32.mrf.mxu0  ;;  %v4983_v2 = vrot.slane %v8347_v12, 7  ;;  %v4974_v60 = vrot.slane %v8347_v12, 6  ;;  %v4970_v1 = vrot.slane %v8347_v12, 4  ;;  %v4972_v7 = vrot.slane %v8347_v12, 5 }
 0x434   :  { %v4354_v22 = vmul.f32 0.70710677, %v4150_v62  ;;  %v4986_v47 = vrot.slane %v4524_v21, 7  ;;  %v4989_v13 = vrot.slane %v4524_v21, 1  ;;  %v4980_v10 = vsel %vm4545_vm8, %v4979_v35, %v4978_v19 }
 0x435   :  { %v4152_v0 = vpop.f32.mrf.mxu0  ;;  %v4997_v44 = vsel %vm4536_vm5, %v4983_v2, 0.0  ;;  %v4985_v16 = vsel %vm4536_vm5, %v4974_v60, 0.0  ;;  %v4305_v6 = vmul.f32 0.5, %v4150_v62  ;;  %v4971_v36 = vsel %vm4548_vm9, %v4970_v1, %v4969_v38 }
 0x436   :  { %5471 = verf.f32 %v4354_v22  ;;  %v8339_v53 = vadd.f32 %v7847_v8, %v4152_v0  ;;  %v4987_v59 = vsel %vm8765_vm6, %v4986_v47, %v4985_v16  ;;  %v4998_v20 = vsel %vm8766_vm13, %v4524_v21, %v4997_v44  ;;  %vm8776_vm6 = vmmov %vm8773_vm1 }
 0x437   :  { %v5285_v4 = vpop.f32.mrf.mxu0  ;;  %v4981_v52 = vsel %vm4548_vm9, %v4972_v7, %v4980_v10  ;;  %v4991_v39 = vrot.slane %v4524_v21, 2  ;;  %v4988_v55 = vsel %vm4542_vm7, %v4524_v21, %v4987_v59  ;;  %v4999_v54 = vsel %vm4542_vm7, %v4989_v13, %v4998_v20  ;;  %vm8777_vm13 = vmmov %vm8767_vm0 }
 0x438   :  { %v4355_v24 = vmul.f32 0.70710677, %v8339_v53  ;;  %v4973_v5 = vsel %vm8767_vm0, %v4972_v7, %v4971_v36  ;;  %v4982_v62 = vsel %vm8768_vm11, %v4974_v60, %v4981_v52  ;;  %v4990_v42 = vsel %vm4545_vm8, %v4989_v13, %v4988_v55  ;;  %vm8778_vm11 = vmmov %vm8773_vm1 }
 0x439   :  { %v5000_v46 = vsel %vm4545_vm8, %v4991_v39, %v4999_v54  ;;  %v4992_v26 = vsel %vm4548_vm9, %v4991_v39, %v4990_v42  ;;  %v4306_v47 = vmul.f32 0.5, %v8339_v53 }
 0x43c   :  { %v4245_v61 = vpop.f32.mrf.mxu1 }
 0x43d   :  { %v4246_v3 = vadd.f32 %v8344_v28, %v4245_v61  ;;  %v5001_v61 = vrot.slane %v4524_v21, 3 }
 0x43e   :  { %v5332_v9 = vpop.f32.mrf.mxu1 }
 0x43f   :  { %v4378_v37 = vmul.f32 0.70710677, %v4246_v3  ;;  %v4329_v45 = vmul.f32 0.5, %v4246_v3  ;;  %v4984_v3 = vsel %vm4554_vm2, %v4983_v2, %v4982_v62 }
 0x440   :  { %v4248_v8 = vpop.f32.mrf.mxu1 }
 0x441   :  { %5473 = verf.f32 %v4378_v37  ;;  %v8365_v14 = vadd.f32 %v8344_v28, %v4248_v8  ;;  %v4975_v37 = vsel %vm4554_vm2, %v4974_v60, %v4973_v5 }
 0x442   :  { %v5333_v51 = vpop.f32.mrf.mxu1  ;;  %5475 = verf.f32 %v4355_v24  ;;  %v5002_v24 = vsel %vm4548_vm9, %v5001_v61, %v5000_v46  ;;  %v5151_v29 = vmax.f32 %v4975_v37, %v4984_v3 }
 0x443   :  { %v5472_v23 = vpop.eup %5471  ;;  %v4379_v49 = vmul.f32 0.70710677, %v8365_v14  ;;  %v4330_v3 = vmul.f32 0.5, %v8365_v14 }
 0x444   :  { %v4452_v43 = vadd.f32 1.0, %v5472_v23 }
 0x446   :  { %v4501_v17 = vmul.f32 %v4452_v43, %v4305_v6 }
 0x448   :  { %v4712_v48 = vrot.slane %v4501_v17, 1  ;;  %v4714_v8 = vrot.slane %v4501_v17, 2  ;;  %v4711_v51 = vsel %vm4536_vm5, %v4501_v17, 0.0  ;;  %v4716_v35 = vrot.slane %v4501_v17, 3 }
 0x449   :  { %v4727_v53 = vrot.slane %v4501_v17, 4 }
 0x44a   :  { %v4724_v40 = vsel %vm4536_vm5, %v4712_v48, 0.0  ;;  %v4713_v1 = vsel %vm8771_vm14, %v4712_v48, %v4711_v51  ;;  %vm8781_vm14 = vmmov %vm8773_vm1 }
 0x44b   :  { %v4725_v7 = vsel %vm8772_vm15, %v4714_v8, %v4724_v40  ;;  %v4715_v43 = vsel %vm4542_vm7, %v4714_v8, %v4713_v1  ;;  %vm8782_vm15 = vmmov %vm8773_vm1 }
 0x44c   :  { %v4157_v50 = vpop.f32.mrf.mxu0  ;;  %v4726_v59 = vsel %vm4542_vm7, %v4716_v35, %v4725_v7 }
 0x44d   :  { %v4158_v15 = vadd.f32 %v8344_v28, %v4157_v50  ;;  %v4717_v50 = vsel %vm4545_vm8, %v4716_v35, %v4715_v43  ;;  %v4728_v36 = vsel %vm4545_vm8, %v4727_v53, %v4726_v59 }
 0x44e   :  { %v5288_v22 = vpop.f32.mrf.mxu0  ;;  %v5474_v0 = vpop.eup %5473 }
 0x44f   :  { %v4356_v41 = vmul.f32 0.70710677, %v4158_v15  ;;  %v4476_v25 = vadd.f32 1.0, %v5474_v0  ;;  %v5476_v12 = vpop.eup %5475  ;;  %v4307_v54 = vmul.f32 0.5, %v4158_v15 }
 0x450   :  { %v4160_v4 = vpop.f32.mrf.mxu0  ;;  %v4453_v33 = vadd.f32 1.0, %v5476_v12 }
 0x451   :  { %5477 = verf.f32 %v4356_v41  ;;  %v8379_v9 = vmul.f32 %v4476_v25, %v4329_v45  ;;  %v8382_v34 = vadd.f32 %v8344_v28, %v4160_v4 }
 0x452   :  { %v5289_v32 = vpop.f32.mrf.mxu0  ;;  %5479 = verf.f32 %v4379_v49  ;;  %v4502_v16 = vmul.f32 %v4453_v33, %v4306_v47 }
 0x453   :  { %v4993_v63 = vrot.slane %v8379_v9, 3  ;;  %v8390_v18 = vrot.slane %v8379_v9, 4  ;;  %v8393_v21 = vrot.slane %v8379_v9, 5  ;;  %v4357_v2 = vmul.f32 0.70710677, %v8382_v34 }
 0x454   :  { %v4718_v20 = vrot.slane %v4502_v16, 4  ;;  %v4720_v38 = vrot.slane %v4502_v16, 5  ;;  %v4731_v52 = vrot.slane %v4502_v16, 7  ;;  %v4722_v49 = vrot.slane %v4502_v16, 6 }
 0x455   :  { %v4994_v60 = vsel %vm8769_vm12, %v4993_v63, %v4992_v26  ;;  %v5003_v23 = vsel %vm8770_vm4, %v8390_v18, %v5002_v24  ;;  %5481 = verf.f32 %v4357_v2  ;;  %v4308_v51 = vmul.f32 0.5, %v8382_v34  ;;  %vm8779_vm12 = vmmov %vm8773_vm1 }
 0x456   :  { %v4996_v44 = vsel %vm4554_vm2, %v8390_v18, %v4994_v60  ;;  %v5005_v31 = vsel %vm4554_vm2, %v8393_v21, %v5003_v23  ;;  %v4719_v5 = vsel %vm4548_vm9, %v4718_v20, %v4717_v50  ;;  %v4729_v62 = vsel %vm4548_vm9, %v4720_v38, %v4728_v36  ;;  %vm8780_vm4 = vmmov %vm8773_vm1 }
 0x457   :  { %v5152_v19 = vmax.f32 %v4996_v44, %v5005_v31  ;;  %v4745_v45 = vsel %vm4536_vm5, %v4731_v52, 0.0  ;;  %v4721_v12 = vsel %vm8774_vm3, %v4720_v38, %v4719_v5  ;;  %v4733_v37 = vsel %vm4536_vm5, %v4722_v49, 0.0  ;;  %vm8783_vm3 = vmmov %vm8767_vm0 }
 0x458   :  { %v4730_v8 = vsel %vm8775_vm10, %v4722_v49, %v4729_v62  ;;  %v4723_v47 = vsel %vm4554_vm2, %v4722_v49, %v4721_v12  ;;  %v5006_v43 = vsel %vm4536_vm5, %v8390_v18, 0.0  ;;  %v5018_v59 = vrot.slane %v8379_v9, 6  ;;  %vm8784_vm10 = vmmov %vm8767_vm0 }
 0x459   :  { %v5169_v13 = vmax.f32 %v5151_v29, %v5152_v19  ;;  %v4732_v44 = vsel %vm4554_vm2, %v4731_v52, %v4730_v8 }
 0x45b   :  { %5183 = vst [vmem:[%s8716_s3 + $0x50] sm:$0x7f] %v5169_v13  ;;  %v4253_v10 = vpop.f32.mrf.mxu1  ;;  %v5139_v13 = vmax.f32 %v4723_v47, %v4732_v44 }
 0x45c   :  { %v8416_v39 = vadd.f32 %v8344_v28, %v4253_v10 }
 0x45d   :  { %v5336_v17 = vpop.f32.mrf.mxu1 }
 0x45e   :  { %v5478_v6 = vpop.eup %5477  ;;  %v4380_v0 = vmul.f32 0.70710677, %v8416_v39 }
 0x45f   :  { %v5480_v55 = vpop.eup %5479  ;;  %v4454_v22 = vadd.f32 1.0, %v5478_v6  ;;  %v4256_v4 = vpop.f32.mrf.mxu1 }
 0x460   :  { %v4477_v25 = vadd.f32 1.0, %v5480_v55  ;;  %5483 = verf.f32 %v4380_v0  ;;  %v8423_v42 = vadd.f32 %v8344_v28, %v4256_v4  ;;  %v5017_v55 = vsel %vm4536_vm5, %v8393_v21, 0.0 }
 0x461   :  { %v4503_v41 = vmul.f32 %v4454_v22, %v4307_v54  ;;  %v5337_v32 = vpop.f32.mrf.mxu1  ;;  %v5007_v0 = vsel %vm8780_vm4, %v8393_v21, %v5006_v43  ;;  %vm8789_vm4 = vmmov %vm8773_vm1 }
 0x462   :  { %v4381_v26 = vmul.f32 0.70710677, %v8423_v42  ;;  %v5482_v24 = vpop.eup %5481  ;;  %v8436_v23 = vmul.f32 %v4477_v25, %v4330_v3  ;;  %v5019_v25 = vsel %vm8781_vm14, %v5018_v59, %v5017_v55  ;;  %v4332_v8 = vmul.f32 0.5, %v8423_v42  ;;  %vm8790_vm14 = vmmov %vm8767_vm0 }
 0x463   :  { %v4734_v46 = vrot.slane %v4503_v41, 7  ;;  %v4737_v15 = vrot.slane %v4503_v41, 1  ;;  %v4739_v61 = vrot.slane %v4503_v41, 2  ;;  %v4746_v48 = vsel %vm8773_vm1, %v4503_v41, %v4745_v45 }
 0x464   :  { %v4455_v2 = vadd.f32 1.0, %v5482_v24  ;;  %5485 = verf.f32 %v4381_v26  ;;  %v4749_v14 = vrot.slane %v4503_v41, 3  ;;  %v5008_v53 = vrot.slane %v8436_v23, 6 }
 0x465   :  { %v4735_v63 = vsel %vm8776_vm6, %v4734_v46, %v4733_v37  ;;  %v4747_v40 = vsel %vm4542_vm7, %v4737_v15, %v4746_v48  ;;  %v5010_v54 = vrot.slane %v8436_v23, 7  ;;  %vm8785_vm6 = vmmov %vm8767_vm0 }
 0x466   :  { %v4736_v33 = vsel %vm4542_vm7, %v4503_v41, %v4735_v63  ;;  %v4748_v60 = vsel %vm4545_vm8, %v4739_v61, %v4747_v40  ;;  %v4504_v31 = vmul.f32 %v4455_v2, %v4308_v51  ;;  %v4331_v41 = vmul.f32 0.5, %v8416_v39 }
 0x467   :  { %v4738_v29 = vsel %vm4545_vm8, %v4737_v15, %v4736_v33  ;;  %v4750_v1 = vsel %vm4548_vm9, %v4749_v14, %v4748_v60  ;;  %v5009_v46 = vsel %vm4542_vm7, %v5008_v53, %v5007_v0  ;;  %v5013_v40 = vrot.slane %v8436_v23, 1 }
 0x468   :  { %v4740_v34 = vsel %vm4548_vm9, %v4739_v61, %v4738_v29  ;;  %v4741_v7 = vrot.slane %v4504_v31, 3  ;;  %v4743_v19 = vrot.slane %v4504_v31, 4  ;;  %v4752_v35 = vrot.slane %v4504_v31, 5 }
 0x469   :  { %v4766_v16 = vrot.slane %v4504_v31, 6  ;;  %v5020_v61 = vsel %vm4542_vm7, %v5010_v54, %v5019_v25  ;;  %v5011_v39 = vsel %vm4545_vm8, %v5010_v54, %v5009_v46 }
 0x46a   :  { %v4742_v20 = vsel %vm8777_vm13, %v4741_v7, %v4740_v34  ;;  %v4751_v38 = vsel %vm8767_vm0, %v4743_v19, %v4750_v1  ;;  %v4754_v10 = vsel %vm4536_vm5, %v4743_v19, 0.0  ;;  %v4765_v6 = vsel %vm4536_vm5, %v4752_v35, 0.0  ;;  %vm8786_vm13 = vmmov %vm8767_vm0 }
 0x46b   :  { %v4744_v50 = vsel %vm4554_vm2, %v4743_v19, %v4742_v20  ;;  %v4753_v36 = vsel %vm4554_vm2, %v4752_v35, %v4751_v38  ;;  %v8454_v52 = vsel %vm8778_vm11, %v4752_v35, %v4754_v10  ;;  %v8457_v18 = vsel %vm8779_vm12, %v4766_v16, %v4765_v6  ;;  %v4165_v9 = vpop.f32.mrf.mxu0  ;;  %vm8787_vm11 = vmmov %vm8767_vm0 }
 0x46c   :  { %v5140_v22 = vmax.f32 %v4744_v50, %v4753_v36  ;;  %v4166_v17 = vadd.f32 %v8344_v28, %v4165_v9  ;;  %v5021_v24 = vsel %vm4545_vm8, %v8436_v23, %v5020_v61  ;;  %v5012_v14 = vsel %vm4548_vm9, %v8436_v23, %v5011_v39  ;;  %vm8788_vm12 = vmmov %vm8773_vm1 }
 0x46d   :  { %v5484_v49 = vpop.eup %5483  ;;  %v5292_v5 = vpop.f32.mrf.mxu0  ;;  %v5022_v31 = vsel %vm4548_vm9, %v5013_v40, %v5021_v24  ;;  %v5023_v1 = vrot.slane %v8436_v23, 2  ;;  %v5014_v16 = vsel %vm8783_vm3, %v5013_v40, %v5012_v14  ;;  %vm8792_vm3 = vmmov %vm8773_vm1 }
 0x46e   :  { %v5163_v62 = vmax.f32 %v5139_v13, %v5140_v22  ;;  %v4478_v4 = vadd.f32 1.0, %v5484_v49  ;;  %v4358_v45 = vmul.f32 0.70710677, %v4166_v17  ;;  %v4309_v49 = vmul.f32 0.5, %v4166_v17 }
 0x46f   :  { %v4168_v15 = vpop.f32.mrf.mxu0  ;;  %v5024_v43 = vsel %vm8784_vm10, %v5023_v1, %v5022_v31  ;;  %vm8793_vm10 = vmmov %vm8773_vm1 }
 0x470   :  { %5177 = vst [vmem:[%s8716_s3 + $0x20] sm:$0x7f] %v5163_v62  ;;  %v4527_v48 = vmul.f32 %v4478_v4, %v4331_v41  ;;  %5487 = verf.f32 %v4358_v45  ;;  %v4169_v21 = vadd.f32 %v8344_v28, %v4168_v15 }
 0x471   :  { %v5486_v32 = vpop.eup %5485  ;;  %v5293_v12 = vpop.f32.mrf.mxu0 }
 0x472   :  { %v5015_v37 = vrot.slane %v4527_v48, 2  ;;  %v5025_v3 = vrot.slane %v4527_v48, 3  ;;  %v5029_v26 = vrot.slane %v4527_v48, 4  ;;  %v4479_v63 = vadd.f32 1.0, %v5486_v32 }
 0x473   :  { %v4359_v51 = vmul.f32 0.70710677, %v4169_v21  ;;  %v5040_v60 = vrot.slane %v4527_v48, 5  ;;  %v4310_v25 = vmul.f32 0.5, %v4169_v21 }
 0x474   :  { %v5027_v33 = vsel %vm4536_vm5, %v5015_v37, 0.0  ;;  %v5038_v2 = vsel %vm4536_vm5, %v5025_v3, 0.0  ;;  %v4528_v44 = vmul.f32 %v4479_v63, %v4332_v8  ;;  %v5016_v13 = vsel %vm4554_vm2, %v5015_v37, %v5014_v16 }
 0x475   :  { %v5028_v29 = vsel %vm8782_vm15, %v5025_v3, %v5027_v33  ;;  %v5039_v47 = vsel %vm8773_vm1, %v5029_v26, %v5038_v2  ;;  %5489 = verf.f32 %v4359_v51  ;;  %v5026_v20 = vsel %vm4554_vm2, %v5025_v3, %v5024_v43  ;;  %vm8791_vm15 = vmmov %vm8767_vm0 }
 0x476   :  { %v5030_v42 = vsel %vm4542_vm7, %v5029_v26, %v5028_v29  ;;  %v5041_v34 = vsel %vm4542_vm7, %v5040_v60, %v5039_v47  ;;  %v5031_v7 = vrot.slane %v4528_v44, 5  ;;  %v5033_v19 = vrot.slane %v4528_v44, 6 }
 0x477   :  { %v5035_v35 = vrot.slane %v4528_v44, 7  ;;  %v5045_v23 = vrot.slane %v4528_v44, 1  ;;  %v5153_v54 = vmax.f32 %v5016_v13, %v5026_v20 }
 0x478   :  { %v5032_v59 = vsel %vm4545_vm8, %v5031_v7, %v5030_v42  ;;  %v5042_v53 = vsel %vm4545_vm8, %v5033_v19, %v5041_v34 }
 0x479   :  { %v5034_v38 = vsel %vm4548_vm9, %v5033_v19, %v5032_v59  ;;  %v5043_v10 = vsel %vm4548_vm9, %v5035_v35, %v5042_v53 }
 0x47a   :  { %v5036_v6 = vsel %vm8785_vm6, %v5035_v35, %v5034_v38  ;;  %v5044_v50 = vsel %vm8786_vm13, %v4528_v44, %v5043_v10  ;;  %vm8794_vm6 = vmmov %vm8767_vm0 }
 0x47b   :  { %v5037_v36 = vsel %vm4554_vm2, %v4528_v44, %v5036_v6  ;;  %v5046_v9 = vsel %vm4554_vm2, %v5045_v23, %v5044_v50  ;;  %vm8795_vm13 = vmmov %vm8767_vm0 }
 0x47c   :  { %v5154_v22 = vmax.f32 %v5037_v36, %v5046_v9 }
 0x47d   :  { %v5488_v55 = vpop.eup %5487 }
 0x47e   :  { %v4456_v0 = vadd.f32 1.0, %v5488_v55  ;;  %v5170_v5 = vmax.f32 %v5153_v54, %v5154_v22 }
 0x480   :  { %v4505_v62 = vmul.f32 %v4456_v0, %v4309_v49  ;;  %5184 = vst [vmem:[%s8716_s3 + $0x58] sm:$0x7f] %v5170_v5 }
 0x482   :  { %v4756_v41 = vrot.slane %v4505_v62, 6  ;;  %v4758_v4 = vrot.slane %v4505_v62, 7  ;;  %v5490_v45 = vpop.eup %5489  ;;  %v4761_v46 = vrot.slane %v4505_v62, 1  ;;  %v4771_v32 = vrot.slane %v4505_v62, 2 }
 0x483   :  { %v4457_v61 = vadd.f32 1.0, %v5490_v45 }
 0x484   :  { %v4768_v15 = vsel %vm4542_vm7, %v4758_v4, %v8457_v18  ;;  %v4757_v48 = vsel %vm4542_vm7, %v4756_v41, %v8454_v52 }
 0x485   :  { %v4769_v17 = vsel %vm4545_vm8, %v4505_v62, %v4768_v15  ;;  %v4759_v12 = vsel %vm4545_vm8, %v4758_v4, %v4757_v48  ;;  %v4506_v39 = vmul.f32 %v4457_v61, %v4310_v25 }
 0x486   :  { %v4760_v37 = vsel %vm4548_vm9, %v4505_v62, %v4759_v12  ;;  %v4770_v3 = vsel %vm4548_vm9, %v4761_v46, %v4769_v17 }
 0x487   :  { %v4762_v21 = vsel %vm8767_vm0, %v4761_v46, %v4760_v37  ;;  %v4772_v26 = vsel %vm8787_vm11, %v4771_v32, %v4770_v3  ;;  %v4763_v24 = vrot.slane %v4506_v39, 2  ;;  %v4773_v18 = vrot.slane %v4506_v39, 3  ;;  %vm8796_vm0 = vmmov %vm8773_vm1 }
 0x488   :  { %v4777_v1 = vrot.slane %v4506_v39, 4  ;;  %v4788_v10 = vrot.slane %v4506_v39, 5  ;;  %vm8797_vm11 = vmmov %vm8794_vm6 }
 0x489   :  { %v4764_v8 = vsel %vm4554_vm2, %v4763_v24, %v4762_v21  ;;  %v4774_v52 = vsel %vm4554_vm2, %v4773_v18, %v4772_v26  ;;  %v4775_v35 = vsel %vm4536_vm5, %v4763_v24, 0.0  ;;  %v4786_v16 = vsel %vm4536_vm5, %v4773_v18, 0.0 }
 0x48a   :  { %v5141_v63 = vmax.f32 %v4764_v8, %v4774_v52  ;;  %v4776_v59 = vsel %vm8788_vm12, %v4773_v18, %v4775_v35  ;;  %v4787_v53 = vsel %vm8789_vm4, %v4777_v1, %v4786_v16  ;;  %vm8798_vm12 = vmmov %vm8794_vm6 }
 0x48b   :  { %v4778_v36 = vsel %vm4542_vm7, %v4777_v1, %v4776_v59  ;;  %v4789_v9 = vsel %vm4542_vm7, %v4788_v10, %v4787_v53  ;;  %vm8799_vm4 = vmmov %vm8796_vm0 }
 0x495   :  { %v4261_v51 = vpop.f32.mrf.mxu1  ;;  %v4173_v40 = vpop.f32.mrf.mxu0 }
 0x496   :  { %v4174_v2 = vadd.f32 %v8344_v28, %v4173_v40  ;;  %v4262_v31 = vadd.f32 %v8344_v28, %v4261_v51 }
 0x497   :  { %v5340_v33 = vpop.f32.mrf.mxu1  ;;  %v5296_v60 = vpop.f32.mrf.mxu0 }
 0x498   :  { %v4360_v29 = vmul.f32 0.70710677, %v4174_v2  ;;  %v4382_v34 = vmul.f32 0.70710677, %v4262_v31  ;;  %v4311_v13 = vmul.f32 0.5, %v4174_v2  ;;  %v4333_v48 = vmul.f32 0.5, %v4262_v31 }
 0x499   :  { %v4264_v14 = vpop.f32.mrf.mxu1  ;;  %v4176_v47 = vpop.f32.mrf.mxu0 }
 0x49a   :  { %5491 = verf.f32 %v4360_v29  ;;  %v4265_v7 = vadd.f32 %v8344_v28, %v4264_v14  ;;  %v8537_v37 = vadd.f32 %v8344_v28, %v4176_v47 }
 0x49b   :  { %v5341_v44 = vpop.f32.mrf.mxu1  ;;  %v5297_v42 = vpop.f32.mrf.mxu0  ;;  %5493 = verf.f32 %v4382_v34 }
 0x49c   :  { %v4383_v38 = vmul.f32 0.70710677, %v4265_v7  ;;  %v4361_v51 = vmul.f32 0.70710677, %v8537_v37  ;;  %v4334_v47 = vmul.f32 0.5, %v4265_v7 }
 0x49e   :  { %5495 = verf.f32 %v4383_v38 }
 0x4a7   :  { %v5492_v19 = vpop.eup %5491 }
 0x4a8   :  { %v4458_v43 = vadd.f32 1.0, %v5492_v19  ;;  %v5494_v5 = vpop.eup %5493 }
 0x4a9   :  { %v4480_v46 = vadd.f32 1.0, %v5494_v5 }
 0x4aa   :  { %v4507_v20 = vmul.f32 %v4458_v43, %v4311_v13 }
 0x4ab   :  { %v4529_v12 = vmul.f32 %v4480_v46, %v4333_v48  ;;  %v5496_v8 = vpop.eup %5495 }
 0x4ac   :  { %v4779_v23 = vrot.slane %v4507_v20, 5  ;;  %v4781_v6 = vrot.slane %v4507_v20, 6  ;;  %v4783_v50 = vrot.slane %v4507_v20, 7  ;;  %v4793_v0 = vrot.slane %v4507_v20, 1 }
 0x4ad   :  { %v5048_v52 = vrot.slane %v4529_v12, 1  ;;  %v5047_v33 = vsel %vm4536_vm5, %v4529_v12, 0.0  ;;  %v5050_v2 = vrot.slane %v4529_v12, 2  ;;  %v4481_v60 = vadd.f32 1.0, %v5496_v8 }
 0x4ae   :  { %v4780_v55 = vsel %vm4545_vm8, %v4779_v23, %v4778_v36  ;;  %v4790_v54 = vsel %vm4545_vm8, %v4781_v6, %v4789_v9  ;;  %v5052_v1 = vrot.slane %v4529_v12, 3  ;;  %v5063_v13 = vrot.slane %v4529_v12, 4 }
 0x4af   :  { %v4782_v22 = vsel %vm4548_vm9, %v4781_v6, %v4780_v55  ;;  %v4791_v49 = vsel %vm4548_vm9, %v4783_v50, %v4790_v54  ;;  %v5060_v14 = vsel %vm4536_vm5, %v5048_v52, 0.0  ;;  %v5049_v44 = vsel %vm8773_vm1, %v5048_v52, %v5047_v33  ;;  %vm8802_vm1 = vmmov %vm8796_vm0 }
 0x4b0   :  { %v4784_v62 = vsel %vm8790_vm14, %v4783_v50, %v4782_v22  ;;  %v4792_v41 = vsel %vm8791_vm15, %v4507_v20, %v4791_v49  ;;  %v5061_v31 = vsel %vm8792_vm3, %v5050_v2, %v5060_v14  ;;  %v4530_v42 = vmul.f32 %v4481_v60, %v4334_v47  ;;  %vm8800_vm14 = vmmov %vm8796_vm0 }
 0x4b1   :  { %v4785_v4 = vsel %vm4554_vm2, %v4507_v20, %v4784_v62  ;;  %v4794_v45 = vsel %vm4554_vm2, %v4793_v0, %v4792_v41  ;;  %v5051_v19 = vsel %vm4542_vm7, %v5050_v2, %v5049_v44  ;;  %v5062_v35 = vsel %vm4542_vm7, %v5052_v1, %v5061_v31  ;;  %vm8801_vm15 = vmmov %vm8796_vm0 }
 0x4b2   :  { %v5142_v25 = vmax.f32 %v4785_v4, %v4794_v45  ;;  %v5054_v43 = vrot.slane %v4530_v42, 4  ;;  %v5053_v53 = vsel %vm4545_vm8, %v5052_v1, %v5051_v19  ;;  %v5056_v20 = vrot.slane %v4530_v42, 5  ;;  %vm8803_vm3 = vmmov %vm8796_vm0 }
 0x4b3   :  { %v5067_v38 = vrot.slane %v4530_v42, 7  ;;  %v5064_v10 = vsel %vm4545_vm8, %v5063_v13, %v5062_v35  ;;  %v5058_v36 = vrot.slane %v4530_v42, 6  ;;  %v4312_v14 = vmul.f32 0.5, %v8537_v37 }
 0x4b4   :  { %v5164_v61 = vmax.f32 %v5141_v63, %v5142_v25  ;;  %v5055_v55 = vsel %vm4548_vm9, %v5054_v43, %v5053_v53  ;;  %v5065_v49 = vsel %vm4548_vm9, %v5056_v20, %v5064_v10 }
 0x4b5   :  { %v4269_v15 = vpop.f32.mrf.mxu1  ;;  %v5081_v0 = vsel %vm4536_vm5, %v5067_v38, 0.0  ;;  %v5057_v46 = vsel %vm8794_vm6, %v5056_v20, %v5055_v55  ;;  %v5066_v48 = vsel %vm8795_vm13, %v5058_v36, %v5065_v49  ;;  %vm8805_vm13 = vmmov %vm8796_vm0 }
 0x4b6   :  { %5178 = vst [vmem:[%s8716_s3 + $0x28] sm:$0x7f] %v5164_v61  ;;  %v4270_v32 = vadd.f32 %v8344_v28, %v4269_v15  ;;  %v5069_v15 = vsel %vm4536_vm5, %v5058_v36, 0.0 }
 0x4b7   :  { %v5344_v17 = vpop.f32.mrf.mxu1 }
 0x4b8   :  { %v4384_v3 = vmul.f32 0.70710677, %v4270_v32  ;;  %v4335_v23 = vmul.f32 0.5, %v4270_v32 }
 0x4b9   :  { %v4272_v39 = vpop.f32.mrf.mxu1 }
 0x4ba   :  { %v4273_v21 = vadd.f32 %v8344_v28, %v4272_v39  ;;  %5497 = verf.f32 %v4384_v3 }
 0x4bb   :  { %v4181_v26 = vpop.f32.mrf.mxu0  ;;  %v5345_v24 = vpop.f32.mrf.mxu1 }
 0x4bc   :  { %v4385_v18 = vmul.f32 0.70710677, %v4273_v21  ;;  %v8546_v34 = vadd.f32 %v8344_v28, %v4181_v26  ;;  %v4336_v5 = vmul.f32 0.5, %v4273_v21 }
 0x4bd   :  { %v5300_v63 = vpop.f32.mrf.mxu0 }
 0x4be   :  { %5499 = verf.f32 %v4385_v18  ;;  %v4362_v7 = vmul.f32 0.70710677, %v8546_v34  ;;  %v5059_v63 = vsel %vm4554_vm2, %v5058_v36, %v5057_v46 }
 0x4bf   :  { %v4184_v40 = vpop.f32.mrf.mxu0  ;;  %5501 = verf.f32 %v4361_v51  ;;  %v5068_v51 = vsel %vm4554_vm2, %v5067_v38, %v5066_v48 }
 0x4c0   :  { %v8551_v16 = vadd.f32 %v8344_v28, %v4184_v40  ;;  %5503 = verf.f32 %v4362_v7  ;;  %v5155_v44 = vmax.f32 %v5059_v63, %v5068_v51 }
 0x4c1   :  { %v5301_v29 = vpop.f32.mrf.mxu0 }
 0x4c2   :  { %v4363_v9 = vmul.f32 0.70710677, %v8551_v16 }
 0x4c4   :  { %5505 = verf.f32 %v4363_v9 }
 0x4c7   :  { %v5498_v59 = vpop.eup %5497 }
 0x4c8   :  { %v4482_v6 = vadd.f32 1.0, %v5498_v59 }
 0x4ca   :  { %v4531_v54 = vmul.f32 %v4482_v6, %v4335_v23 }
 0x4cb   :  { %v5500_v50 = vpop.eup %5499 }
 0x4cc   :  { %v4483_v22 = vadd.f32 1.0, %v5500_v50  ;;  %v5070_v62 = vrot.slane %v4531_v54, 7  ;;  %v5073_v41 = vrot.slane %v4531_v54, 1  ;;  %v5075_v4 = vrot.slane %v4531_v54, 2  ;;  %v5502_v25 = vpop.eup %5501 }
 0x4cd   :  { %v5082_v45 = vsel %vm8793_vm10, %v4531_v54, %v5081_v0  ;;  %v5085_v32 = vrot.slane %v4531_v54, 3  ;;  %v4459_v24 = vadd.f32 1.0, %v5502_v25  ;;  %v5504_v13 = vpop.eup %5503  ;;  %v4314_v25 = vmul.f32 0.5, %v8551_v16  ;;  %vm8804_vm10 = vmmov %vm8794_vm6 }
 0x4ce   :  { %v8563_v61 = vmul.f32 %v4483_v22, %v4336_v5  ;;  %v5071_v17 = vsel %vm8796_vm0, %v5070_v62, %v5069_v15  ;;  %v5083_v12 = vsel %vm4542_vm7, %v5073_v41, %v5082_v45  ;;  %v4460_v10 = vadd.f32 1.0, %v5504_v13  ;;  %vm8806_vm0 = vmmov %vm8794_vm6 }
 0x4cf   :  { %v5072_v39 = vsel %vm4542_vm7, %v4531_v54, %v5071_v17  ;;  %v5084_v26 = vsel %vm4545_vm8, %v5075_v4, %v5083_v12  ;;  %v4508_v42 = vmul.f32 %v4459_v24, %v4312_v14  ;;  %v4313_v54 = vmul.f32 0.5, %v8546_v34 }
 0x4d0   :  { %v5077_v3 = vrot.slane %v8563_v61, 3  ;;  %v8571_v21 = vrot.slane %v8563_v61, 4  ;;  %v5074_v18 = vsel %vm4545_vm8, %v5073_v41, %v5072_v39  ;;  %v5086_v8 = vsel %vm4548_vm9, %v5085_v32, %v5084_v26 }
 0x4d1   :  { %v8577_v52 = vrot.slane %v8563_v61, 5  ;;  %v5076_v40 = vsel %vm4548_vm9, %v5075_v4, %v5074_v18  ;;  %v4796_v59 = vrot.slane %v4508_v42, 1  ;;  %v5506_v38 = vpop.eup %5505  ;;  %v4795_v9 = vsel %vm4536_vm5, %v4508_v42, 0.0 }
 0x4d2   :  { %v5087_v33 = vsel %vm8797_vm11, %v8571_v21, %v5086_v8  ;;  %v5078_v2 = vsel %vm8798_vm12, %v5077_v3, %v5076_v40  ;;  %v4798_v55 = vrot.slane %v4508_v42, 2  ;;  %v4461_v0 = vadd.f32 1.0, %v5506_v38  ;;  %vm8807_vm11 = vmmov %vm8806_vm0 }
 0x4d3   :  { %v5089_v60 = vsel %vm4554_vm2, %v8577_v52, %v5087_v33  ;;  %v5080_v29 = vsel %vm4554_vm2, %v8571_v21, %v5078_v2  ;;  %v4808_v49 = vsel %vm4536_vm5, %v4796_v59, 0.0  ;;  %v4509_v41 = vmul.f32 %v4460_v10, %v4313_v54  ;;  %vm8808_vm12 = vmmov %vm8806_vm0 }
 0x4d4   :  { %v4277_v47 = vpop.f32.mrf.mxu1  ;;  %v5156_v31 = vmax.f32 %v5080_v29, %v5089_v60  ;;  %v4797_v45 = vsel %vm8799_vm4, %v4796_v59, %v4795_v9  ;;  %v4809_v48 = vsel %vm8800_vm14, %v4798_v55, %v4808_v49  ;;  %v4800_v17 = vrot.slane %v4508_v42, 3  ;;  %vm8809_vm4 = vmmov %vm8806_vm0 }
 0x4d5   :  { %v4278_v1 = vadd.f32 %v8344_v28, %v4277_v47  ;;  %v8614_v32 = vmul.f32 %v4461_v0, %v4314_v25  ;;  %v4799_v39 = vsel %vm4542_vm7, %v4798_v55, %v4797_v45  ;;  %v4815_v3 = vrot.slane %v4509_v41, 7  ;;  %vm8810_vm14 = vmmov %vm8802_vm1 }
 0x4d6   :  { %v5348_v19 = vpop.f32.mrf.mxu1  ;;  %v5171_v35 = vmax.f32 %v5155_v44, %v5156_v31  ;;  %v4802_v24 = vrot.slane %v4509_v41, 4  ;;  %v4804_v18 = vrot.slane %v4509_v41, 5  ;;  %v4810_v16 = vsel %vm4542_vm7, %v4800_v17, %v4809_v48 }
 0x4d7   :  { %v4386_v7 = vmul.f32 0.70710677, %v4278_v1  ;;  %v4811_v8 = vrot.slane %v4508_v42, 4  ;;  %v4806_v63 = vrot.slane %v4509_v41, 6  ;;  %v4818_v51 = vrot.slane %v8614_v32, 7 }
 0x4d8   :  { %v4280_v43 = vpop.f32.mrf.mxu1  ;;  %5185 = vst [vmem:[%s8716_s3 + $0x60] sm:$0x7f] %v5171_v35  ;;  %v4801_v40 = vsel %vm4545_vm8, %v4800_v17, %v4799_v39  ;;  %v4829_v2 = vsel %vm4536_vm5, %v4815_v3, 0.0  ;;  %v5090_v14 = vsel %vm4536_vm5, %v8571_v21, 0.0  ;;  %v4821_v31 = vrot.slane %v8614_v32, 1 }
 0x4d9   :  { %v8595_v37 = vadd.f32 %v8344_v28, %v4280_v43  ;;  %5507 = verf.f32 %v4386_v7  ;;  %v4812_v33 = vsel %vm4545_vm8, %v4811_v8, %v4810_v16  ;;  %v4803_v29 = vsel %vm4548_vm9, %v4802_v24, %v4801_v40 }
 0x4da   :  { %v5349_v20 = vpop.f32.mrf.mxu1  ;;  %v4813_v47 = vsel %vm4548_vm9, %v4804_v18, %v4812_v33  ;;  %v4817_v44 = vsel %vm4536_vm5, %v4806_v63, 0.0  ;;  %v4337_v42 = vmul.f32 0.5, %v4278_v1  ;;  %v5102_v35 = vrot.slane %v8563_v61, 6 }
 0x4db   :  { %v4387_v50 = vmul.f32 0.70710677, %v8595_v37  ;;  %v4819_v13 = vsel %vm8801_vm15, %v4818_v51, %v4817_v44  ;;  %v4830_v43 = vsel %vm8802_vm1, %v8614_v32, %v4829_v2  ;;  %v5091_v21 = vsel %vm8803_vm3, %v8577_v52, %v5090_v14  ;;  %vm8811_vm15 = vmmov %vm8802_vm1 }
 0x4dc   :  { %v4189_v53 = vpop.f32.mrf.mxu0  ;;  %v5101_v59 = vsel %vm4536_vm5, %v8577_v52, 0.0  ;;  %v4814_v1 = vsel %vm8794_vm6, %v4806_v63, %v4813_v47  ;;  %v4823_v61 = vrot.slane %v8614_v32, 2  ;;  %v4338_v10 = vmul.f32 0.5, %v8595_v37  ;;  %vm8812_vm3 = vmmov %vm8802_vm1 }
 0x4dd   :  { %v8598_v23 = vadd.f32 %v8344_v28, %v4189_v53  ;;  %v4285_v36 = vpop.f32.mrf.mxu1  ;;  %5509 = verf.f32 %v4387_v50  ;;  %v4805_v53 = vsel %vm8804_vm10, %v4804_v18, %v4803_v29  ;;  %v4820_v50 = vsel %vm4542_vm7, %v8614_v32, %v4819_v13  ;;  %vm8815_vm10 = vmmov %vm8806_vm0 }
 0x4de   :  { %v5304_v6 = vpop.f32.mrf.mxu0  ;;  %v8606_v4 = vadd.f32 %v8344_v28, %v4285_v36  ;;  %v4831_v55 = vsel %vm4542_vm7, %v4821_v31, %v4830_v43  ;;  %v5103_v52 = vsel %vm8805_vm13, %v5102_v35, %v5101_v59  ;;  %v4807_v0 = vsel %vm4554_vm2, %v4806_v63, %v4805_v53  ;;  %vm8816_vm6 = vmmov %vm8806_vm0 }
 0x4df   :  { %v4364_v22 = vmul.f32 0.70710677, %v8598_v23  ;;  %v5352_v62 = vpop.f32.mrf.mxu1  ;;  %v4315_v54 = vmul.f32 0.5, %v8598_v23  ;;  %v4833_v41 = vrot.slane %v8614_v32, 3  ;;  %v4822_v25 = vsel %vm4545_vm8, %v4821_v31, %v4820_v50 }
 0x4e0   :  { %v4192_v5 = vpop.f32.mrf.mxu0  ;;  %v4388_v26 = vmul.f32 0.70710677, %v8606_v4  ;;  %v4824_v18 = vsel %vm4548_vm9, %v4823_v61, %v4822_v25  ;;  %v4339_v16 = vmul.f32 0.5, %v8606_v4 }
 0x4e1   :  { %5511 = verf.f32 %v4364_v22  ;;  %v8611_v46 = vadd.f32 %v8344_v28, %v4192_v5  ;;  %v4288_v15 = vpop.f32.mrf.mxu1  ;;  %v4816_v5 = vsel %vm4554_vm2, %v4815_v3, %v4814_v1 }
 0x4e2   :  { %v5305_v34 = vpop.f32.mrf.mxu0  ;;  %5513 = verf.f32 %v4388_v26  ;;  %v5143_v24 = vmax.f32 %v4807_v0, %v4816_v5 }
 0x4e3   :  { %v5353_v12 = vpop.f32.mrf.mxu1  ;;  %v4365_v28 = vmul.f32 0.70710677, %v8611_v46  ;;  %v4832_v34 = vsel %vm4545_vm8, %v4823_v61, %v4831_v55  ;;  %v4316_v31 = vmul.f32 0.5, %v8611_v46 }
 0x4e4   :  { %v4834_v32 = vsel %vm4548_vm9, %v4833_v41, %v4832_v34 }
 0x4e5   :  { %5515 = verf.f32 %v4365_v28 }
 0x4e6   :  { %v5508_v60 = vpop.eup %5507 }
 0x4e7   :  { %v4484_v19 = vadd.f32 1.0, %v5508_v60 }
 0x4e9   :  { %v4533_v20 = vmul.f32 %v4484_v19, %v4337_v42 }
 0x4ea   :  { %v5510_v7 = vpop.eup %5509 }
 0x4eb   :  { %v4485_v6 = vadd.f32 1.0, %v5510_v7  ;;  %v5092_v36 = vrot.slane %v4533_v20, 6  ;;  %v5094_v9 = vrot.slane %v4533_v20, 7  ;;  %v5097_v15 = vrot.slane %v4533_v20, 1 }
 0x4ec   :  { %v5107_v2 = vrot.slane %v4533_v20, 2 }
 0x4ed   :  { %v4534_v49 = vmul.f32 %v4485_v6, %v4338_v10  ;;  %v5104_v37 = vsel %vm4542_vm7, %v5094_v9, %v5103_v52  ;;  %v5093_v62 = vsel %vm4542_vm7, %v5092_v36, %v5091_v21 }
 0x4ee   :  { %v5512_v38 = vpop.eup %5511  ;;  %v5105_v23 = vsel %vm4545_vm8, %v4533_v20, %v5104_v37  ;;  %v5095_v48 = vsel %vm4545_vm8, %v5094_v9, %v5093_v62 }
 0x4ef   :  { %v4462_v22 = vadd.f32 1.0, %v5512_v38  ;;  %v5099_v17 = vrot.slane %v4534_v49, 2  ;;  %v5109_v26 = vrot.slane %v4534_v49, 3  ;;  %v5514_v28 = vpop.eup %5513  ;;  %v5096_v51 = vsel %vm4548_vm9, %v4533_v20, %v5095_v48 }
 0x4f0   :  { %v5106_v40 = vsel %vm4548_vm9, %v5097_v15, %v5105_v23  ;;  %v5113_v29 = vrot.slane %v4534_v49, 4  ;;  %v5098_v35 = vsel %vm8808_vm12, %v5097_v15, %v5096_v51  ;;  %v4486_v59 = vadd.f32 1.0, %v5514_v28 }
 0x4f1   :  { %v4511_v45 = vmul.f32 %v4462_v22, %v4315_v54  ;;  %v5111_v44 = vsel %vm4536_vm5, %v5099_v17, 0.0  ;;  %v5122_v4 = vsel %vm4536_vm5, %v5109_v26, 0.0  ;;  %v5108_v13 = vsel %vm8809_vm4, %v5107_v2, %v5106_v40 }
 0x4f2   :  { %v5516_v33 = vpop.eup %5515  ;;  %v5112_v53 = vsel %vm8810_vm14, %v5109_v26, %v5111_v44  ;;  %v5123_v20 = vsel %vm8811_vm15, %v5113_v29, %v5122_v4  ;;  %v5124_v46 = vrot.slane %v4534_v49, 5  ;;  %v4535_v1 = vmul.f32 %v4486_v59, %v4339_v16 }
 0x4f3   :  { %v4825_v12 = vrot.slane %v4511_v45, 3  ;;  %v4827_v39 = vrot.slane %v4511_v45, 4  ;;  %v4836_v3 = vrot.slane %v4511_v45, 5  ;;  %v4850_v19 = vrot.slane %v4511_v45, 6 }
 0x4f4   :  { %v4463_v21 = vadd.f32 1.0, %v5516_v33  ;;  %v5100_v6 = vsel %vm4554_vm2, %v5099_v17, %v5098_v35  ;;  %v5110_v50 = vsel %vm4554_vm2, %v5109_v26, %v5108_v13  ;;  %v5114_v36 = vsel %vm4542_vm7, %v5113_v29, %v5112_v53 }
 0x4f5   :  { %v4826_v8 = vsel %vm8806_vm0, %v4825_v12, %v4824_v18  ;;  %v4835_v63 = vsel %vm8807_vm11, %v4827_v39, %v4834_v32  ;;  %v4838_v42 = vsel %vm4536_vm5, %v4827_v39, 0.0  ;;  %v4849_v43 = vsel %vm4536_vm5, %v4836_v3, 0.0  ;;  %vm8813_vm5 = vmmov %vm8806_vm0 }
 0x4f6   :  { %v4828_v60 = vsel %vm4554_vm2, %v4827_v39, %v4826_v8  ;;  %v4837_v14 = vsel %vm4554_vm2, %v4836_v3, %v4835_v63  ;;  %v4512_v38 = vmul.f32 %v4463_v21, %v4316_v31  ;;  %v4839_v61 = vsel %vm8802_vm1, %v4836_v3, %v4838_v42 }
 0x4f7   :  { %v5144_v47 = vmax.f32 %v4828_v60, %v4837_v14  ;;  %v4851_v10 = vsel %vm8812_vm3, %v4850_v19, %v4849_v43  ;;  %v5125_v9 = vsel %vm4542_vm7, %v5124_v46, %v5123_v20  ;;  %v5115_v22 = vrot.slane %v4535_v1, 5 }
 0x4f8   :  { %v4840_v55 = vrot.slane %v4512_v38, 6  ;;  %v4842_v52 = vrot.slane %v4512_v38, 7  ;;  %v4845_v54 = vrot.slane %v4512_v38, 1  ;;  %v5117_v0 = vrot.slane %v4535_v1, 6 }
 0x4f9   :  { %v5165_v7 = vmax.f32 %v5143_v24, %v5144_v47  ;;  %v5119_v49 = vrot.slane %v4535_v1, 7  ;;  %v4855_v62 = vrot.slane %v4512_v38, 2  ;;  %v5129_v41 = vrot.slane %v4535_v1, 1 }
 0x4fa   :  { %v4841_v5 = vsel %vm4542_vm7, %v4840_v55, %v4839_v61  ;;  %v4852_v37 = vsel %vm4542_vm7, %v4842_v52, %v4851_v10  ;;  %v5116_v34 = vsel %vm4545_vm8, %v5115_v22, %v5114_v36  ;;  %v5126_v15 = vsel %vm4545_vm8, %v5117_v0, %v5125_v9  ;;  %vm8814_vm7 = vmmov %vm8806_vm0 }
 0x4fb   :  { %5179 = vst [vmem:[%s8716_s3 + $0x30] sm:$0x7f] %v5165_v7  ;;  %v4843_v45 = vsel %vm4545_vm8, %v4842_v52, %v4841_v5  ;;  %v4853_v25 = vsel %vm4545_vm8, %v4512_v38, %v4852_v37  ;;  %v5118_v17 = vsel %vm4548_vm9, %v5117_v0, %v5116_v34  ;;  %v5127_v12 = vsel %vm4548_vm9, %v5119_v49, %v5126_v15 }
 0x4fc   :  { %v4844_v23 = vsel %vm4548_vm9, %v4512_v38, %v4843_v45  ;;  %v4854_v48 = vsel %vm4548_vm9, %v4845_v54, %v4853_v25  ;;  %v5120_v26 = vsel %vm8815_vm10, %v5119_v49, %v5118_v17  ;;  %v5128_v24 = vsel %vm8816_vm6, %v4535_v1, %v5127_v12 }
 0x4fd   :  { %v4846_v39 = vsel %vm8813_vm5, %v4845_v54, %v4844_v23  ;;  %v4856_v3 = vsel %vm8814_vm7, %v4855_v62, %v4854_v48  ;;  %v5121_v16 = vsel %vm4554_vm2, %v4535_v1, %v5120_v26  ;;  %v5130_v28 = vsel %vm4554_vm2, %v5129_v41, %v5128_v24 }
 0x4fe   :  { %v4848_v18 = vsel %vm4554_vm2, %v4847_v27, %v4846_v39  ;;  %v4858_v32 = vsel %vm4554_vm2, %v7675_v11, %v4856_v3  ;;  %v5157_v8 = vmax.f32 %v5100_v6, %v5110_v50  ;;  %v5158_v51 = vmax.f32 %v5121_v16, %v5130_v28 }
 0x4ff   :  { %v5145_v63 = vmax.f32 %v4848_v18, %v4858_v32 }
 0x500   :  { %v5172_v33 = vmax.f32 %v5157_v8, %v5158_v51 }
 0x501   :  { %v5166_v40 = vmax.f32 %v5145_v63, %v5146_v57 }
 0x502   :  { %5186 = vst [vmem:[%s8716_s3 + $0x68] sm:$0x7f] %v5172_v33 }
 0x503   :  { %5180 = vst [vmem:[%s8716_s3 + $0x38] sm:$0x7f] %v5166_v40 }

</bundles_post_ra>
